<compile_context>
chip_gen: v7x
topology: tpu7x:2x2x1
jax: 0.10.0
libtpu: 0.0.40
codegen_flags: <defaults>
</compile_context>

<pallas_src>
import functools

import jax
import jax.numpy as jnp
import numpy as np
from jax import lax
from jax.experimental import pallas as pl
from jax.experimental.pallas import tpu as pltpu

_HIGHEST = jax.lax.Precision.HIGHEST


def _round_up(x, m):
    return ((x + m - 1) // m) * m


def _choose_tile(B, batch_tile):
    """Pick the batch tile.

    * cap at `batch_tile` (default 128): the (TB, n_e) per-level intermediates
      are the main vreg-pressure driver (v5e especially).
    * aim for >= 2 grid steps whenever B > 8 so the "parallel" grid axis can be
      sharded across both TensorCores on v7x.
    """
    tb = min(batch_tile, _round_up(B, 8))
    if B > 8 and _round_up(B, tb) // tb < 2:
        tb = min(tb, _round_up(pl.cdiv(B, 2), 8))
    return tb


def _rq_kernel(x_ref, cb_ref, csq_ref, y_ref, idx_ref, sse_ref, *,
               n_levels, n_e, distance_precision):
    """One batch tile: full residual-quantization cascade over all L levels.

    x_ref   : (TB, D)     f32  input tile
    cb_ref  : (L, n_e, D) f32  stacked codebooks (grid-invariant block)
    csq_ref : (L, n_e)    f32  precomputed ||codeword||^2 per level (invariant)
    y_ref   : (TB, D)     f32  reconstruction (sum of selected codewords)
    idx_ref : (TB, L)     i32  selected code index per level
    sse_ref : (TB, 1)     f32  per-row sum over levels of ||x_q - r||^2
    """
    r = x_ref[...].astype(jnp.float32)                 # residual, (TB, D)
    sse = jnp.zeros((r.shape[0], 1), jnp.float32)      # per-row loss partial

    iota_row = lax.broadcasted_iota(jnp.int32, (1, n_e), 1)   # (1, n_e)

    for l in range(n_levels):                          # L is small & static
        cb = cb_ref[l]                                 # (n_e, D)
        c_sq = csq_ref[pl.ds(l, 1), :]                 # (1, n_e)

        # argmin_j ||r_i - c_j||^2 == argmin_j (||c_j||^2 - 2 <r_i, c_j>)
        # (the per-row ||r_i||^2 term cannot change the argmin -> dropped).
        rc = lax.dot_general(r, cb, (((1,), (1,)), ((), ())),
                             precision=distance_precision,
                             preferred_element_type=jnp.float32)   # (TB, n_e)
        d = c_sq - 2.0 * rc

        # First-occurrence argmin via min + broadcast iota (VPU + XLU reduce).
        dmin = jnp.min(d, axis=-1, keepdims=True)                  # (TB, 1)
        idx = jnp.min(jnp.where(d <= dmin, iota_row, n_e),
                      axis=-1, keepdims=True)                      # (TB, 1) i32

        # Exact one-hot of the selected code (handles ties like argmin).
        onehot = (iota_row == idx).astype(jnp.float32)             # (TB, n_e)

        # MXU gather of the selected codewords (kept exact f32).
        x_q = jnp.dot(onehot, cb, precision=_HIGHEST,
                      preferred_element_type=jnp.float32)          # (TB, D)

        # Store the index column directly; no extra matmul / convert.
        idx_ref[:, pl.ds(l, 1)] = idx

        # residual update; (x_q - r_l)^2 == r_{l+1}^2 so the loss uses new r.
        r = r - x_q
        sse = sse + jnp.sum(r * r, axis=-1, keepdims=True)

    # y = sum_l x_q_l == x - r_final (no per-level accumulator kept live).
    y_ref[...] = (x_ref[...].astype(jnp.float32) - r).astype(y_ref.dtype)
    sse_ref[...] = sse


def residual_quantize(x, codebooks, beta, *, batch_tile=128,
                      distance_precision=_HIGHEST):
    """x: (B, e_dim) f32; codebooks: (L, n_e, e_dim) f32.

    Returns (y:(B,e_dim), indices:(B,L) int32, mean_loss: scalar).
    `distance_precision=lax.Precision.DEFAULT` trades exact argmin on near-ties
    for ~3-6x less MXU work on v6e/v7x.
    """
    B, D = x.shape
    L, n_e, D2 = codebooks.shape
    assert D == D2
    assert n_e < (1 << 24)

    tb = _choose_tile(B, batch_tile)
    B_pad = _round_up(B, tb)
    if B_pad != B:
        x = jnp.pad(x, ((0, B_pad - B), (0, 0)))   # padded rows sliced off below
    num_tiles = B_pad // tb

    # Hoisted, grid-invariant ||codeword||^2 (tiny (L, n_e) VMEM resident).
    c_sq = jnp.sum(codebooks * codebooks, axis=-1)

    kernel = functools.partial(_rq_kernel, n_levels=L, n_e=n_e,
                               distance_precision=distance_precision)

    flops = int(L * B_pad * 4 * n_e * D)                # distance dot + gather
    bytes_accessed = int(4 * (2 * B_pad * D             # x in, y out
                              + L * n_e * D + L * n_e   # codebooks + c_sq
                              + L * B_pad + B_pad))     # indices + sse partials

    y, indices, sse_rows = pl.pallas_call(
        kernel,
        out_shape=(
            jax.ShapeDtypeStruct((B_pad, D), x.dtype),
            jax.ShapeDtypeStruct((B_pad, L), jnp.int32),
            jax.ShapeDtypeStruct((B_pad, 1), jnp.float32),
        ),
        grid_spec=pltpu.PrefetchScalarGridSpec(
            num_scalar_prefetch=0,
            grid=(num_tiles,),
            in_specs=[
                pl.BlockSpec((tb, D), lambda i: (i, 0)),
                pl.BlockSpec((L, n_e, D), lambda i: (0, 0, 0)),  # constant block
                pl.BlockSpec((L, n_e), lambda i: (0, 0)),        # constant block
            ],
            out_specs=[
                pl.BlockSpec((tb, D), lambda i: (i, 0)),
                pl.BlockSpec((tb, L), lambda i: (i, 0)),         # (B, L) indices
                pl.BlockSpec((tb, 1), lambda i: (i, 0)),         # per-row SSE
            ],
        ),
        compiler_params=pltpu.CompilerParams(
            dimension_semantics=("parallel",)),                  # no cross-step dep
        cost_estimate=pl.CostEstimate(
            flops=flops, transcendentals=0, bytes_accessed=bytes_accessed),
    )(x, codebooks, c_sq)

    y = y[:B]
    indices = indices[:B]                                        # (B, L)
    sse = jnp.sum(sse_rows[:B, 0])                               # excludes padding
    # (1+beta) because codebook_loss and commitment_loss are numerically equal in fwd.
    mean_loss = (1.0 + beta) * sse / (L * B * D)
    return y, indices, mean_loss


def _reference(x, codebooks, beta):
    """float64 numpy reference mirroring the PyTorch forward."""
    x = np.asarray(x, dtype=np.float64)
    cbs = np.asarray(codebooks, dtype=np.float64)
    r = x.copy()
    y = np.zeros_like(x)
    idxs, losses = [], []
    for l in range(cbs.shape[0]):
        cb = cbs[l]
        d = ((r * r).sum(axis=1, keepdims=True)
             + (cb * cb).sum(axis=1)[None, :]
             - 2.0 * r @ cb.T)
        idx = np.argmin(d, axis=-1)
        x_q = cb[idx]
        losses.append((1.0 + beta) * np.mean((x_q - r) ** 2))
        y = y + x_q
        r = r - x_q
        idxs.append(idx.astype(np.int32))
    return y, np.stack(idxs, axis=-1), float(np.mean(np.array(losses)))


if __name__ == "__main__":
    # Module config (ResidualQuantizer(codebook_size=[256,256,256], e_dim=32, beta=0.25))
    codebook_size = [256, 256, 256]
    e_dim = 32
    beta = 0.25
    L = len(codebook_size)
    n_e = codebook_size[0]

    key = jax.random.PRNGKey(0)
    kx, kc, kx2 = jax.random.split(key, 3)
    # Deterministic nn.Embedding-style init: U(-1/n_e, 1/n_e) per level.
    codebooks = jax.random.uniform(kc, (L, n_e, e_dim), dtype=jnp.float32,
                                   minval=-1.0 / n_e, maxval=1.0 / n_e)

    # Small shape consistent with the module: x (B, e_dim).
    B = 16
    x = jax.random.normal(kx, (B, e_dim), dtype=jnp.float32)
    y, indices, mean_loss = residual_quantize(x, codebooks, beta)
    jax.block_until_ready((y, indices, mean_loss))

    y_ref, idx_ref, loss_ref = _reference(x, codebooks, beta)
    np.testing.assert_allclose(np.asarray(y), y_ref, rtol=1e-5, atol=1e-5)
    np.testing.assert_array_equal(np.asarray(indices), idx_ref)
    np.testing.assert_allclose(float(mean_loss), loss_ref, rtol=1e-5, atol=1e-6)

    # Larger batch exercising the multi-tile grid + batch-padding path.
    B2 = 300
    x2 = jax.random.normal(kx2, (B2, e_dim), dtype=jnp.float32)
    y2, idx2, loss2 = residual_quantize(x2, codebooks, beta)
    jax.block_until_ready((y2, idx2, loss2))

    y2_ref, idx2_ref, loss2_ref = _reference(x2, codebooks, beta)
    np.testing.assert_allclose(np.asarray(y2), y2_ref, rtol=1e-5, atol=1e-5)
    np.testing.assert_array_equal(np.asarray(idx2), idx2_ref)
    np.testing.assert_allclose(float(loss2), loss2_ref, rtol=1e-5, atol=1e-6)

    print("KERNEL_OK")
</pallas_src>

<mosaic_0001>
module attributes {stable_mosaic.version = 11 : i64} {
  func.func @_rq_kernel(%arg0: i32, %arg1: memref<8x32xf32, #tpu.memory_space<vmem>>, %arg2: memref<3x256x32xf32, #tpu.memory_space<vmem>>, %arg3: memref<3x256xf32, #tpu.memory_space<vmem>>, %arg4: memref<8x32xf32, #tpu.memory_space<vmem>>, %arg5: memref<8x3xi32, #tpu.memory_space<vmem>>, %arg6: memref<8x1xf32, #tpu.memory_space<vmem>>) attributes {dimension_semantics = [#tpu.dimension_semantics<parallel>], iteration_bounds = array<i64: 2>, scalar_prefetch = 0 : i64, scratch_operands = 0 : i64, tpu.core_type = #tpu.core_type<tc>, window_params = [{transform_indices = @transform_0, window_bounds = array<i64: 8, 32>}, {pipeline_mode = #tpu.pipeline_mode<synchronous>, transform_indices = @transform_1, window_bounds = array<i64: 3, 256, 32>}, {pipeline_mode = #tpu.pipeline_mode<synchronous>, transform_indices = @transform_2, window_bounds = array<i64: 3, 256>}, {transform_indices = @transform_3, window_bounds = array<i64: 8, 32>}, {transform_indices = @transform_4, window_bounds = array<i64: 8, 3>}, {transform_indices = @transform_5, window_bounds = array<i64: 8, 1>}]} {
    %c0 = arith.constant 0 : index
    %c0_0 = arith.constant 0 : index
    %0 = vector.load %arg1[%c0, %c0_0] : memref<8x32xf32, #tpu.memory_space<vmem>>, vector<8x32xf32>
    %cst = arith.constant 0.000000e+00 : f32
    %1 = vector.broadcast %cst : f32 to vector<8x1xf32>
    %2 = tpu.iota {dimensions = array<i32: 1>} : vector<1x256xi32>
    %c0_1 = arith.constant 0 : index
    %c0_2 = arith.constant 0 : index
    %c0_3 = arith.constant 0 : index
    %3 = vector.load %arg2[%c0_1, %c0_2, %c0_3] : memref<3x256x32xf32, #tpu.memory_space<vmem>>, vector<1x256x32xf32>
    %4 = vector.shape_cast %3 : vector<1x256x32xf32> to vector<256x32xf32>
    %c0_4 = arith.constant 0 : index
    %c0_5 = arith.constant 0 : index
    %5 = vector.load %arg3[%c0_4, %c0_5] : memref<3x256xf32, #tpu.memory_space<vmem>>, vector<1x256xf32>
    %cst_6 = arith.constant dense<0.000000e+00> : vector<8x256xf32>
    %6 = tpu.matmul %0, %4, %cst_6 {dimension_numbers = #tpu.dot_dimension_numbers<[1], [1], [0], [0], [0, 0, 1, 0], [], []>, precision = #tpu.contract_precision<fp32>} : vector<8x32xf32>, vector<256x32xf32>, vector<8x256xf32> -> vector<8x256xf32>
    %cst_7 = arith.constant 2.000000e+00 : f32
    %7 = vector.broadcast %cst_7 : f32 to vector<8x256xf32>
    %8 = arith.mulf %7, %6 : vector<8x256xf32>
    %9 = vector.broadcast %5 : vector<1x256xf32> to vector<8x256xf32>
    %10 = arith.subf %9, %8 : vector<8x256xf32>
    %cst_8 = arith.constant dense<0x7F800000> : vector<8xf32>
    %11 = vector.multi_reduction <minimumf>, %10, %cst_8 [1] : vector<8x256xf32> to vector<8xf32>
    %12 = vector.shape_cast %11 : vector<8xf32> to vector<8x1xf32>
    %13 = vector.broadcast %12 : vector<8x1xf32> to vector<8x256xf32>
    %14 = arith.cmpf ole, %10, %13 : vector<8x256xf32>
    %c256_i32 = arith.constant 256 : i32
    %15 = vector.shape_cast %2 : vector<1x256xi32> to vector<1x256xi32>
    %16 = vector.broadcast %15 : vector<1x256xi32> to vector<8x256xi32>
    %17 = vector.broadcast %c256_i32 : i32 to vector<8x256xi32>
    %18 = arith.select %14, %16, %17 : vector<8x256xi1>, vector<8x256xi32>
    %cst_9 = arith.constant dense<2147483647> : vector<8xi32>
    %19 = vector.multi_reduction <minsi>, %18, %cst_9 [1] : vector<8x256xi32> to vector<8xi32>
    %20 = vector.shape_cast %19 : vector<8xi32> to vector<8x1xi32>
    %21 = vector.broadcast %2 : vector<1x256xi32> to vector<8x256xi32>
    %22 = vector.broadcast %20 : vector<8x1xi32> to vector<8x256xi32>
    %23 = arith.cmpi eq, %21, %22 : vector<8x256xi32>
    %24 = arith.extui %23 : vector<8x256xi1> to vector<8x256xi32>
    %25 = arith.sitofp %24 : vector<8x256xi32> to vector<8x256xf32>
    %cst_10 = arith.constant dense<0.000000e+00> : vector<8x32xf32>
    %26 = tpu.matmul %25, %4, %cst_10 {dimension_numbers = #tpu.dot_dimension_numbers<[1], [0], [0], [1], [0, 0, 1, 1], [], []>, precision = #tpu.contract_precision<fp32>} : vector<8x256xf32>, vector<256x32xf32>, vector<8x32xf32> -> vector<8x32xf32>
    %c0_11 = arith.constant 0 : index
    %c0_12 = arith.constant 0 : index
    %27 = vector.load %arg5[%c0_11, %c0_12] : memref<8x3xi32, #tpu.memory_space<vmem>>, vector<8x1xi32>
    tpu.vector_store %arg5[%c0_11, %c0_12], %20 {strides = array<i32>} : memref<8x3xi32, #tpu.memory_space<vmem>>, vector<8x1xi32>,
    %28 = arith.subf %0, %26 : vector<8x32xf32>
    %29 = arith.mulf %28, %28 : vector<8x32xf32>
    %cst_13 = arith.constant dense<0.000000e+00> : vector<8xf32>
    %30 = vector.multi_reduction <add>, %29, %cst_13 [1] : vector<8x32xf32> to vector<8xf32>
    %31 = vector.shape_cast %30 : vector<8xf32> to vector<8x1xf32>
    %32 = arith.addf %1, %31 : vector<8x1xf32>
    %c1 = arith.constant 1 : index
    %c0_14 = arith.constant 0 : index
    %c0_15 = arith.constant 0 : index
    %33 = vector.load %arg2[%c1, %c0_14, %c0_15] : memref<3x256x32xf32, #tpu.memory_space<vmem>>, vector<1x256x32xf32>
    %34 = vector.shape_cast %33 : vector<1x256x32xf32> to vector<256x32xf32>
    %c1_16 = arith.constant 1 : index
    %c0_17 = arith.constant 0 : index
    %35 = vector.load %arg3[%c1_16, %c0_17] : memref<3x256xf32, #tpu.memory_space<vmem>>, vector<1x256xf32>
    %cst_18 = arith.constant dense<0.000000e+00> : vector<8x256xf32>
    %36 = tpu.matmul %28, %34, %cst_18 {dimension_numbers = #tpu.dot_dimension_numbers<[1], [1], [0], [0], [0, 0, 1, 0], [], []>, precision = #tpu.contract_precision<fp32>} : vector<8x32xf32>, vector<256x32xf32>, vector<8x256xf32> -> vector<8x256xf32>
    %cst_19 = arith.constant 2.000000e+00 : f32
    %37 = vector.broadcast %cst_19 : f32 to vector<8x256xf32>
    %38 = arith.mulf %37, %36 : vector<8x256xf32>
    %39 = vector.broadcast %35 : vector<1x256xf32> to vector<8x256xf32>
    %40 = arith.subf %39, %38 : vector<8x256xf32>
    %cst_20 = arith.constant dense<0x7F800000> : vector<8xf32>
    %41 = vector.multi_reduction <minimumf>, %40, %cst_20 [1] : vector<8x256xf32> to vector<8xf32>
    %42 = vector.shape_cast %41 : vector<8xf32> to vector<8x1xf32>
    %43 = vector.broadcast %42 : vector<8x1xf32> to vector<8x256xf32>
    %44 = arith.cmpf ole, %40, %43 : vector<8x256xf32>
    %c256_i32_21 = arith.constant 256 : i32
    %45 = vector.shape_cast %2 : vector<1x256xi32> to vector<1x256xi32>
    %46 = vector.broadcast %45 : vector<1x256xi32> to vector<8x256xi32>
    %47 = vector.broadcast %c256_i32_21 : i32 to vector<8x256xi32>
    %48 = arith.select %44, %46, %47 : vector<8x256xi1>, vector<8x256xi32>
    %cst_22 = arith.constant dense<2147483647> : vector<8xi32>
    %49 = vector.multi_reduction <minsi>, %48, %cst_22 [1] : vector<8x256xi32> to vector<8xi32>
    %50 = vector.shape_cast %49 : vector<8xi32> to vector<8x1xi32>
    %51 = vector.broadcast %2 : vector<1x256xi32> to vector<8x256xi32>
    %52 = vector.broadcast %50 : vector<8x1xi32> to vector<8x256xi32>
    %53 = arith.cmpi eq, %51, %52 : vector<8x256xi32>
    %54 = arith.extui %53 : vector<8x256xi1> to vector<8x256xi32>
    %55 = arith.sitofp %54 : vector<8x256xi32> to vector<8x256xf32>
    %cst_23 = arith.constant dense<0.000000e+00> : vector<8x32xf32>
    %56 = tpu.matmul %55, %34, %cst_23 {dimension_numbers = #tpu.dot_dimension_numbers<[1], [0], [0], [1], [0, 0, 1, 1], [], []>, precision = #tpu.contract_precision<fp32>} : vector<8x256xf32>, vector<256x32xf32>, vector<8x32xf32> -> vector<8x32xf32>
    %c0_24 = arith.constant 0 : index
    %c1_25 = arith.constant 1 : index
    %57 = vector.load %arg5[%c0_24, %c1_25] : memref<8x3xi32, #tpu.memory_space<vmem>>, vector<8x1xi32>
    tpu.vector_store %arg5[%c0_24, %c1_25], %50 {strides = array<i32>} : memref<8x3xi32, #tpu.memory_space<vmem>>, vector<8x1xi32>,
    %58 = arith.subf %28, %56 : vector<8x32xf32>
    %59 = arith.mulf %58, %58 : vector<8x32xf32>
    %cst_26 = arith.constant dense<0.000000e+00> : vector<8xf32>
    %60 = vector.multi_reduction <add>, %59, %cst_26 [1] : vector<8x32xf32> to vector<8xf32>
    %61 = vector.shape_cast %60 : vector<8xf32> to vector<8x1xf32>
    %62 = arith.addf %32, %61 : vector<8x1xf32>
    %c2 = arith.constant 2 : index
    %c0_27 = arith.constant 0 : index
    %c0_28 = arith.constant 0 : index
    %63 = vector.load %arg2[%c2, %c0_27, %c0_28] : memref<3x256x32xf32, #tpu.memory_space<vmem>>, vector<1x256x32xf32>
    %64 = vector.shape_cast %63 : vector<1x256x32xf32> to vector<256x32xf32>
    %c2_29 = arith.constant 2 : index
    %c0_30 = arith.constant 0 : index
    %65 = vector.load %arg3[%c2_29, %c0_30] : memref<3x256xf32, #tpu.memory_space<vmem>>, vector<1x256xf32>
    %cst_31 = arith.constant dense<0.000000e+00> : vector<8x256xf32>
    %66 = tpu.matmul %58, %64, %cst_31 {dimension_numbers = #tpu.dot_dimension_numbers<[1], [1], [0], [0], [0, 0, 1, 0], [], []>, precision = #tpu.contract_precision<fp32>} : vector<8x32xf32>, vector<256x32xf32>, vector<8x256xf32> -> vector<8x256xf32>
    %cst_32 = arith.constant 2.000000e+00 : f32
    %67 = vector.broadcast %cst_32 : f32 to vector<8x256xf32>
    %68 = arith.mulf %67, %66 : vector<8x256xf32>
    %69 = vector.broadcast %65 : vector<1x256xf32> to vector<8x256xf32>
    %70 = arith.subf %69, %68 : vector<8x256xf32>
    %cst_33 = arith.constant dense<0x7F800000> : vector<8xf32>
    %71 = vector.multi_reduction <minimumf>, %70, %cst_33 [1] : vector<8x256xf32> to vector<8xf32>
    %72 = vector.shape_cast %71 : vector<8xf32> to vector<8x1xf32>
    %73 = vector.broadcast %72 : vector<8x1xf32> to vector<8x256xf32>
    %74 = arith.cmpf ole, %70, %73 : vector<8x256xf32>
    %c256_i32_34 = arith.constant 256 : i32
    %75 = vector.shape_cast %2 : vector<1x256xi32> to vector<1x256xi32>
    %76 = vector.broadcast %75 : vector<1x256xi32> to vector<8x256xi32>
    %77 = vector.broadcast %c256_i32_34 : i32 to vector<8x256xi32>
    %78 = arith.select %74, %76, %77 : vector<8x256xi1>, vector<8x256xi32>
    %cst_35 = arith.constant dense<2147483647> : vector<8xi32>
    %79 = vector.multi_reduction <minsi>, %78, %cst_35 [1] : vector<8x256xi32> to vector<8xi32>
    %80 = vector.shape_cast %79 : vector<8xi32> to vector<8x1xi32>
    %81 = vector.broadcast %2 : vector<1x256xi32> to vector<8x256xi32>
    %82 = vector.broadcast %80 : vector<8x1xi32> to vector<8x256xi32>
    %83 = arith.cmpi eq, %81, %82 : vector<8x256xi32>
    %84 = arith.extui %83 : vector<8x256xi1> to vector<8x256xi32>
    %85 = arith.sitofp %84 : vector<8x256xi32> to vector<8x256xf32>
    %cst_36 = arith.constant dense<0.000000e+00> : vector<8x32xf32>
    %86 = tpu.matmul %85, %64, %cst_36 {dimension_numbers = #tpu.dot_dimension_numbers<[1], [0], [0], [1], [0, 0, 1, 1], [], []>, precision = #tpu.contract_precision<fp32>} : vector<8x256xf32>, vector<256x32xf32>, vector<8x32xf32> -> vector<8x32xf32>
    %c0_37 = arith.constant 0 : index
    %c2_38 = arith.constant 2 : index
    %87 = vector.load %arg5[%c0_37, %c2_38] : memref<8x3xi32, #tpu.memory_space<vmem>>, vector<8x1xi32>
    tpu.vector_store %arg5[%c0_37, %c2_38], %80 {strides = array<i32>} : memref<8x3xi32, #tpu.memory_space<vmem>>, vector<8x1xi32>,
    %88 = arith.subf %58, %86 : vector<8x32xf32>
    %89 = arith.mulf %88, %88 : vector<8x32xf32>
    %cst_39 = arith.constant dense<0.000000e+00> : vector<8xf32>
    %90 = vector.multi_reduction <add>, %89, %cst_39 [1] : vector<8x32xf32> to vector<8xf32>
    %91 = vector.shape_cast %90 : vector<8xf32> to vector<8x1xf32>
    %92 = arith.addf %62, %91 : vector<8x1xf32>
    %c0_40 = arith.constant 0 : index
    %c0_41 = arith.constant 0 : index
    %93 = vector.load %arg1[%c0_40, %c0_41] : memref<8x32xf32, #tpu.memory_space<vmem>>, vector<8x32xf32>
    %94 = arith.subf %93, %88 : vector<8x32xf32>
    %c0_42 = arith.constant 0 : index
    %c0_43 = arith.constant 0 : index
    %95 = vector.load %arg4[%c0_42, %c0_43] : memref<8x32xf32, #tpu.memory_space<vmem>>, vector<8x32xf32>
    tpu.vector_store %arg4[%c0_42, %c0_43], %94 {strides = array<i32>} : memref<8x32xf32, #tpu.memory_space<vmem>>, vector<8x32xf32>,
    %c0_44 = arith.constant 0 : index
    %c0_45 = arith.constant 0 : index
    %96 = vector.load %arg6[%c0_44, %c0_45] : memref<8x1xf32, #tpu.memory_space<vmem>>, vector<8x1xf32>
    tpu.vector_store %arg6[%c0_44, %c0_45], %92 {strides = array<i32>} : memref<8x1xf32, #tpu.memory_space<vmem>>, vector<8x1xf32>,
    return
  }
  func.func @transform_0(%arg0: i32) -> (i32, i32) {
    %c0_i32 = arith.constant 0 : i32
    %c0_i32_0 = arith.constant 0 : i32
    return %arg0, %c0_i32 : i32, i32
  }
  func.func @transform_1(%arg0: i32) -> (i32, i32, i32) {
    %c0_i32 = arith.constant 0 : i32
    %c0_i32_0 = arith.constant 0 : i32
    %c0_i32_1 = arith.constant 0 : i32
    %c0_i32_2 = arith.constant 0 : i32
    return %c0_i32, %c0_i32_0, %c0_i32_1 : i32, i32, i32
  }
  func.func @transform_2(%arg0: i32) -> (i32, i32) {
    %c0_i32 = arith.constant 0 : i32
    %c0_i32_0 = arith.constant 0 : i32
    %c0_i32_1 = arith.constant 0 : i32
    return %c0_i32, %c0_i32_0 : i32, i32
  }
  func.func @transform_3(%arg0: i32) -> (i32, i32) {
    %c0_i32 = arith.constant 0 : i32
    %c0_i32_0 = arith.constant 0 : i32
    return %arg0, %c0_i32 : i32, i32
  }
  func.func @transform_4(%arg0: i32) -> (i32, i32) {
    %c0_i32 = arith.constant 0 : i32
    %c0_i32_0 = arith.constant 0 : i32
    return %arg0, %c0_i32 : i32, i32
  }
  func.func @transform_5(%arg0: i32) -> (i32, i32) {
    %c0_i32 = arith.constant 0 : i32
    %c0_i32_0 = arith.constant 0 : i32
    return %arg0, %c0_i32 : i32, i32
  }
}

</mosaic_0001>

<bundles_post_ra>
// kernel: tpu_custom_call.1
= control target key start
LH: loop header
LB: loop body
LE: loop exit
PB: predicated region body
PF: predicated region fallthrough
CT: control target
= control target key end

     0   :  { %11 = vsyncpa [#allocation3], 0  ;;  %s12673_s0 = inlined_call_operand.vmem [shape: f32[16,32], index: 0, kind: input, shape index: {}]   ;;  %s12674_s1 = inlined_call_operand.vmem [shape: f32[3,256,32], index: 1, kind: input, shape index: {}]   ;;  %s12675_s2 = inlined_call_operand.vmem [shape: f32[3,256], index: 2, kind: input, shape index: {}]   ;;  %s12676_s3 = inlined_call_operand.hbm [shape: f32[16,32], index: 3, kind: output, shape index: {0}]   ;;  %s12677_s4 = inlined_call_operand.vmem [shape: s32[16,3], index: 4, kind: output, shape index: {1}]   ;;  %s12678_s5 = inlined_call_operand.vmem [shape: f32[16,1], index: 5, kind: output, shape index: {2}]  }
   0x1   :  { %13 = vsyncpa [#allocation3 + $0x1], 0  ;;  %s8757_s18 = smov 0   ;;  %s8759_s19 = smov 0  }
   0x2   :  { %s8761_s20 = smov 0   ;;  %s8763_s21 = smov 0  }
   0x3 LB: > { %s8778_s22 = sadd.s32 4294967295, %s8722_s21   ;;  %s6092_s23 = sadd.s32 4294967294, %s8722_s21   ;;  %s8722_s21 = sphi %s8763_s21, %s14010_s21   ;;  %s8718_s20 = sphi %s8761_s20, %s14009_s20   ;;  %s8714_s19 = sphi %s8759_s19, %s14008_s19   ;;  %s8710_s18 = sphi %s8757_s18, %s14007_s18  }
   0x4   : > { %s8782_s24 = sadd.s32 1, %s8722_s21   ;;  %s94_s25 = sadd.s32 1, %s8718_s20 }
   0x5   : > { %s91_s26 = ssub.s32 %s8722_s21, %s8782_s24  ;;  %p104_p0 = scmp.ne.s32.totalorder %s8718_s20, %s8714_s19 }
   0x6   : > { %p92_p1 = scmp.eq.s32.totalorder %s91_s26, 0  ;;  %p105_p2 = scmp.eq.s32.totalorder %s8778_s22, 1 }
   0x7   : > { %p110_p3 = scmp.ne.s32.totalorder %s8714_s19, %s8710_s18  ;;  %p111_p4 = scmp.eq.s32.totalorder %s6092_s23, 1 }
   0x8   : > { %s8793_s27 = scalar_select %p92_p1, %s8718_s20, %s94_s25  }
   0x9   : > { %p8795_p5 = por %p105_p2, %p104_p0  ;;  %p8799_p6 = por %p111_p4, %p110_p3 }
   0xa   : > { %p6095_p7 = scmp.ge.s32.totalorder %s8722_s21, 1  ;;  %p194_p8 = scmp.lt.s32.totalorder %s8722_s21, 3 }
   0xc   : > { %p195_p9 = pnand %p6095_p7, %p194_p8 }
   0xe   : > { %198 = sbr.rel (%p195_p9) target bundleno = 4276 (0x10b4), region = 32 }
  0x15   : > { %v8808_v0 = vld [vmem:[%s12674_s1 + $0x80] sm:$0xff]  ;;  %v8813_v1 = vld [vmem:[%s12674_s1 + $0x88] sm:$0xff]  ;;  %vm278_vm0 = vcmask 261120   ;;  %v8840_v7 = vld [vmem:[%s12674_s1 + $0x90] sm:$0xff]  ;;  %p229_p10 = scmp.lt.s32.totalorder %s8778_s22, 1  ;;  %vm2139_vm5 = vcmask 7168  }
  0x16   : > { %13268 = vst [vmem:[#allocation5_spill] sm:$0xff] %v8808_v0  ;;  %13269 = vst [vmem:[#allocation6_spill] sm:$0xff] %v8813_v1  ;;  %v8818_v2 = vld [vmem:[%s12674_s1] sm:$0xff]  ;;  %v8822_v3 = vsel %vm278_vm0, %v8808_v0, 0  ;;  %v8826_v4 = vsel %vm278_vm0, %v8813_v1, 0  ;;  %v8831_v5 = vld [vmem:[%s12674_s1 + $0x8] sm:$0xff] }
  0x17   : > { %13270 = vst [vmem:[#allocation7_spill] sm:$0xff] %v8818_v2  ;;  %13271 = vst [vmem:[#allocation8_spill] sm:$0xff] %v8831_v5  ;;  %v8835_v6 = vsel %vm278_vm0, %v8818_v2, 0  ;;  %v8845_v8 = vld [vmem:[%s12674_s1 + $0x98] sm:$0xff]  ;;  %v12705_v9 = vand.u32 4294901760, %v8822_v3  ;;  %v12703_v10 = vand.u32 4294901760, %v8826_v4 }
  0x18   : > { %13272 = vst [vmem:[#allocation9_spill] sm:$0xff] %v8840_v7  ;;  %13273 = vst [vmem:[#allocation10_spill] sm:$0xff] %v8845_v8  ;;  %v8851_v11 = vsel %vm278_vm0, %v8831_v5, 0  ;;  %v12702_v12 = vand.u32 4294901760, %v8835_v6  ;;  %v8857_v13 = vld [vmem:[%s12674_s1 + $0x10] sm:$0xff]  ;;  %v8862_v14 = vld [vmem:[%s12674_s1 + $0x18] sm:$0xff] }
  0x19   : > { %13274 = vst [vmem:[#allocation11_spill] sm:$0xff] %v8857_v13  ;;  %13275 = vst [vmem:[#allocation12_spill] sm:$0xff] %v8862_v14  ;;  %v12701_v15 = vand.u32 4294901760, %v8851_v11  ;;  %v8867_v16 = vsel %vm278_vm0, %v8840_v7, 0  ;;  %v8871_v17 = vsel %vm278_vm0, %v8845_v8, 0  ;;  %v8875_v18 = vsel %vm278_vm0, %v8857_v13, 0 }
  0x1a   : > { %v8880_v19 = vsub.f32 %v8822_v3, %v12705_v9  ;;  %v8885_v20 = vsub.f32 %v8826_v4, %v12703_v10  ;;  %v8890_v21 = vsub.f32 %v8835_v6, %v12702_v12  ;;  %v12698_v22 = vand.u32 4294901760, %v8867_v16  ;;  %v8947_v43 = vld [vmem:[%s12674_s1 + $0xa0] sm:$0xff]  ;;  %v8952_v44 = vld [vmem:[%s12674_s1 + $0xa8] sm:$0xff]  ;;  %v8988_v63 = vld [vmem:[%s12674_s1 + $0xb0] sm:$0xff]  ;;  %s230_s7 = scalar_select %p229_p10, %s8778_s22, 1 }
  0x1b   : > { %v8896_v23 = vsub.f32 %v8851_v11, %v12701_v15  ;;  %v12697_v24 = vand.u32 4294901760, %v8871_v17  ;;  %v8901_v25 = vsel %vm278_vm0, %v8862_v14, 0  ;;  %v12694_v26 = vand.u32 4294901760, %v8875_v18  ;;  %13278 = vst [vmem:[#allocation15_spill] sm:$0xff] %v8947_v43  ;;  %13279 = vst [vmem:[#allocation16_spill] sm:$0xff] %v8952_v44  ;;  %v8967_v53 = vld [vmem:[%s12674_s1 + $0x20] sm:$0xff] }
  0x1c   : > { %v12688_v27 = vand.u32 4294901760, %v8880_v19  ;;  %v12687_v28 = vand.u32 4294901760, %v8885_v20  ;;  %v12684_v29 = vand.u32 4294901760, %v8890_v21  ;;  %v8910_v30 = vsub.f32 %v8867_v16, %v12698_v22  ;;  %13280 = vst [vmem:[#allocation17_spill] sm:$0xff] %v8967_v53  ;;  %v8972_v54 = vld [vmem:[%s12674_s1 + $0x28] sm:$0xff]  ;;  %13282 = vst [vmem:[#allocation19_spill] sm:$0xff] %v8988_v63 }
  0x1d   : > { %13276 = vst [vmem:[#allocation13_spill] sm:$0xff] %v8896_v23  ;;  %v12683_v31 = vand.u32 4294901760, %v8896_v23  ;;  %v8916_v32 = vsub.f32 %v8871_v17, %v12697_v24  ;;  %v12692_v33 = vand.u32 4294901760, %v8901_v25  ;;  %v8922_v34 = vsub.f32 %v8875_v18, %v12694_v26  ;;  %13281 = vst [vmem:[#allocation18_spill] sm:$0xff] %v8972_v54  ;;  %s9287_s14 = sshll.u32 %s230_s7, 3  ;;  %s6191_s26 = sshll.u32 %s8778_s22, 7 }
  0x1e   : > { %v602_v35 = vsub.f32 %v8880_v19, %v12688_v27  ;;  %v609_v36 = vsub.f32 %v8885_v20, %v12687_v28  ;;  %v490_v37 = vsub.f32 %v8890_v21, %v12684_v29  ;;  %v12682_v38 = vand.u32 4294901760, %v8910_v30  ;;  %s9345_s7 = scalar_lea.vmem %s12673_s0, %s9287_s14  ;;  %s10072_s15 = scalar_lea.vmem %s12677_s4, %s9287_s14 }
  0x1f   : > { %v497_v39 = vsub.f32 %v8896_v23, %v12683_v31  ;;  %v12681_v40 = vand.u32 4294901760, %v8916_v32  ;;  %v12680_v41 = vand.u32 4294901760, %v8922_v34  ;;  %v8942_v42 = vsub.f32 %v8901_v25, %v12692_v33  ;;  %s12632_s9 = scalar_lea.hbm %s12676_s3, %s6191_s26  ;;  %s8726_s11 = smov [#allocation2]  }
  0x20   : > { %v603_v45 = vand.u32 4294901760, %v602_v35  ;;  %v610_v46 = vand.u32 4294901760, %v609_v36  ;;  %v491_v47 = vand.u32 4294901760, %v490_v37  ;;  %v616_v48 = vsub.f32 %v8910_v30, %v12682_v38  ;;  %v8993_v35 = vld [vmem:[%s12674_s1 + $0xb8] sm:$0xff]  ;;  %s8664_s12 = sshll.u32 %s8726_s11, 4  ;;  %s8665_s12 = int_to_ptr.vmem [resolvable:$false] %s8664_s12 }
  0x21   : > { %13277 = vst [vmem:[#allocation14_spill] sm:$0xff] %v8942_v42  ;;  %v498_v49 = vand.u32 4294901760, %v497_v39  ;;  %v623_v50 = vsub.f32 %v8916_v32, %v12681_v40  ;;  %v504_v51 = vsub.f32 %v8922_v34, %v12680_v41  ;;  %v12679_v52 = vand.u32 4294901760, %v8942_v42  ;;  %13283 = vst [vmem:[#allocation20_spill] sm:$0xff] %v8993_v35  ;;  %s8666_s13 = scalar_lea.vmem %s8665_s12, 256 }
  0x22   : > { %v7468_v55 = vpack.c.bf16 %v610_v46, %v603_v45  ;;  %v617_v56 = vand.u32 4294901760, %v616_v48  ;;  %v8976_v57 = vsel %vm278_vm0, %v8947_v43, 0  ;;  %v8980_v58 = vsel %vm278_vm0, %v8952_v44, 0 }
  0x23   : > { %v7470_v59 = vpack.c.bf16 %v498_v49, %v491_v47  ;;  %v624_v60 = vand.u32 4294901760, %v623_v50  ;;  %v505_v61 = vand.u32 4294901760, %v504_v51  ;;  %v511_v62 = vsub.f32 %v8942_v42, %v12679_v52  ;;  %v9010_v50 = vld [vmem:[%s12674_s1 + $0x30] sm:$0xff] }
  0x24   : > { %7469 = vmatprep.subr.bf16.mxu0 %v7468_v55  ;;  %v12691_v36 = vand.u32 4294901760, %v8976_v57  ;;  %v12689_v37 = vand.u32 4294901760, %v8980_v58  ;;  %v8999_v39 = vsel %vm278_vm0, %v8967_v53, 0  ;;  %v9003_v45 = vsel %vm278_vm0, %v8972_v54, 0  ;;  %13284 = vst [vmem:[#allocation21_spill] sm:$0xff] %v9010_v50 }
  0x25   : > { %7471 = vmatpush3.bf16.xpose.msra.mxu0 %v7470_v59  ;;  %v7472_v46 = vpack.c.bf16 %v624_v60, %v617_v56  ;;  %v512_v47 = vand.u32 4294901760, %v511_v62  ;;  %v12686_v48 = vand.u32 4294901760, %v8999_v39  ;;  %v12685_v49 = vand.u32 4294901760, %v9003_v45  ;;  %v9033_v60 = vld [vmem:[%s12674_s1 + $0x38] sm:$0xff] }
  0x26   : > { %v9015_v51 = vsub.f32 %v8976_v57, %v12691_v36  ;;  %v9020_v55 = vsub.f32 %v8980_v58, %v12689_v37  ;;  %v9024_v56 = vsel %vm278_vm0, %v8988_v63, 0  ;;  %v9028_v59 = vsel %vm278_vm0, %v8993_v35, 0  ;;  %13287 = vst [vmem:[#allocation24_spill] sm:$0xff] %v9033_v60 }
  0x27   : > { %13286 = vst [vmem:[#allocation23_spill] sm:$0xff] %v9028_v59  ;;  %7473 = vmatprep.subr.bf16.mxu0 %v7472_v46  ;;  %v7474_v62 = vpack.c.bf16 %v512_v47, %v505_v61  ;;  %v9038_v52 = vsub.f32 %v8999_v39, %v12686_v48  ;;  %v9043_v41 = vsub.f32 %v9003_v45, %v12685_v49  ;;  %v12690_v40 = vand.u32 4294901760, %v9024_v56 }
  0x28   : > { %13285 = vst [vmem:[#allocation22_spill] sm:$0xff] %v9020_v55  ;;  %v12693_v38 = vand.u32 4294901760, %v9015_v51  ;;  %v12695_v31 = vand.u32 4294901760, %v9020_v55  ;;  %v12696_v29 = vand.u32 4294901760, %v9028_v59  ;;  %v9051_v61 = vsel %vm278_vm0, %v9010_v50, 0 }
  0x29   : > { %13288 = vst [vmem:[#allocation25_spill] sm:$0xff] %v9051_v61  ;;  %v12699_v46 = vand.u32 4294901760, %v9038_v52  ;;  %v12700_v47 = vand.u32 4294901760, %v9043_v41  ;;  %v9058_v49 = vsub.f32 %v9024_v56, %v12690_v40  ;;  %v9062_v48 = vsel %vm278_vm0, %v9033_v60, 0 }
  0x2a   : > { %13289 = vst [vmem:[#allocation26_spill] sm:$0xff] %v9062_v48  ;;  %v630_v28 = vsub.f32 %v9015_v51, %v12693_v38  ;;  %v637_v27 = vsub.f32 %v9020_v55, %v12695_v31  ;;  %v9073_v37 = vsub.f32 %v9028_v59, %v12696_v29  ;;  %v12704_v40 = vand.u32 4294901760, %v9051_v61  ;;  %v9087_v31 = vld [vmem:[%s12674_s1 + $0xc0] sm:$0xff] }
  0x2b   : > { %v518_v36 = vsub.f32 %v9038_v52, %v12699_v46  ;;  %v525_v33 = vsub.f32 %v9043_v41, %v12700_v47  ;;  %v12707_v38 = vand.u32 4294901760, %v9058_v49  ;;  %v12708_v26 = vand.u32 4294901760, %v9062_v48  ;;  %13291 = vst [vmem:[#allocation28_spill] sm:$0xff] %v9087_v31  ;;  %v9098_v47 = vld [vmem:[%s12674_s1 + $0xc8] sm:$0xff] }
  0x2c   : > { %13290 = vst [vmem:[#allocation27_spill] sm:$0xff] %v9073_v37  ;;  %v631_v29 = vand.u32 4294901760, %v630_v28  ;;  %v638_v24 = vand.u32 4294901760, %v637_v27  ;;  %v12706_v22 = vand.u32 4294901760, %v9073_v37  ;;  %v9093_v46 = vsub.f32 %v9051_v61, %v12704_v40  ;;  %13292 = vst [vmem:[#allocation29_spill] sm:$0xff] %v9098_v47 }
  0x2d   : > { %7475 = vmatpush3.bf16.xpose.msra.mxu0 %v7474_v62  ;;  %v519_v15 = vand.u32 4294901760, %v518_v36  ;;  %v526_v12 = vand.u32 4294901760, %v525_v33  ;;  %v644_v28 = vsub.f32 %v9058_v49, %v12707_v38  ;;  %v9106_v27 = vsub.f32 %v9062_v48, %v12708_v26  ;;  %v9119_v33 = vld [vmem:[%s12674_s1 + $0x40] sm:$0xff]  ;;  %v9124_v62 = vld [vmem:[%s12674_s1 + $0x48] sm:$0xff] }
  0x2e   : > { %v7476_v10 = vpack.c.bf16 %v638_v24, %v631_v29  ;;  %v651_v40 = vsub.f32 %v9073_v37, %v12706_v22  ;;  %v9114_v36 = vsel %vm278_vm0, %v9087_v31, 0  ;;  %13295 = vst [vmem:[#allocation32_spill] sm:$0xff] %v9119_v33  ;;  %13296 = vst [vmem:[#allocation33_spill] sm:$0xff] %v9124_v62  ;;  %v9129_v24 = vld [vmem:[%s12674_s1 + $0xd0] sm:$0xff]  ;;  %v9134_v26 = vsel %vm278_vm0, %v9098_v47, 0 }
  0x2f   : > { %13293 = vst [vmem:[#allocation30_spill] sm:$0xff] %v9106_v27  ;;  %13294 = vst [vmem:[#allocation31_spill] sm:$0xff] %v9114_v36  ;;  %v7478_v29 = vpack.c.bf16 %v526_v12, %v519_v15  ;;  %v645_v22 = vand.u32 4294901760, %v644_v28  ;;  %v12719_v38 = vand.u32 4294901760, %v9106_v27  ;;  %v13299_v31 = vand.u32 4294901760, %v9093_v46  ;;  %v9144_v12 = vld [vmem:[%s12674_s1 + $0xd8] sm:$0xff] }
  0x30   : > { %13297 = vst [vmem:[#allocation34_spill] sm:$0xff] %v9129_v24  ;;  %13298 = vst [vmem:[#allocation35_spill] sm:$0xff] %v9134_v26  ;;  %7477 = vmatprep.subr.bf16.mxu0 %v7476_v10  ;;  %v652_v9 = vand.u32 4294901760, %v651_v40  ;;  %v12728_v50 = vand.u32 4294901760, %v9114_v36  ;;  %v9151_v10 = vsel %vm278_vm0, %v9119_v33, 0  ;;  %v9159_v40 = vsel %vm278_vm0, %v9129_v24, 0 }
  0x31   : > { %v532_v60 = vsub.f32 %v9093_v46, %v13299_v31  ;;  %13300 = vst [vmem:[#allocation36_spill] sm:$0xff] %v9144_v12  ;;  %v539_v15 = vsub.f32 %v9106_v27, %v12719_v38  ;;  %13301 = vst [vmem:[#allocation37_spill] sm:$0xff] %v9151_v10  ;;  %v9155_v31 = vsel %vm278_vm0, %v9124_v62, 0  ;;  %v13304_v38 = vand.u32 4294901760, %v9134_v26  ;;  %v9174_v62 = vld [vmem:[%s12674_s1 + $0x50] sm:$0xff] }
  0x32   : > { %13302 = vst [vmem:[#allocation38_spill] sm:$0xff] %v9155_v31  ;;  %13303 = vst [vmem:[#allocation39_spill] sm:$0xff] %v9159_v40  ;;  %v7480_v28 = vpack.c.bf16 %v652_v9, %v645_v22  ;;  %v9164_v47 = vsub.f32 %v9114_v36, %v12728_v50  ;;  %v12733_v24 = vand.u32 4294901760, %v9151_v10  ;;  %v9180_v22 = vsel %vm278_vm0, %v9144_v12, 0 }
  0x33   : > { %v533_v35 = vand.u32 4294901760, %v532_v60  ;;  %v9169_v33 = vsub.f32 %v9134_v26, %v13304_v38  ;;  %13305 = vst [vmem:[#allocation40_spill] sm:$0xff] %v9174_v62  ;;  %v540_v63 = vand.u32 4294901760, %v539_v15  ;;  %13306 = vst [vmem:[#allocation41_spill] sm:$0xff] %v9180_v22  ;;  %v12740_v38 = vand.u32 4294901760, %v9159_v40  ;;  %v9189_v15 = vld [vmem:[%s12674_s1 + $0x58] sm:$0xff] }
  0x34   : > { %13307 = vst [vmem:[#allocation42_spill] sm:$0xff] %v9189_v15  ;;  %v9195_v12 = vsub.f32 %v9151_v10, %v12733_v24  ;;  %v13309_v60 = vand.u32 4294901760, %v9155_v31  ;;  %v9204_v54 = vsel %vm278_vm0, %v9174_v62, 0  ;;  %v13314_v53 = vand.u32 4294901760, %v9180_v22 }
  0x35   : > { %7479 = vmatpush3.bf16.xpose.msra.mxu0 %v7478_v29  ;;  %v7482_v9 = vpack.c.bf16 %v540_v63, %v533_v35  ;;  %13311 = vst [vmem:[#allocation45_spill] sm:$0xff] %v9204_v54  ;;  %v13312_v29 = vand.u32 4294901760, %v9164_v47  ;;  %v13313_v35 = vand.u32 4294901760, %v9169_v33  ;;  %v13318_v7 = vand.u32 4294901760, %v9204_v54 }
  0x36   : > { %13308 = vst [vmem:[#allocation43_spill] sm:$0xff] %v9195_v12  ;;  %v9200_v50 = vsub.f32 %v9155_v31, %v13309_v60  ;;  %7481 = vmatprep.subr.bf16.mxu0 %v7480_v28  ;;  %v9215_v60 = vsub.f32 %v9159_v40, %v12740_v38  ;;  %v9220_v44 = vsub.f32 %v9180_v22, %v13314_v53  ;;  %v12753_v28 = vand.u32 4294901760, %v9195_v12  ;;  %v9232_v38 = vld [vmem:[%s12674_s1 + $0xe0] sm:$0xff] }
  0x37   : > { %v658_v63 = vsub.f32 %v9164_v47, %v13312_v29  ;;  %v665_v24 = vsub.f32 %v9169_v33, %v13313_v35  ;;  %v9226_v29 = vsel %vm278_vm0, %v9189_v15, 0  ;;  %13316 = vst [vmem:[#allocation47_spill] sm:$0xff] %v9232_v38  ;;  %v9264_v8 = vsel %vm278_vm0, %v9232_v38, 0 }
  0x38   : > { %13310 = vst [vmem:[#allocation44_spill] sm:$0xff] %v9200_v50  ;;  %13315 = vst [vmem:[#allocation46_spill] sm:$0xff] %v9226_v29  ;;  %v12762_v53 = vand.u32 4294901760, %v9215_v60  ;;  %v546_v62 = vsub.f32 %v9195_v12, %v12753_v28  ;;  %v13317_v15 = vand.u32 4294901760, %v9200_v50  ;;  %v13321_v5 = vand.u32 4294901760, %v9220_v44 }
  0x39   : > { %v659_v43 = vand.u32 4294901760, %v658_v63  ;;  %v666_v14 = vand.u32 4294901760, %v665_v24  ;;  %v9249_v24 = vsub.f32 %v9204_v54, %v13318_v7  ;;  %v9254_v63 = vld [vmem:[%s12674_s1 + $0xe8] sm:$0xff]  ;;  %13322 = vst [vmem:[#allocation50_spill] sm:$0xff] %v9264_v8  ;;  %v13323_v0 = vand.u32 4294901760, %v9226_v29 }
  0x3a   : > { %v553_v35 = vsub.f32 %v9200_v50, %v13317_v15  ;;  %13320 = vst [vmem:[#allocation49_spill] sm:$0xff] %v9254_v63  ;;  %v672_v28 = vsub.f32 %v9215_v60, %v12762_v53  ;;  %v679_v15 = vsub.f32 %v9220_v44, %v13321_v5  ;;  %v547_v7 = vand.u32 4294901760, %v546_v62  ;;  %v9280_v5 = vld [vmem:[%s12674_s1 + $0x68] sm:$0xff] }
  0x3b   : > { %13319 = vst [vmem:[#allocation48_spill] sm:$0xff] %v9249_v24  ;;  %v7484_v13 = vpack.c.bf16 %v666_v14, %v659_v43  ;;  %v9270_v14 = vsub.f32 %v9226_v29, %v13323_v0  ;;  %v9275_v43 = vld [vmem:[%s12674_s1 + $0x60] sm:$0xff]  ;;  %13326 = vst [vmem:[#allocation53_spill] sm:$0xff] %v9280_v5  ;;  %v9284_v62 = vsel %vm278_vm0, %v9254_v63, 0  ;;  %v9294_v29 = vld [vmem:[%s12674_s1 + $0xf0] sm:$0xff]  ;;  %v9312_v38 = vsel %vm278_vm0, %v9280_v5, 0 }
  0x3c   : > { %v554_v2 = vand.u32 4294901760, %v553_v35  ;;  %13325 = vst [vmem:[#allocation52_spill] sm:$0xff] %v9275_v43  ;;  %13327 = vst [vmem:[#allocation54_spill] sm:$0xff] %v9284_v62  ;;  %v673_v0 = vand.u32 4294901760, %v672_v28  ;;  %v680_v53 = vand.u32 4294901760, %v679_v15  ;;  %v9299_v63 = vld [vmem:[%s12674_s1 + $0xf8] sm:$0xff] }
  0x3d   : > { %13324 = vst [vmem:[#allocation51_spill] sm:$0xff] %v9270_v14  ;;  %7483 = vmatpush3.bf16.xpose.msra.mxu0 %v7482_v9  ;;  %13328 = vst [vmem:[#allocation55_spill] sm:$0xff] %v9294_v29  ;;  %v13330_v9 = vand.u32 4294901760, %v9264_v8  ;;  %v9308_v15 = vsel %vm278_vm0, %v9275_v43, 0  ;;  %v13334_v1 = vand.u32 4294901760, %v9249_v24  ;;  %v9329_v5 = vld [vmem:[%s12674_s1 + $0x70] sm:$0xff] }
  0x3e   : > { %13329 = vst [vmem:[#allocation56_spill] sm:$0xff] %v9299_v63  ;;  %7485 = vmatprep.subr.bf16.mxu0 %v7484_v13  ;;  %v7486_v35 = vpack.c.bf16 %v554_v2, %v547_v7  ;;  %13332 = vst [vmem:[#allocation58_spill] sm:$0xff] %v9308_v15  ;;  %v13335_v13 = vand.u32 4294901760, %v9270_v14  ;;  %v13336_v7 = vand.u32 4294901760, %v9284_v62  ;;  %v9335_v22 = vsel %vm278_vm0, %v9294_v29, 0 }
  0x3f   : > { %v9304_v28 = vsub.f32 %v9264_v8, %v13330_v9  ;;  %13333 = vst [vmem:[#allocation59_spill] sm:$0xff] %v9312_v38  ;;  %v560_v54 = vsub.f32 %v9249_v24, %v13334_v1  ;;  %13338 = vst [vmem:[#allocation61_spill] sm:$0xff] %v9329_v5  ;;  %v13341_v8 = vand.u32 4294901760, %v9308_v15  ;;  %vm4042_vm12 = vcmask 15368  }
  0x40   : > { %v567_v2 = vsub.f32 %v9270_v14, %v13335_v13  ;;  %v9323_v9 = vsub.f32 %v9284_v62, %v13336_v7  ;;  %13339 = vst [vmem:[#allocation62_spill] sm:$0xff] %v9335_v22  ;;  %v9339_v13 = vsel %vm278_vm0, %v9299_v63, 0  ;;  %v7488_v7 = vpack.c.bf16 %v680_v53, %v673_v0  ;;  %v9357_v63 = vld [vmem:[%s12674_s1 + $0x78] sm:$0xff] }
  0x41   : > { %13331 = vst [vmem:[#allocation57_spill] sm:$0xff] %v9304_v28  ;;  %13340 = vst [vmem:[#allocation63_spill] sm:$0xff] %v9339_v13  ;;  %v9351_v1 = vsub.f32 %v9308_v15, %v13341_v8  ;;  %v13344_v62 = vand.u32 4294901760, %v9304_v28  ;;  %v13345_v53 = vand.u32 4294901760, %v9312_v38  ;;  %v9370_v8 = vsel %vm278_vm0, %v9329_v5, 0 }
  0x42   : > { %13337 = vst [vmem:[#allocation60_spill] sm:$0xff] %v9323_v9  ;;  %13343 = vst [vmem:[#allocation65_spill] sm:$0xff] %v9357_v63  ;;  %v561_v29 = vand.u32 4294901760, %v560_v54  ;;  %v13347_v15 = vand.u32 4294901760, %v9323_v9  ;;  %v13350_v36 = vand.u32 4294901760, %v9339_v13  ;;  %v9390_v54 = vsel %vm278_vm0, %v9357_v63, 0 }
  0x43   : > { %13342 = vst [vmem:[#allocation64_spill] sm:$0xff] %v9351_v1  ;;  %v686_v40 = vsub.f32 %v9304_v28, %v13344_v62  ;;  %v9365_v0 = vsub.f32 %v9312_v38, %v13345_v53  ;;  %v13348_v62 = vand.u32 4294901760, %v9335_v22  ;;  %v241_v53 = vld [vmem:[%s9345_s7] sm:$0xff]  ;;  %v568_v38 = vand.u32 4294901760, %v567_v2  ;;  %13352 = vst [vmem:[#allocation69_spill] sm:$0xff] %v9390_v54 }
  0x44   : > { %v693_v31 = vsub.f32 %v9323_v9, %v13347_v15  ;;  %v9386_v5 = vsub.f32 %v9339_v13, %v13350_v36  ;;  %v13353_v2 = vand.u32 4294901760, %v9351_v1  ;;  %v12798_v36 = vand.u32 4294901760, %v9390_v54 }
  0x45   : > { %13346 = vst [vmem:[#allocation66_spill] sm:$0xff] %v9365_v0  ;;  %v9379_v26 = vsub.f32 %v9335_v22, %v13348_v62  ;;  %7487 = vmatpush3.bf16.xpose.msra.mxu0 %v7486_v35  ;;  %v687_v15 = vand.u32 4294901760, %v686_v40  ;;  %v12797_v62 = vand.u32 4294901760, %v9370_v8  ;;  %v280_v13 = vsel %vm278_vm0, %v241_v53, 0 }
  0x46   : > { %13351 = vst [vmem:[#allocation68_spill] sm:$0xff] %v9386_v5  ;;  %v694_v10 = vand.u32 4294901760, %v693_v31  ;;  %7489 = vmatprep.subr.bf16.mxu0 %v7488_v7  ;;  %v574_v43 = vsub.f32 %v9351_v1, %v13353_v2  ;;  %v13354_v63 = vand.u32 4294901760, %v9365_v0  ;;  %v9411_v7 = vand.u32 4294901760, %v280_v13 }
  0x47   : > { %13349 = vst [vmem:[#allocation67_spill] sm:$0xff] %v9379_v26  ;;  %v12794_v48 = vand.u32 4294901760, %v9379_v26  ;;  %v9409_v35 = vsub.f32 %v9370_v8, %v12797_v62  ;;  %v7490_v2 = vpack.c.bf16 %v568_v38, %v561_v29  ;;  %v9416_v53 = vsub.f32 %v9390_v54, %v12798_v36 }
  0x48   : > { %v581_v40 = vsub.f32 %v9365_v0, %v13354_v63  ;;  %v7500_v63 = vpack.c.bf16 %v8885_v20, %v8880_v19  ;;  %v7502_v22 = vpack.c.bf16 %v8896_v23, %v8890_v21  ;;  %v575_v61 = vand.u32 4294901760, %v574_v43  ;;  %6260 = vmatprep.mubr.f32.mxu0 %v9411_v7 }
  0x49   : > { %v700_v31 = vsub.f32 %v9379_v26, %v12794_v48  ;;  %v7492_v48 = vpack.c.bf16 %v694_v10, %v687_v15  ;;  %v13355_v59 = vand.u32 4294901760, %v9386_v5  ;;  %v7504_v38 = vpack.c.bf16 %v8916_v32, %v8910_v30 }
  0x4a   : > { %v582_v29 = vand.u32 4294901760, %v581_v40  ;;  %v7506_v36 = vpack.c.bf16 %v8942_v42, %v8922_v34  ;;  %v7508_v54 = vpack.c.bf16 %v9020_v55, %v9015_v51  ;;  %v7510_v10 = vpack.c.bf16 %v9043_v41, %v9038_v52 }
  0x4b   : > { %v707_v62 = vsub.f32 %v9386_v5, %v13355_v59  ;;  %v701_v43 = vand.u32 4294901760, %v700_v31  ;;  %v7512_v59 = vpack.c.bf16 %v9073_v37, %v9058_v49  ;;  %v7514_v23 = vpack.c.bf16 %v9106_v27, %v9093_v46 }
  0x4c   : > { %v7516_v42 = vpack.c.bf16 %v9169_v33, %v9164_v47  ;;  %v7518_v55 = vpack.c.bf16 %v9200_v50, %v9195_v12  ;;  %v7520_v31 = vpack.c.bf16 %v9220_v44, %v9215_v60  ;;  %v7522_v37 = vpack.c.bf16 %v9270_v14, %v9249_v24 }
  0x4d   : > { %7491 = vmatpush3.bf16.xpose.msra.mxu0 %v7490_v2  ;;  %v708_v15 = vand.u32 4294901760, %v707_v62  ;;  %v7524_v27 = vpack.c.bf16 %v9323_v9, %v9304_v28  ;;  %v7526_v2 = vpack.c.bf16 %v9365_v0, %v9351_v1  ;;  %v7528_v40 = vpack.c.bf16 %v9386_v5, %v9379_v26 }
  0x4e   : > { %7493 = vmatprep.subr.bf16.mxu0 %v7492_v48  ;;  %v7530_v50 = vpack.c.bf16 %v9416_v53, %v9409_v35  ;;  %v13356_v12 = vand.u32 4294901760, %v8822_v3  ;;  %v13357_v48 = vand.u32 4294901760, %v8826_v4  ;;  %v13358_v14 = vand.u32 4294901760, %v8835_v6 }
  0x4f   : > { %v13359_v24 = vand.u32 4294901760, %v8851_v11  ;;  %v7494_v28 = vpack.c.bf16 %v582_v29, %v575_v61  ;;  %v13360_v0 = vand.u32 4294901760, %v9409_v35  ;;  %v13361_v26 = vand.u32 4294901760, %v9416_v53 }
  0x50   : > { %v9460_v62 = vpack.c.bf16 %v13357_v48, %v13356_v12  ;;  %v13362_v3 = vand.u32 4294901760, %v8867_v16  ;;  %v13363_v4 = vand.u32 4294901760, %v8871_v17  ;;  %v7496_v6 = vpack.c.bf16 %v708_v15, %v701_v43  ;;  %v13373_v15 = vld [vmem:[#allocation23_spill] sm:$0xff] }
  0x51   : > { %v9466_v9 = vpack.c.bf16 %v13359_v24, %v13358_v14  ;;  %v588_v5 = vsub.f32 %v9409_v35, %v13360_v0  ;;  %v595_v1 = vsub.f32 %v9416_v53, %v13361_v26  ;;  %v13364_v24 = vand.u32 4294901760, %v8875_v18 }
  0x52   : > { %v9478_v12 = vpack.c.bf16 %v13363_v4, %v13362_v3  ;;  %7437 = vmatprep.subr.bf16.mxu1 %v9460_v62  ;;  %v13365_v26 = vand.u32 4294901760, %v8901_v25  ;;  %v13366_v14 = vand.u32 4294901760, %v8976_v57  ;;  %v13367_v0 = vand.u32 4294901760, %v8980_v58  ;;  %v13381_v4 = vld [vmem:[#allocation35_spill] sm:$0xff] }
  0x53   : > { %7439 = vmatpush3.bf16.xpose.msra.mxu1 %v9466_v9  ;;  %v589_v11 = vand.u32 4294901760, %v588_v5  ;;  %v596_v61 = vand.u32 4294901760, %v595_v1  ;;  %v13368_v5 = vand.u32 4294901760, %v8880_v19  ;;  %v13369_v18 = vand.u32 4294901760, %v8885_v20  ;;  %v13375_v19 = vld [vmem:[#allocation25_spill] sm:$0xff] }
  0x54   : > { %7441 = vmatprep.subr.bf16.mxu1 %v9478_v12  ;;  %v9487_v16 = vpack.c.bf16 %v13365_v26, %v13364_v24  ;;  %v9493_v29 = vpack.c.bf16 %v13367_v0, %v13366_v14  ;;  %v13370_v25 = vand.u32 4294901760, %v8999_v39  ;;  %v13371_v1 = vand.u32 4294901760, %v9003_v45  ;;  %v13377_v39 = vld [vmem:[#allocation26_spill] sm:$0xff]  ;;  %v13389_v0 = vld [vmem:[#allocation41_spill] sm:$0xff] }
  0x55   : > { %7495 = vmatpush3.bf16.xpose.msra.mxu0 %v7494_v28  ;;  %v7498_v17 = vpack.c.bf16 %v596_v61, %v589_v11  ;;  %v7564_v28 = vpack.c.bf16 %v13369_v18, %v13368_v5  ;;  %v476_v58 = vsub.f32 %v280_v13, %v9411_v7  ;;  %v13372_v43 = vand.u32 4294901760, %v9024_v56  ;;  %v13379_v56 = vld [vmem:[#allocation31_spill] sm:$0xff]  ;;  %v13385_v61 = vld [vmem:[#allocation38_spill] sm:$0xff] }
  0x56   : > { %7497 = vmatprep.subr.bf16.mxu0 %v7496_v6  ;;  %v9505_v57 = vpack.c.bf16 %v13371_v1, %v13370_v25  ;;  %v13374_v48 = vand.u32 4294901760, %v13373_v15  ;;  %v13376_v20 = vand.u32 4294901760, %v13375_v19  ;;  %v13378_v45 = vand.u32 4294901760, %v13377_v39  ;;  %v13393_v25 = vld [vmem:[#allocation46_spill] sm:$0xff] }
  0x57   : > { %v13382_v6 = vand.u32 4294901760, %v13381_v4  ;;  %v13386_v24 = vand.u32 4294901760, %v13385_v61  ;;  %v13390_v5 = vand.u32 4294901760, %v13389_v0  ;;  %v13394_v1 = vand.u32 4294901760, %v13393_v25  ;;  %v13395_v15 = vld [vmem:[#allocation50_spill] sm:$0xff] }
  0x58   : > { %v9512_v3 = vpack.c.bf16 %v13374_v48, %v13372_v43  ;;  %v9521_v13 = vpack.c.bf16 %v13378_v45, %v13376_v20  ;;  %v13396_v48 = vand.u32 4294901760, %v13395_v15  ;;  %v13397_v19 = vld [vmem:[#allocation54_spill] sm:$0xff]  ;;  %v13401_v45 = vld [vmem:[#allocation59_spill] sm:$0xff] }
  0x59   : > { %v13398_v20 = vand.u32 4294901760, %v13397_v19  ;;  %v13403_v4 = vld [vmem:[#allocation62_spill] sm:$0xff]  ;;  %v13424_v19 = vld [vmem:[#allocation27_spill] sm:$0xff] }
  0x5b   : > { %7443 = vmatpush3.bf16.xpose.msra.mxu1 %v9487_v16  ;;  %v9555_v39 = vpack.c.bf16 %v13398_v20, %v13396_v48  ;;  %v13423_v48 = vand.u32 4294901760, %v9058_v49  ;;  %v13425_v20 = vand.u32 4294901760, %v13424_v19  ;;  %v13433_v49 = vld [vmem:[#allocation44_spill] sm:$0xff] }
  0x5c   : > { %7445 = vmatprep.subr.bf16.mxu1 %v9493_v29 }
  0x5d   : > { %7499 = vmatpush3.bf16.xpose.msra.mxu0 %v7498_v17  ;;  %v13387_v17 = vld [vmem:[#allocation39_spill] sm:$0xff] }
  0x5e   : > { %7501 = vmatprep.subr.bf16.mxu0 %v7500_v63  ;;  %v13380_v63 = vand.u32 4294901760, %v13379_v56  ;;  %v13388_v14 = vand.u32 4294901760, %v13387_v17  ;;  %v13402_v56 = vand.u32 4294901760, %v13401_v45 }
  0x60   : > { %v9527_v11 = vpack.c.bf16 %v13382_v6, %v13380_v63  ;;  %v9541_v18 = vpack.c.bf16 %v13390_v5, %v13388_v14  ;;  %v13404_v6 = vand.u32 4294901760, %v13403_v4  ;;  %v477_v14 = vand.u32 4294901760, %v476_v58 }
  0x61   : > { %v13430_v4 = vand.u32 4294901760, %v9169_v33 }
  0x63   : > { %7447 = vmatpush3.bf16.xpose.msra.mxu1 %v9505_v57 }
  0x64   : > { %7449 = vmatprep.subr.bf16.mxu1 %v9512_v3  ;;  %6261 = vmatmul.mubr.f32.vlgmr.msra.gmra.mrb[0].mxu0 %v9411_v7 }
  0x65   : > { %7503 = vmatpush3.bf16.xpose.msra.mxu0 %v7502_v22  ;;  %6294 = vmatprep.mubr.f32.mxu0 %v476_v58  ;;  %v13383_v22 = vld [vmem:[#allocation37_spill] sm:$0xff] }
  0x66   : > { %7505 = vmatprep.subr.bf16.mxu0 %v7504_v38  ;;  %v13384_v38 = vand.u32 4294901760, %v13383_v22  ;;  %v13405_v22 = vld [vmem:[#allocation63_spill] sm:$0xff] }
  0x68   : > { %v9535_v26 = vpack.c.bf16 %v13386_v24, %v13384_v38  ;;  %v13406_v38 = vand.u32 4294901760, %v13405_v22  ;;  %v13434_v22 = vand.u32 4294901760, %v13433_v49 }
  0x6a   : > { %v9569_v61 = vpack.c.bf16 %v13406_v38, %v13404_v6 }
  0x6b   : > { %7451 = vmatpush3.bf16.xpose.msra.mxu1 %v9521_v13 }
  0x6c   : > { %7453 = vmatprep.subr.bf16.mxu1 %v9527_v11 }
  0x6d   : > { %7507 = vmatpush3.bf16.xpose.msra.mxu0 %v7506_v36  ;;  %v13391_v36 = vld [vmem:[#allocation45_spill] sm:$0xff] }
  0x6e   : > { %7509 = vmatprep.subr.bf16.mxu0 %v7508_v54  ;;  %v13392_v54 = vand.u32 4294901760, %v13391_v36  ;;  %v13418_v36 = vand.u32 4294901760, %v9015_v51  ;;  %v13427_v51 = vld [vmem:[#allocation30_spill] sm:$0xff] }
  0x70   : > { %v9549_v43 = vpack.c.bf16 %v13394_v1, %v13392_v54  ;;  %v13419_v54 = vld [vmem:[#allocation22_spill] sm:$0xff] }
  0x71   : > { %v13420_v25 = vand.u32 4294901760, %v13419_v54  ;;  %v13453_v54 = vand.u32 4294901760, %v9409_v35 }
  0x73   : > { %7455 = vmatpush3.bf16.xpose.msra.mxu1 %v9535_v26  ;;  %v7572_v1 = vpack.c.bf16 %v13420_v25, %v13418_v36  ;;  %v13454_v25 = vand.u32 4294901760, %v9416_v53  ;;  %v242_v53 = vlaneseq }
  0x74   : > { %7457 = vmatprep.subr.bf16.mxu1 %v9541_v18 }
  0x75   : > { %7511 = vmatpush3.bf16.xpose.msra.mxu0 %v7510_v10  ;;  %v13399_v10 = vld [vmem:[#allocation58_spill] sm:$0xff] }
  0x76   : > { %7513 = vmatprep.subr.bf16.mxu0 %v7512_v59  ;;  %v13400_v59 = vand.u32 4294901760, %v13399_v10  ;;  %v13426_v10 = vand.u32 4294901760, %v9093_v46 }
  0x78   : > { %v9563_v63 = vpack.c.bf16 %v13402_v56, %v13400_v59  ;;  %v13428_v59 = vand.u32 4294901760, %v13427_v51  ;;  %v13429_v56 = vand.u32 4294901760, %v9164_v47  ;;  %v13439_v47 = vld [vmem:[#allocation51_spill] sm:$0xff] }
  0x7a   : > { %v7578_v45 = vpack.c.bf16 %v13428_v59, %v13426_v10  ;;  %v13459_v10 = vld [vmem:[#allocation5_spill] sm:$0xff]  ;;  %v13460_v59 = vld [vmem:[#allocation6_spill] sm:$0xff] }
  0x7b   : > { %7459 = vmatpush3.bf16.xpose.msra.mxu1 %v9549_v43  ;;  %v1326_v51 = vand.u32 4294901760, %v13459_v10 }
  0x7c   : > { %7461 = vmatprep.subr.bf16.mxu1 %v9555_v39 }
  0x7d   : > { %7515 = vmatpush3.bf16.xpose.msra.mxu0 %v7514_v23  ;;  %v13407_v23 = vand.u32 4294901760, %v9370_v8 }
  0x7e   : > { %7517 = vmatprep.subr.bf16.mxu0 %v7516_v42  ;;  %v13408_v42 = vld [vmem:[#allocation69_spill] sm:$0xff] }
  0x7f   : > { %v13409_v24 = vand.u32 4294901760, %v13408_v42  ;;  %v13436_v42 = vand.u32 4294901760, %v9220_v44 }
  0x81   : > { %v9577_v17 = vpack.c.bf16 %v13409_v24, %v13407_v23  ;;  %v13435_v23 = vand.u32 4294901760, %v9215_v60  ;;  %v13437_v24 = vld [vmem:[#allocation48_spill] sm:$0xff]  ;;  %v13447_v60 = vld [vmem:[#allocation66_spill] sm:$0xff] }
  0x83   : > { %7463 = vmatpush3.bf16.xpose.msra.mxu1 %v9563_v63  ;;  %v7584_v46 = vpack.c.bf16 %v13436_v42, %v13435_v23  ;;  %v13465_v23 = vld [vmem:[#allocation11_spill] sm:$0xff] }
  0x84   : > { %7465 = vmatprep.subr.bf16.mxu1 %v9569_v61  ;;  %v1284_v42 = vand.u32 4294901760, %v13465_v23 }
  0x85   : > { %7519 = vmatpush3.bf16.xpose.msra.mxu0 %v7518_v55  ;;  %v13410_v55 = vand.u32 4294901760, %v8890_v21 }
  0x86   : > { %7521 = vmatprep.subr.bf16.mxu0 %v7520_v31  ;;  %v13413_v31 = vand.u32 4294901760, %v8910_v30  ;;  %v13421_v30 = vand.u32 4294901760, %v9038_v52  ;;  %v7580_v52 = vpack.c.bf16 %v13430_v4, %v13429_v56  ;;  %v13461_v56 = vld [vmem:[#allocation7_spill] sm:$0xff] }
  0x87   : > { %v1278_v4 = vand.u32 4294901760, %v13461_v56 }
  0x8b   : > { %7467 = vmatpush3.bf16.xpose.msra.mxu1 %v9577_v17 }
  0x8d   : > { %7523 = vmatpush3.bf16.xpose.msra.mxu0 %v7522_v37  ;;  %v478_v37 = vsub.f32 %v476_v58, %v477_v14 }
  0x8e   : > { %7525 = vmatprep.subr.bf16.mxu0 %v7524_v27  ;;  %v13411_v27 = vld [vmem:[#allocation13_spill] sm:$0xff] }
  0x8f   : > { %v13412_v8 = vand.u32 4294901760, %v13411_v27  ;;  %v13443_v27 = vld [vmem:[#allocation60_spill] sm:$0xff] }
  0x95   : > { %7527 = vmatpush3.bf16.xpose.msra.mxu0 %v7526_v2  ;;  %v13414_v2 = vand.u32 4294901760, %v8916_v32  ;;  %v13422_v32 = vand.u32 4294901760, %v9043_v41  ;;  %v13431_v41 = vld [vmem:[#allocation43_spill] sm:$0xff] }
  0x96   : > { %7529 = vmatprep.subr.bf16.mxu0 %v7528_v40  ;;  %v7566_v40 = vpack.c.bf16 %v13412_v8, %v13410_v55  ;;  %v13432_v6 = vand.u32 4294901760, %v13431_v41  ;;  %v13444_v8 = vand.u32 4294901760, %v13443_v27  ;;  %v13472_v27 = vld [vmem:[#allocation16_spill] sm:$0xff] }
  0x97   : > { %v7568_v0 = vpack.c.bf16 %v13414_v2, %v13413_v31  ;;  %v7574_v15 = vpack.c.bf16 %v13422_v32, %v13421_v30  ;;  %v13445_v31 = vld [vmem:[#allocation64_spill] sm:$0xff] }
  0x98   : > { %v7582_v38 = vpack.c.bf16 %v13434_v22, %v13432_v6  ;;  %v13446_v2 = vand.u32 4294901760, %v13445_v31  ;;  %v13463_v6 = vld [vmem:[#allocation9_spill] sm:$0xff]  ;;  %v13464_v22 = vld [vmem:[#allocation10_spill] sm:$0xff] }
  0x99   : > { %v1332_v49 = vand.u32 4294901760, %v13463_v6 }
  0x9d   : > { %7531 = vmatpush3.bf16.xpose.msra.mxu0 %v7530_v50  ;;  %v479_v50 = vand.u32 4294901760, %v478_v37  ;;  %v13440_v37 = vand.u32 4294901760, %v13439_v47 }
  0x9e   : > { %7533 = vmatprep.subr.bf16.mxu0 %v9460_v62 }
  0x9f   : > { %6226 = vmatprep.mubr.f32.mxu1 %v479_v50 }
  0xa0   : > { %6227 = vmatmul.mubr.f32.vlgmr.msra.gmra.mrb[0].mxu1 %v479_v50  ;;  %v13441_v50 = vld [vmem:[#allocation57_spill] sm:$0xff] }
  0xa1   : > { %v13442_v55 = vand.u32 4294901760, %v13441_v50  ;;  %v13471_v50 = vld [vmem:[#allocation15_spill] sm:$0xff] }
  0xa4   : > { %6295 = vmatmul.mubr.f32.vlgmr.msra.gmra.mrb[0].mxu0 %v476_v58  ;;  %v13416_v58 = vld [vmem:[#allocation14_spill] sm:$0xff] }
  0xa5   : > { %7535 = vmatpush3.bf16.xpose.msra.mxu0 %v9466_v9  ;;  %6328 = vmatprep.mubr.f32.mxu0 %v477_v14  ;;  %v13417_v5 = vand.u32 4294901760, %v13416_v58 }
  0xa6   : > { %7537 = vmatprep.subr.bf16.mxu0 %v9478_v12 }
  0xad   : > { %7539 = vmatpush3.bf16.xpose.msra.mxu0 %v9487_v16 }
  0xae   : > { %7541 = vmatprep.subr.bf16.mxu0 %v9493_v29 }
  0xb5   : > { %7543 = vmatpush3.bf16.xpose.msra.mxu0 %v9505_v57 }
  0xb6   : > { %7545 = vmatprep.subr.bf16.mxu0 %v9512_v3 }
  0xbd   : > { %7547 = vmatpush3.bf16.xpose.msra.mxu0 %v9521_v13 }
  0xbe   : > { %7549 = vmatprep.subr.bf16.mxu0 %v9527_v11 }
  0xc5   : > { %7551 = vmatpush3.bf16.xpose.msra.mxu0 %v9535_v26 }
  0xc6   : > { %7553 = vmatprep.subr.bf16.mxu0 %v9541_v18 }
  0xcd   : > { %7555 = vmatpush3.bf16.xpose.msra.mxu0 %v9549_v43 }
  0xce   : > { %7557 = vmatprep.subr.bf16.mxu0 %v9555_v39 }
  0xd5   : > { %7559 = vmatpush3.bf16.xpose.msra.mxu0 %v9563_v63 }
  0xd6   : > { %7561 = vmatprep.subr.bf16.mxu0 %v9569_v61 }
  0xdd   : > { %7563 = vmatpush3.bf16.xpose.msra.mxu0 %v9577_v17 }
  0xde   : > { %7565 = vmatprep.subr.bf16.mxu0 %v7564_v28  ;;  %v13415_v28 = vand.u32 4294901760, %v8922_v34  ;;  %v7576_v34 = vpack.c.bf16 %v13425_v20, %v13423_v48 }
  0xe0   : > { %v7570_v21 = vpack.c.bf16 %v13417_v5, %v13415_v28  ;;  %v13449_v28 = vld [vmem:[#allocation67_spill] sm:$0xff]  ;;  %v13451_v5 = vld [vmem:[#allocation68_spill] sm:$0xff] }
  0xe1   : > { %v13450_v58 = vand.u32 4294901760, %v13449_v28  ;;  %v13476_v28 = vld [vmem:[#allocation20_spill] sm:$0xff] }
  0xe4   : > { %6329 = vmatmul.mubr.f32.vlgmr.msra.gmra.mrb[0].mxu0 %v477_v14  ;;  %v13438_v14 = vand.u32 4294901760, %v13437_v24 }
  0xe5   : > { %7567 = vmatpush3.bf16.xpose.msra.mxu0 %v7566_v40  ;;  %6362 = vmatprep.mubr.f32.mxu0 %v9411_v7  ;;  %v7588_v40 = vpack.c.bf16 %v13444_v8, %v13442_v55  ;;  %v1338_v55 = vand.u32 4294901760, %v13471_v50  ;;  %v1341_v8 = vand.u32 4294901760, %v13472_v27 }
  0xe6   : > { %7569 = vmatprep.subr.bf16.mxu0 %v7568_v0  ;;  %v7586_v33 = vpack.c.bf16 %v13440_v37, %v13438_v14  ;;  %v13448_v0 = vand.u32 4294901760, %v13447_v60 }
  0xe8   : > { %v7590_v44 = vpack.c.bf16 %v13448_v0, %v13446_v2  ;;  %v13474_v2 = vld [vmem:[#allocation18_spill] sm:$0xff]  ;;  %v13475_v0 = vld [vmem:[#allocation19_spill] sm:$0xff] }
  0xe9   : > { %v1293_v60 = vand.u32 4294901760, %v13474_v2 }
  0xed   : > { %7571 = vmatpush3.bf16.xpose.msra.mxu0 %v7570_v21  ;;  %v13452_v21 = vand.u32 4294901760, %v13451_v5  ;;  %v9717_v5 = vpack.c.bf16 %v1341_v8, %v1338_v55 }
  0xee   : > { %7573 = vmatprep.subr.bf16.mxu0 %v7572_v1  ;;  %v7594_v1 = vpack.c.bf16 %v13454_v25, %v13453_v54  ;;  %v13480_v25 = vld [vmem:[#allocation24_spill] sm:$0xff] }
  0xef   : > { %v7592_v36 = vpack.c.bf16 %v13452_v21, %v13450_v58  ;;  %v1347_v58 = vand.u32 4294901760, %v13476_v28  ;;  %13477 = vst [vmem:[#allocation41_spill] sm:$0xff] %v9717_v5 }
  0xf5   : > { %7575 = vmatpush3.bf16.xpose.msra.mxu0 %v7574_v15 }
  0xf6   : > { %7577 = vmatprep.subr.bf16.mxu0 %v7576_v34 }
  0xfd   : > { %7579 = vmatpush3.bf16.xpose.msra.mxu0 %v7578_v45  ;;  %v1329_v45 = vand.u32 4294901760, %v13460_v59 }
  0xfe   : > { %7581 = vmatprep.subr.bf16.mxu0 %v7580_v52  ;;  %v13462_v52 = vld [vmem:[#allocation8_spill] sm:$0xff] }
  0xff   : > { %v1281_v41 = vand.u32 4294901760, %v13462_v52  ;;  %v9700_v14 = vpack.c.bf16 %v1329_v45, %v1326_v51 }
 0x101   : > { %13467 = vst [vmem:[#allocation35_spill] sm:$0xff] %v9700_v14  ;;  %v9702_v47 = vpack.c.bf16 %v1281_v41, %v1278_v4  ;;  %7629 = vmatprep.subr.bf16.mxu1 %v9700_v14 }
 0x103   : > { %13468 = vst [vmem:[#allocation37_spill] sm:$0xff] %v9702_v47  ;;  %7631 = vmatpush3.bf16.msra.mxu1 %v9702_v47 }
 0x105   : > { %7583 = vmatpush3.bf16.xpose.msra.mxu0 %v7582_v38  ;;  %v1335_v38 = vand.u32 4294901760, %v13464_v22 }
 0x106   : > { %7585 = vmatprep.subr.bf16.mxu0 %v7584_v46  ;;  %v13466_v46 = vld [vmem:[#allocation12_spill] sm:$0xff] }
 0x107   : > { %v1287_v24 = vand.u32 4294901760, %v13466_v46  ;;  %v9704_v37 = vpack.c.bf16 %v1335_v38, %v1332_v49 }
 0x109   : > { %13469 = vst [vmem:[#allocation38_spill] sm:$0xff] %v9704_v37  ;;  %7633 = vmatprep.subr.bf16.mxu1 %v9704_v37 }
 0x10d   : > { %7587 = vmatpush3.bf16.xpose.msra.mxu0 %v7586_v33  ;;  %v9707_v33 = vpack.c.bf16 %v1287_v24, %v1284_v42 }
 0x10e   : > { %7589 = vmatprep.subr.bf16.mxu0 %v7588_v40  ;;  %v13473_v40 = vld [vmem:[#allocation17_spill] sm:$0xff] }
 0x10f   : > { %13470 = vst [vmem:[#allocation39_spill] sm:$0xff] %v9707_v33  ;;  %v1290_v31 = vand.u32 4294901760, %v13473_v40  ;;  %7635 = vmatpush3.bf16.msra.mxu1 %v9707_v33 }
 0x110   : > { %7637 = vmatprep.subr.bf16.mxu1 %v9717_v5 }
 0x111   : > { %v9720_v21 = vpack.c.bf16 %v1293_v60, %v1290_v31 }
 0x113   : > { %13478 = vst [vmem:[#allocation45_spill] sm:$0xff] %v9720_v21  ;;  %7639 = vmatpush3.bf16.msra.mxu1 %v9720_v21  ;;  %v9769_v21 = vsub.f32 %v13464_v22, %v1335_v38  ;;  %v9784_v22 = vsub.f32 %v13471_v50, %v1338_v55  ;;  %v9787_v38 = vsub.f32 %v13472_v27, %v1341_v8 }
 0x115   : > { %7591 = vmatpush3.bf16.xpose.msra.mxu0 %v7590_v44  ;;  %v1344_v44 = vand.u32 4294901760, %v13475_v0 }
 0x116   : > { %7593 = vmatprep.subr.bf16.mxu0 %v7592_v36  ;;  %v13479_v36 = vld [vmem:[#allocation21_spill] sm:$0xff] }
 0x117   : > { %v1296_v54 = vand.u32 4294901760, %v13479_v36 }
 0x119   : > { %v9806_v50 = vsub.f32 %v13479_v36, %v1296_v54  ;;  %v13509_v36 = vld [vmem:[#allocation61_spill] sm:$0xff] }
 0x11d   : > { %7595 = vmatpush3.bf16.xpose.msra.mxu0 %v7594_v1  ;;  %v1299_v1 = vand.u32 4294901760, %v13480_v25 }
 0x11e   : > { %7597 = vmatprep.subr.bf16.mxu0 %v9460_v62  ;;  %v1237_v62 = vshrl.u32 %v242_v53, 7 }
 0x11f   : > { %v9809_v55 = vsub.f32 %v13480_v25, %v1299_v1  ;;  %v13510_v25 = vld [vmem:[#allocation65_spill] sm:$0xff] }
 0x121   : > { %13501 = vst [vmem:[#allocation13_spill] sm:$0xff] %v9809_v55 }
 0x124   : > { %6363 = vmatmul.mubr.f32.vlgmr.msra.gmra.mrb[0].mxu0 %v9411_v7 }
 0x125   : > { %7599 = vmatpush3.bf16.xpose.msra.mxu0 %v9466_v9  ;;  %6396 = vmatprep.mubr.f32.mxu0 %v9411_v7 }
 0x126   : > { %7601 = vmatprep.subr.bf16.mxu0 %v9478_v12  ;;  %v9676_v12 = vsub.s32 0, %v1237_v62 }
 0x128   : > { %13455 = vst [vmem:[#allocation23_spill] sm:$0xff] %v9676_v12 }
 0x12d   : > { %7603 = vmatpush3.bf16.xpose.msra.mxu0 %v9487_v16  ;;  %v277_v16 = vld [vmem:[%s12675_s2] ss:$4 sm:$0x3] }
 0x12e   : > { %7605 = vmatprep.subr.bf16.mxu0 %v9493_v29  ;;  %v9681_v29 = vsub.s32 1, %v1237_v62  ;;  %v13483_v62 = vld [vmem:[#allocation29_spill] sm:$0xff] }
 0x130   : > { %13456 = vst [vmem:[#allocation25_spill] sm:$0xff] %v9681_v29 }
 0x135   : > { %7607 = vmatpush3.bf16.xpose.msra.mxu0 %v9505_v57 }
 0x136   : > { %7609 = vmatprep.subr.bf16.mxu0 %v9512_v3 }
 0x13d   : > { %7611 = vmatpush3.bf16.xpose.msra.mxu0 %v9521_v13 }
 0x13e   : > { %7613 = vmatprep.subr.bf16.mxu0 %v9527_v11  ;;  %v1239_v11 = vrot.slane %v277_v16, %v9676_v12 }
 0x145   : > { %7615 = vmatpush3.bf16.xpose.msra.mxu0 %v9535_v26 }
 0x146   : > { %7617 = vmatprep.subr.bf16.mxu0 %v9541_v18 }
 0x14d   : > { %7619 = vmatpush3.bf16.xpose.msra.mxu0 %v9549_v43 }
 0x14e   : > { %7621 = vmatprep.subr.bf16.mxu0 %v9555_v39 }
 0x155   : > { %7623 = vmatpush3.bf16.xpose.msra.mxu0 %v9563_v63 }
 0x156   : > { %7625 = vmatprep.subr.bf16.mxu0 %v9569_v61 }
 0x15d   : > { %7627 = vmatpush3.bf16.xpose.msra.mxu0 %v9577_v17  ;;  %v9685_v17 = vand.u32 127, %v242_v53 }
 0x15f   : > { %13457 = vst [vmem:[#allocation26_spill] sm:$0xff] %v9685_v17  ;;  %v9688_v30 = vadd.s32 128, %v9685_v17 }
 0x161   : > { %13458 = vst [vmem:[#allocation31_spill] sm:$0xff] %v9688_v30 }
 0x164   : > { %6397 = vmatmul.mubr.f32.vlgmr.msra.gmra.mrb[0].mxu0 %v9411_v7  ;;  %v1243_v7 = vrot.slane %v277_v16, %v9681_v29  ;;  %v1353_v16 = vand.u32 4294901760, %v13483_v62  ;;  %v13491_v29 = vld [vmem:[#allocation40_spill] sm:$0xff] }
 0x165   : > { %v1308_v12 = vand.u32 4294901760, %v13491_v29 }
 0x166   : > { %v9815_v8 = vsub.f32 %v13483_v62, %v1353_v16 }
 0x168   : > { %13503 = vst [vmem:[#allocation22_spill] sm:$0xff] %v9815_v8 }
 0x173   : > { %v481_v9 = vpop.f32.mrb[0].mxu1 }
 0x174   : > { %v483_v35 = vpop.f32.mrb[1].mxu1 }
 0x237   : > { %v1228_v57 = vpop.f32.mrb[0].mxu0 }
 0x238   : > { %v8588_v3 = vadd.f32 %v1228_v57, %v481_v9  ;;  %v1230_v13 = vpop.f32.mrb[1].mxu0  ;;  %v9725_v9 = vpack.c.bf16 %v1347_v58, %v1344_v44  ;;  %v9730_v57 = vpack.c.bf16 %v1299_v1, %v1296_v54  ;;  %v12838_v54 = vand.u32 4294901760, %v13509_v36 }
 0x239   : > { %v8589_v26 = vadd.f32 %v1230_v13, %v483_v35  ;;  %v13482_v35 = vld [vmem:[#allocation28_spill] sm:$0xff]  ;;  %v12837_v1 = vand.u32 4294901760, %v13510_v25 }
 0x23a   : > { %v1233_v18 = vmul.f32 2.0, %v8588_v3  ;;  %13481 = vst [vmem:[#allocation46_spill] sm:$0xff] %v9725_v9  ;;  %v1350_v53 = vand.u32 4294901760, %v13482_v35  ;;  %13484 = vst [vmem:[#allocation50_spill] sm:$0xff] %v9730_v57  ;;  %v13485_v3 = vld [vmem:[#allocation32_spill] sm:$0xff]  ;;  %7641 = vmatprep.subr.bf16.mxu1 %v9725_v9 }
 0x23b   : > { %v1234_v43 = vmul.f32 2.0, %v8589_v26  ;;  %v1302_v13 = vand.u32 4294901760, %v13485_v3  ;;  %7643 = vmatpush3.bf16.msra.mxu1 %v9730_v57  ;;  %v13492_v57 = vld [vmem:[#allocation42_spill] sm:$0xff] }
 0x23c   : > { %v1246_v39 = vsub.f32 %v1239_v11, %v1233_v18  ;;  %v13486_v11 = vld [vmem:[#allocation33_spill] sm:$0xff]  ;;  %v1311_v9 = vand.u32 4294901760, %v13492_v57  ;;  %v9812_v27 = vsub.f32 %v13482_v35, %v1350_v53 }
 0x23d   : > { %v1247_v63 = vsub.f32 %v1243_v7, %v1234_v43  ;;  %v1305_v26 = vand.u32 4294901760, %v13486_v11  ;;  %v9735_v7 = vpack.c.bf16 %v1353_v16, %v1350_v53 }
 0x23e   : > { %13502 = vst [vmem:[#allocation14_spill] sm:$0xff] %v9812_v27 }
 0x23f   : > { %v1248_v61 = vmin.f32 %v1246_v39, %v1247_v63  ;;  %13487 = vst [vmem:[#allocation54_spill] sm:$0xff] %v9735_v7  ;;  %v9738_v18 = vpack.c.bf16 %v1305_v26, %v1302_v13  ;;  %7645 = vmatprep.subr.bf16.mxu1 %v9735_v7  ;;  %v9750_v7 = vsub.f32 %v13459_v10, %v1326_v51  ;;  %v13495_v10 = vld [vmem:[#allocation47_spill] sm:$0xff] }
 0x240   : > { %v1362_v51 = vand.u32 4294901760, %v13495_v10 }
 0x241   : > { %1249 = vmin.xlane.f32.xlu0 %v1248_v61  ;;  %13488 = vst [vmem:[#allocation58_spill] sm:$0xff] %v9738_v18  ;;  %7647 = vmatpush3.bf16.msra.mxu1 %v9738_v18  ;;  %v12834_v35 = vand.u32 4294901760, %v9750_v7 }
 0x2ce   : > { %v1250_v32 = vpop.xlane.xlu0 %1249 }
 0x2cf   : > { %vm1251_vm1 = vcmp.le.f32.partialorder %v1246_v39, %v1250_v32  ;;  %vm1252_vm2 = vcmp.le.f32.partialorder %v1247_v63, %v1250_v32  ;;  %v13489_v32 = vld [vmem:[#allocation34_spill] sm:$0xff] }
 0x2d0   : > { %v1253_v15 = vsel %vm1251_vm1, %v9685_v17, 256  ;;  %v1254_v48 = vsel %vm1252_vm2, %v9688_v30, 256 }
 0x2d1   : > { %vm1255_vm3 = vcmp.lt.s32.totalorder %v1253_v15, %v1254_v48 }
 0x2d2   : > { %v1256_v19 = vsel %vm1255_vm3, %v1253_v15, %v1254_v48  ;;  %v1356_v15 = vand.u32 4294901760, %v13489_v32  ;;  %v13490_v48 = vld [vmem:[#allocation36_spill] sm:$0xff] }
 0x2d3   : > { %v1258_v20 = vshra.s32 %v1256_v19, 16  ;;  %v1257_v43 = vand.u32 65535, %v1256_v19  ;;  %v9755_v19 = vsub.f32 %v13460_v59, %v1329_v45  ;;  %v13496_v59 = vld [vmem:[#allocation49_spill] sm:$0xff] }
 0x2d4   : > { %v1365_v45 = vand.u32 4294901760, %v13496_v59 }
 0x2d5   : > { %v1260_v34 = vcvt.s32.f32 %v1258_v20  ;;  %v1259_v63 = vcvt.s32.f32 %v1257_v43  ;;  %v1359_v20 = vand.u32 4294901760, %v13490_v48  ;;  %v9761_v43 = vsub.f32 %v13462_v52, %v1281_v41  ;;  %v13497_v52 = vld [vmem:[#allocation52_spill] sm:$0xff] }
 0x2d6   : > { %v1314_v41 = vand.u32 4294901760, %v13497_v52  ;;  %v12833_v53 = vand.u32 4294901760, %v9755_v19 }
 0x2d7   : > { %1261 = vmin.xlane.f32.xlu0 %v1260_v34  ;;  %v9752_v18 = vpack.c.bf16 %v1359_v20, %v1356_v15  ;;  %v12836_v16 = vand.u32 4294901760, %v9761_v43 }
 0x2d9   : > { %13493 = vst [vmem:[#allocation59_spill] sm:$0xff] %v9752_v18  ;;  %7649 = vmatprep.subr.bf16.mxu1 %v9752_v18  ;;  %v9790_v18 = vsub.f32 %v13473_v40, %v1290_v31  ;;  %v9819_v40 = vsub.f32 %v13485_v3, %v1302_v13  ;;  %v9822_v31 = vsub.f32 %v13486_v11, %v1305_v26 }
 0x2da   : > { %v9840_v3 = vsub.f32 %v13491_v29, %v1308_v12  ;;  %v9843_v13 = vsub.f32 %v13492_v57, %v1311_v9  ;;  %v9853_v26 = vpack.c.bf16 %v12837_v1, %v12838_v54  ;;  %v1512_v29 = vsub.f32 %v9755_v19, %v12833_v53 }
 0x2db   : > { %13504 = vst [vmem:[#allocation27_spill] sm:$0xff] %v9819_v40  ;;  %13505 = vst [vmem:[#allocation30_spill] sm:$0xff] %v9822_v31  ;;  %v1400_v57 = vsub.f32 %v9761_v43, %v12836_v16 }
 0x2dc   : > { %13512 = vst [vmem:[#allocation48_spill] sm:$0xff] %v9853_v26 }
 0x364   : > { %v9742_v39 = vpop.xlane.xlu0 %1261 }
 0x365   : > { %vm1263_vm4 = vcmp.eq.f32.partialorder %v1260_v34, %v9742_v39  ;;  %v9758_v34 = vsub.f32 %v13461_v56, %v1278_v4  ;;  %v9775_v56 = vsub.f32 %v13465_v23, %v1284_v42  ;;  %v9778_v4 = vsub.f32 %v13466_v46, %v1287_v24 }
 0x366   : > { %v1264_v61 = vsel %vm1263_vm4, %v1259_v63, inf  ;;  %v9763_v63 = vpack.c.bf16 %v1311_v9, %v1308_v12  ;;  %v9792_v23 = vpack.c.bf16 %v1365_v45, %v1362_v51  ;;  %v9795_v42 = vsub.f32 %v13474_v2, %v1293_v60 }
 0x367   : > { %1265 = vmin.xlane.f32.xlu1 %v1264_v61  ;;  %v9766_v61 = vsub.f32 %v13463_v6, %v1332_v49  ;;  %v13498_v6 = vld [vmem:[#allocation53_spill] sm:$0xff]  ;;  %v9798_v46 = vsub.f32 %v13475_v0, %v1344_v44  ;;  %v9801_v24 = vsub.f32 %v13476_v28, %v1347_v58  ;;  %v9825_v2 = vsub.f32 %v13489_v32, %v1356_v15  ;;  %v13507_v0 = vld [vmem:[#allocation55_spill] sm:$0xff]  ;;  %v13508_v28 = vld [vmem:[#allocation56_spill] sm:$0xff] }
 0x368   : > { %13494 = vst [vmem:[#allocation62_spill] sm:$0xff] %v9763_v63  ;;  %7651 = vmatpush3.bf16.msra.mxu1 %v9763_v63  ;;  %v1317_v49 = vand.u32 4294901760, %v13498_v6  ;;  %13499 = vst [vmem:[#allocation63_spill] sm:$0xff] %v9792_v23  ;;  %v9828_v60 = vsub.f32 %v13490_v48, %v1359_v20  ;;  %v1368_v44 = vand.u32 4294901760, %v13507_v0  ;;  %v12840_v58 = vand.u32 4294901760, %v13508_v28 }
 0x369   : > { %7653 = vmatprep.subr.bf16.mxu1 %v9792_v23  ;;  %v12835_v62 = vand.u32 4294901760, %v9758_v34  ;;  %v9856_v32 = vsub.f32 %v13495_v10, %v1362_v51  ;;  %v9859_v15 = vsub.f32 %v13496_v59, %v1365_v45  ;;  %v1505_v12 = vsub.f32 %v9750_v7, %v12834_v35 }
 0x36a   : > { %v9803_v63 = vpack.c.bf16 %v1317_v49, %v1314_v41  ;;  %13506 = vst [vmem:[#allocation43_spill] sm:$0xff] %v9828_v60  ;;  %v9847_v11 = vpack.c.bf16 %v12840_v58, %v1368_v44  ;;  %v12839_v48 = vand.u32 4294901760, %v9766_v61  ;;  %v12841_v20 = vand.u32 4294901760, %v9769_v21 }
 0x36b   : > { %13513 = vst [vmem:[#allocation51_spill] sm:$0xff] %v9856_v32  ;;  %13514 = vst [vmem:[#allocation57_spill] sm:$0xff] %v9859_v15  ;;  %v1393_v9 = vsub.f32 %v9758_v34, %v12835_v62  ;;  %v1506_v10 = vand.u32 4294901760, %v1505_v12  ;;  %v1513_v51 = vand.u32 4294901760, %v1512_v29  ;;  %v12842_v59 = vand.u32 4294901760, %v9775_v56 }
 0x36c   : > { %13500 = vst [vmem:[#allocation69_spill] sm:$0xff] %v9803_v63  ;;  %7655 = vmatpush3.bf16.msra.mxu1 %v9803_v63  ;;  %13511 = vst [vmem:[#allocation44_spill] sm:$0xff] %v9847_v11  ;;  %v12843_v45 = vand.u32 4294901760, %v9778_v4  ;;  %v1401_v35 = vand.u32 4294901760, %v1400_v57  ;;  %v1519_v62 = vsub.f32 %v9766_v61, %v12839_v48  ;;  %v1526_v16 = vsub.f32 %v9769_v21, %v12841_v20 }
 0x36d   : > { %7657 = vmatprep.subr.bf16.mxu1 %v9847_v11  ;;  %v1394_v53 = vand.u32 4294901760, %v1393_v9  ;;  %v7660_v1 = vpack.c.bf16 %v1513_v51, %v1506_v10  ;;  %v1407_v12 = vsub.f32 %v9775_v56, %v12842_v59  ;;  %v12850_v9 = vand.u32 4294901760, %v9784_v22 }
 0x36e   : > { %v1414_v29 = vsub.f32 %v9778_v4, %v12843_v45  ;;  %v9893_v57 = vsub.f32 %v13497_v52, %v1314_v41  ;;  %v1520_v48 = vand.u32 4294901760, %v1519_v62  ;;  %v1527_v58 = vand.u32 4294901760, %v1526_v16 }
 0x36f   : > { %v9895_v54 = vpack.c.bf16 %v1401_v35, %v1394_v53  ;;  %v1408_v20 = vand.u32 4294901760, %v1407_v12  ;;  %v1533_v51 = vsub.f32 %v9784_v22, %v12850_v9  ;;  %v12848_v59 = vand.u32 4294901760, %v9787_v38 }
 0x370   : > { %7659 = vmatpush3.bf16.msra.mxu1 %v9853_v26  ;;  %13515 = vst [vmem:[#allocation60_spill] sm:$0xff] %v9893_v57  ;;  %v1415_v10 = vand.u32 4294901760, %v1414_v29  ;;  %v9902_v45 = vsub.f32 %v13498_v6, %v1317_v49  ;;  %v9904_v26 = vpack.c.bf16 %v1527_v58, %v1520_v48  ;;  %v12847_v52 = vand.u32 4294901760, %v9790_v18 }
 0x371   : > { %7661 = vmatprep.subr.bf16.mxu1 %v7660_v1  ;;  %v12846_v41 = vand.u32 4294901760, %v9795_v42  ;;  %v1534_v1 = vand.u32 4294901760, %v1533_v51  ;;  %v1540_v53 = vsub.f32 %v9787_v38, %v12848_v59  ;;  %v12849_v62 = vand.u32 4294901760, %v9798_v46 }
 0x372   : > { %13516 = vst [vmem:[#allocation64_spill] sm:$0xff] %v9902_v45  ;;  %v9908_v35 = vpack.c.bf16 %v1415_v10, %v1408_v20  ;;  %v1421_v6 = vsub.f32 %v9790_v18, %v12847_v52  ;;  %v12851_v58 = vand.u32 4294901760, %v9801_v24  ;;  %v12852_v16 = vand.u32 4294901760, %v9806_v50 }
 0x373   : > { %v1428_v49 = vsub.f32 %v9795_v42, %v12846_v41  ;;  %v9923_v48 = vsub.f32 %v13507_v0, %v1368_v44  ;;  %v1541_v20 = vand.u32 4294901760, %v1540_v53  ;;  %v1547_v12 = vsub.f32 %v9798_v46, %v12849_v62 }
 0x374   : > { %v12853_v29 = vand.u32 4294901760, %v9809_v55  ;;  %v1422_v10 = vand.u32 4294901760, %v1421_v6  ;;  %v1554_v41 = vsub.f32 %v9801_v24, %v12851_v58  ;;  %v1435_v52 = vsub.f32 %v9806_v50, %v12852_v16 }
 0x375   : > { %13517 = vst [vmem:[#allocation66_spill] sm:$0xff] %v9923_v48  ;;  %v1429_v51 = vand.u32 4294901760, %v1428_v49  ;;  %v9935_v59 = vpack.c.bf16 %v1541_v20, %v1534_v1  ;;  %v1548_v0 = vand.u32 4294901760, %v1547_v12  ;;  %v12854_v53 = vand.u32 4294901760, %v9812_v27 }
 0x376   : > { %v1442_v44 = vsub.f32 %v9809_v55, %v12853_v29  ;;  %v1555_v6 = vand.u32 4294901760, %v1554_v41  ;;  %v1436_v49 = vand.u32 4294901760, %v1435_v52  ;;  %v12858_v9 = vand.u32 4294901760, %v9815_v8 }
 0x377   : > { %v9941_v62 = vpack.c.bf16 %v1429_v51, %v1422_v10  ;;  %v1561_v16 = vsub.f32 %v9812_v27, %v12854_v53  ;;  %v12857_v1 = vand.u32 4294901760, %v9819_v40  ;;  %v13518_v12 = vand.u32 4294901760, %v13508_v28 }
 0x378   : > { %v1443_v58 = vand.u32 4294901760, %v1442_v44  ;;  %v13520_v10 = vand.u32 4294901760, %v13509_v36  ;;  %v9959_v41 = vpack.c.bf16 %v1555_v6, %v1548_v0  ;;  %v1568_v51 = vsub.f32 %v9815_v8, %v12858_v9 }
 0x379   : > { %v9952_v29 = vsub.f32 %v13508_v28, %v13518_v12  ;;  %v1562_v53 = vand.u32 4294901760, %v1561_v16  ;;  %v1449_v20 = vsub.f32 %v9819_v40, %v12857_v1  ;;  %v13522_v28 = vand.u32 4294901760, %v9822_v31 }
 0x37a   : > { %v9957_v52 = vsub.f32 %v13509_v36, %v13520_v10  ;;  %v9964_v44 = vpack.c.bf16 %v1443_v58, %v1436_v49  ;;  %v1569_v11 = vand.u32 4294901760, %v1568_v51  ;;  %v12861_v36 = vand.u32 4294901760, %v9825_v2 }
 0x37b   : > { %13519 = vst [vmem:[#allocation67_spill] sm:$0xff] %v9952_v29  ;;  %v1456_v12 = vsub.f32 %v9822_v31, %v13522_v28  ;;  %v12864_v0 = vand.u32 4294901760, %v9828_v60  ;;  %v12865_v6 = vand.u32 4294901760, %v9840_v3  ;;  %v13523_v10 = vand.u32 4294901760, %v13510_v25 }
 0x37c   : > { %13521 = vst [vmem:[#allocation68_spill] sm:$0xff] %v9957_v52  ;;  %v1450_v16 = vand.u32 4294901760, %v1449_v20  ;;  %v12866_v1 = vand.u32 4294901760, %v9843_v13  ;;  %v9981_v9 = vpack.c.bf16 %v1569_v11, %v1562_v53  ;;  %v1575_v51 = vsub.f32 %v9825_v2, %v12861_v36 }
 0x37d   : > { %v9978_v58 = vsub.f32 %v13510_v25, %v13523_v10  ;;  %v1457_v49 = vand.u32 4294901760, %v1456_v12  ;;  %v1582_v28 = vsub.f32 %v9828_v60, %v12864_v0  ;;  %v1463_v63 = vsub.f32 %v9840_v3, %v12865_v6 }
 0x37e   : > { %v1470_v20 = vsub.f32 %v9843_v13, %v12866_v1  ;;  %v12867_v11 = vand.u32 4294901760, %v9856_v32  ;;  %v12872_v53 = vand.u32 4294901760, %v9859_v15  ;;  %v1576_v12 = vand.u32 4294901760, %v1575_v51 }
 0x37f   : > { %13524 = vst [vmem:[#allocation5_spill] sm:$0xff] %v9978_v58  ;;  %v9992_v25 = vpack.c.bf16 %v1457_v49, %v1450_v16  ;;  %v1583_v10 = vand.u32 4294901760, %v1582_v28  ;;  %v1464_v36 = vand.u32 4294901760, %v1463_v63  ;;  %v12875_v23 = vand.u32 4294901760, %v9893_v57 }
 0x380   : > { %v1471_v0 = vand.u32 4294901760, %v1470_v20  ;;  %v1589_v6 = vsub.f32 %v9856_v32, %v12867_v11  ;;  %v1596_v16 = vsub.f32 %v9859_v15, %v12872_v53  ;;  %v12876_v49 = vand.u32 4294901760, %v9902_v45 }
 0x381   : > { %v10007_v1 = vpack.c.bf16 %v1583_v10, %v1576_v12  ;;  %v1477_v51 = vsub.f32 %v9893_v57, %v12875_v23  ;;  %v12881_v33 = vand.u32 4294901760, %v9923_v48  ;;  %v12882_v53 = vand.u32 4294901760, %v9952_v29 }
 0x382   : > { %v10012_v63 = vpack.c.bf16 %v1471_v0, %v1464_v36  ;;  %v1590_v28 = vand.u32 4294901760, %v1589_v6  ;;  %v1597_v20 = vand.u32 4294901760, %v1596_v16  ;;  %v1484_v11 = vsub.f32 %v9902_v45, %v12876_v49 }
 0x383   : > { %v1478_v5 = vand.u32 4294901760, %v1477_v51  ;;  %v12883_v12 = vand.u32 4294901760, %v9957_v52  ;;  %v12884_v23 = vand.u32 4294901760, %v9978_v58  ;;  %v1603_v36 = vsub.f32 %v9923_v48, %v12881_v33 }
 0x384   : > { %v10020_v10 = vpack.c.bf16 %v1597_v20, %v1590_v28  ;;  %v1485_v37 = vand.u32 4294901760, %v1484_v11  ;;  %v1610_v0 = vsub.f32 %v9952_v29, %v12882_v53  ;;  %v7692_v33 = vpack.c.bf16 %v9755_v19, %v9750_v7 }
 0x385   : > { %v1491_v6 = vsub.f32 %v9957_v52, %v12883_v12  ;;  %v1498_v51 = vsub.f32 %v9978_v58, %v12884_v23  ;;  %v1604_v11 = vand.u32 4294901760, %v1603_v36  ;;  %v7694_v53 = vpack.c.bf16 %v9761_v43, %v9758_v34 }
 0x386   : > { %v7686_v16 = vpack.c.bf16 %v1485_v37, %v1478_v5  ;;  %v1611_v28 = vand.u32 4294901760, %v1610_v0  ;;  %v7696_v12 = vpack.c.bf16 %v9769_v21, %v9766_v61  ;;  %v7698_v37 = vpack.c.bf16 %v9778_v4, %v9775_v56 }
 0x387   : > { %v1492_v20 = vand.u32 4294901760, %v1491_v6  ;;  %v1499_v49 = vand.u32 4294901760, %v1498_v51  ;;  %v7700_v5 = vpack.c.bf16 %v9787_v38, %v9784_v22  ;;  %v7702_v36 = vpack.c.bf16 %v9795_v42, %v9790_v18 }
 0x388   : > { %v7688_v47 = vpack.c.bf16 %v1611_v28, %v1604_v11  ;;  %v7706_v0 = vpack.c.bf16 %v9809_v55, %v9806_v50  ;;  %v7708_v6 = vpack.c.bf16 %v9815_v8, %v9812_v27  ;;  %v7710_v51 = vpack.c.bf16 %v9822_v31, %v9819_v40 }
 0x389   : > { %v7690_v14 = vpack.c.bf16 %v1499_v49, %v1492_v20  ;;  %v7704_v49 = vpack.c.bf16 %v9801_v24, %v9798_v46  ;;  %v7712_v11 = vpack.c.bf16 %v9828_v60, %v9825_v2  ;;  %v7714_v28 = vpack.c.bf16 %v9843_v13, %v9840_v3 }
 0x38a   : > { %v7716_v20 = vpack.c.bf16 %v9859_v15, %v9856_v32  ;;  %v7718_v23 = vpack.c.bf16 %v9902_v45, %v9893_v57  ;;  %v7720_v55 = vpack.c.bf16 %v9952_v29, %v9923_v48  ;;  %v7722_v8 = vpack.c.bf16 %v9978_v58, %v9957_v52 }
 0x38b   : > { %v1268_v31 = vcvt.f32.s32 %v9742_v39  ;;  %v12899_v39 = vmov 0.0   ;;  %v12901_v32 = vmov 1.0   ;;  %vm5945_vm4 = vcmask 23568  }
 0x38d   : > { %v1269_v27 = vshll.u32 %v1268_v31, 16 }
 0x3f4   : > { %v1266_v40 = vpop.xlane.xlu1 %1265 }
 0x3f5   : > { %v1267_v60 = vcvt.f32.s32 %v1266_v40 }
 0x3f7   : > { %v10074_v15 = vadd.s32 %v1269_v27, %v1267_v60 }
 0x3f9   : > { %vm1271_vm6 = vcmp.eq.s32.totalorder %v9685_v17, %v10074_v15  ;;  %vm1272_vm7 = vcmp.eq.s32.totalorder %v9688_v30, %v10074_v15  ;;  %2140 = vst.msk [vmem:[%s10072_s15] sm:$0xff] %vm2139_vm5, %v10074_v15 }
 0x3fa   : > { %v6100_v40 = vsel %vm1271_vm6, 1.0, %v12899_v39  ;;  %v6101_v27 = vsel %vm1272_vm7, 1.0, %v12899_v39 }
 0x3fb   : > { %v10091_v31 = vsub.f32 %v6100_v40, %v6100_v40  ;;  %v1374_v60 = vsub.f32 %v6101_v27, %v6101_v27  ;;  %v13567_v27 = vld [vmem:[#allocation43_spill] sm:$0xff] }
 0x3fd   : > { %v1375_v58 = vand.u32 4294901760, %v1374_v60  ;;  %v1381_v52 = vand.u32 4294901760, %v10091_v31 }
 0x3ff   : > { %v1376_v29 = vsub.f32 %v1374_v60, %v1375_v58  ;;  %v1382_v48 = vsub.f32 %v10091_v31, %v1381_v52 }
 0x401   : > { %v1377_v45 = vand.u32 4294901760, %v1376_v29  ;;  %v1383_v57 = vand.u32 4294901760, %v1382_v48  ;;  %v13539_v48 = vld [vmem:[#allocation44_spill] sm:$0xff]  ;;  %v13540_v29 = vand.u32 4294901760, %v9750_v7  ;;  %v13547_v7 = vand.u32 4294901760, %v9775_v56 }
 0x402   : > { %v13554_v56 = vand.u32 4294901760, %v9801_v24  ;;  %v13566_v24 = vand.u32 4294901760, %v9825_v2 }
 0x403   : > { %1378 = vmatprep.mubr.f32.mxu1 %v1377_v45  ;;  %v13531_v45 = vld [vmem:[#allocation46_spill] sm:$0xff] }
 0x404   : > { %1384 = vmatmul.mubr.f32.vlgmr.msra.gmra.mrb[2].mxu1 %v1383_v57  ;;  %v13536_v57 = vld [vmem:[#allocation62_spill] sm:$0xff] }
 0x405   : > { %7663 = vmatpush3.bf16.msra.mxu1 %v9895_v54  ;;  %6102 = vmatprep.mubr.msk.f32.mxu1 %vm1272_vm7, %v12901_v32  ;;  %v13528_v54 = vld [vmem:[#allocation39_spill] sm:$0xff] }
 0x406   : > { %7665 = vmatprep.subr.bf16.mxu1 %v9904_v26  ;;  %v13529_v26 = vld [vmem:[#allocation41_spill] sm:$0xff] }
 0x409   : > { %7667 = vmatpush3.bf16.msra.mxu1 %v9908_v35  ;;  %v13537_v35 = vld [vmem:[#allocation63_spill] sm:$0xff] }
 0x40a   : > { %7669 = vmatprep.subr.bf16.mxu1 %v9935_v59  ;;  %v13530_v59 = vld [vmem:[#allocation45_spill] sm:$0xff] }
 0x40d   : > { %7671 = vmatpush3.bf16.msra.mxu1 %v9941_v62  ;;  %v13538_v62 = vld [vmem:[#allocation69_spill] sm:$0xff] }
 0x40e   : > { %7673 = vmatprep.subr.bf16.mxu1 %v9959_v41 }
 0x411   : > { %7675 = vmatpush3.bf16.msra.mxu1 %v9964_v44  ;;  %v13542_v44 = vld [vmem:[#allocation48_spill] sm:$0xff] }
 0x412   : > { %7677 = vmatprep.subr.bf16.mxu1 %v9981_v9  ;;  %v13535_v9 = vld [vmem:[#allocation59_spill] sm:$0xff] }
 0x415   : > { %7679 = vmatpush3.bf16.msra.mxu1 %v9992_v25  ;;  %v13544_v25 = vand.u32 4294901760, %v9761_v43  ;;  %v13549_v43 = vand.u32 4294901760, %v9784_v22 }
 0x416   : > { %7681 = vmatprep.subr.bf16.mxu1 %v10007_v1  ;;  %v13541_v1 = vand.u32 4294901760, %v9755_v19  ;;  %v13548_v19 = vand.u32 4294901760, %v9778_v4  ;;  %v13555_v4 = vand.u32 4294901760, %v9806_v50  ;;  %v13568_v50 = vand.u32 4294901760, %v13567_v27 }
 0x418   : > { %v7756_v41 = vpack.c.bf16 %v13541_v1, %v13540_v29  ;;  %v13570_v29 = vand.u32 4294901760, %v9843_v13  ;;  %v13583_v13 = vld [vmem:[#allocation68_spill] sm:$0xff] }
 0x419   : > { %7683 = vmatpush3.bf16.msra.mxu1 %v10012_v63  ;;  %v13545_v63 = vand.u32 4294901760, %v9766_v61 }
 0x41a   : > { %7685 = vmatprep.subr.bf16.mxu1 %v10020_v10 }
 0x41d   : > { %7687 = vmatpush3.bf16.msra.mxu1 %v7686_v16  ;;  %v13552_v16 = vand.u32 4294901760, %v9795_v42  ;;  %v13562_v42 = vld [vmem:[#allocation27_spill] sm:$0xff] }
 0x41e   : > { %7689 = vmatprep.subr.bf16.mxu1 %v7688_v47  ;;  %v13526_v47 = vld [vmem:[#allocation37_spill] sm:$0xff] }
 0x421   : > { %7691 = vmatpush3.bf16.msra.mxu1 %v7690_v14  ;;  %v13525_v14 = vld [vmem:[#allocation35_spill] sm:$0xff] }
 0x422   : > { %7693 = vmatprep.subr.bf16.mxu1 %v7692_v33  ;;  %v13527_v33 = vld [vmem:[#allocation38_spill] sm:$0xff] }
 0x424   : > { %6103 = vmatmul.mubr.msk.f32.vlgmr.msra.gmra.mrb[4].mxu1 %vm1271_vm6, %v12901_v32 }
 0x425   : > { %7695 = vmatpush3.bf16.msra.mxu1 %v7694_v53  ;;  %1751 = vmatprep.mubr.f32.mxu1 %v1374_v60  ;;  %v13569_v60 = vand.u32 4294901760, %v9840_v3 }
 0x426   : > { %7697 = vmatprep.subr.bf16.mxu1 %v7696_v12  ;;  %v13546_v12 = vand.u32 4294901760, %v9769_v21  ;;  %v13550_v21 = vand.u32 4294901760, %v9787_v38  ;;  %v13558_v38 = vld [vmem:[#allocation14_spill] sm:$0xff] }
 0x427   : > { %v7778_v1 = vpack.c.bf16 %v13570_v29, %v13569_v60  ;;  %v10324_v60 = vld [vmem:[%s12674_s1 + $0x1a8] sm:$0xff] }
 0x428   : > { %v7760_v10 = vpack.c.bf16 %v13546_v12, %v13545_v63  ;;  %v7764_v61 = vpack.c.bf16 %v13550_v21, %v13549_v43  ;;  %v13575_v12 = vld [vmem:[#allocation60_spill] sm:$0xff]  ;;  %v13581_v21 = vld [vmem:[#allocation67_spill] sm:$0xff]  ;;  %13596 = vst [vmem:[#allocation17_spill] sm:$0xff] %v10324_v60 }
 0x429   : > { %7699 = vmatpush3.bf16.msra.mxu1 %v7698_v37  ;;  %v13582_v3 = vand.u32 4294901760, %v13581_v21 }
 0x42a   : > { %7701 = vmatprep.subr.bf16.mxu1 %v7700_v5  ;;  %v13553_v5 = vand.u32 4294901760, %v9798_v46 }
 0x42d   : > { %7703 = vmatpush3.bf16.msra.mxu1 %v7702_v36  ;;  %v7768_v36 = vpack.c.bf16 %v13554_v56, %v13553_v5 }
 0x42e   : > { %7705 = vmatprep.subr.bf16.mxu1 %v7704_v49  ;;  %v13556_v49 = vld [vmem:[#allocation13_spill] sm:$0xff] }
 0x42f   : > { %v13557_v22 = vand.u32 4294901760, %v13556_v49 }
 0x431   : > { %7707 = vmatpush3.bf16.msra.mxu1 %v7706_v0  ;;  %v7770_v0 = vpack.c.bf16 %v13557_v22, %v13555_v4  ;;  %v10286_v4 = vld [vmem:[%s12674_s1 + $0x118] sm:$0xff] }
 0x432   : > { %7709 = vmatprep.subr.bf16.mxu1 %v7708_v6  ;;  %v13559_v6 = vand.u32 4294901760, %v13558_v38  ;;  %13594 = vst [vmem:[#allocation15_spill] sm:$0xff] %v10286_v4 }
 0x435   : > { %7711 = vmatpush3.bf16.msra.mxu1 %v7710_v51  ;;  %v13560_v51 = vld [vmem:[#allocation22_spill] sm:$0xff] }
 0x436   : > { %7713 = vmatprep.subr.bf16.mxu1 %v7712_v11 }
 0x439   : > { %7715 = vmatpush3.bf16.msra.mxu1 %v7714_v28  ;;  %v13563_v28 = vand.u32 4294901760, %v13562_v42 }
 0x43a   : > { %7717 = vmatprep.subr.bf16.mxu1 %v7716_v20  ;;  %v13564_v20 = vld [vmem:[#allocation30_spill] sm:$0xff] }
 0x43b   : > { %v13565_v46 = vand.u32 4294901760, %v13564_v20 }
 0x43d   : > { %7719 = vmatpush3.bf16.msra.mxu1 %v7718_v23  ;;  %v13532_v23 = vld [vmem:[#allocation50_spill] sm:$0xff]  ;;  %v7774_v40 = vpack.c.bf16 %v13565_v46, %v13563_v28 }
 0x43e   : > { %7721 = vmatprep.subr.bf16.mxu1 %v7720_v55  ;;  %v13533_v55 = vld [vmem:[#allocation54_spill] sm:$0xff] }
 0x441   : > { %7723 = vmatpush3.bf16.msra.mxu1 %v7722_v8  ;;  %v13534_v8 = vld [vmem:[#allocation58_spill] sm:$0xff] }
 0x442   : > { %7725 = vmatprep.subr.bf16.mxu1 %v13525_v14 }
 0x444   : > { %1754 = vmatmul.mubr.f32.vlgmr.msra.gmra.mrb[6].mxu1 %v10091_v31  ;;  %v7776_v31 = vpack.c.bf16 %v13568_v50, %v13566_v24 }
 0x445   : > { %7727 = vmatpush3.bf16.msra.mxu1 %v13526_v47  ;;  %1858 = vmatprep.mubr.f32.mxu1 %v1375_v58  ;;  %v13543_v58 = vand.u32 4294901760, %v9758_v34  ;;  %v7762_v34 = vpack.c.bf16 %v13548_v19, %v13547_v7  ;;  %v13577_v7 = vld [vmem:[#allocation64_spill] sm:$0xff] }
 0x446   : > { %7729 = vmatprep.subr.bf16.mxu1 %v13527_v33  ;;  %v13578_v2 = vand.u32 4294901760, %v13577_v7 }
 0x447   : > { %v7758_v53 = vpack.c.bf16 %v13544_v25, %v13543_v58  ;;  %v13573_v25 = vld [vmem:[#allocation57_spill] sm:$0xff] }
 0x449   : > { %7731 = vmatpush3.bf16.msra.mxu1 %v13528_v54 }
 0x44a   : > { %7733 = vmatprep.subr.bf16.mxu1 %v13529_v26 }
 0x44d   : > { %7735 = vmatpush3.bf16.msra.mxu1 %v13530_v59 }
 0x44e   : > { %7737 = vmatprep.subr.bf16.mxu1 %v13531_v45 }
 0x451   : > { %7739 = vmatpush3.bf16.msra.mxu1 %v13532_v23 }
 0x452   : > { %7741 = vmatprep.subr.bf16.mxu1 %v13533_v55 }
 0x455   : > { %7743 = vmatpush3.bf16.msra.mxu1 %v13534_v8 }
 0x456   : > { %7745 = vmatprep.subr.bf16.mxu1 %v13535_v9 }
 0x459   : > { %7747 = vmatpush3.bf16.msra.mxu1 %v13536_v57 }
 0x45a   : > { %7749 = vmatprep.subr.bf16.mxu1 %v13537_v35 }
 0x45d   : > { %7751 = vmatpush3.bf16.msra.mxu1 %v13538_v62 }
 0x45e   : > { %7753 = vmatprep.subr.bf16.mxu1 %v13539_v48 }
 0x461   : > { %7755 = vmatpush3.bf16.msra.mxu1 %v13542_v44 }
 0x462   : > { %7757 = vmatprep.subr.bf16.mxu1 %v7756_v41  ;;  %v13571_v41 = vld [vmem:[#allocation51_spill] sm:$0xff] }
 0x463   : > { %v13572_v58 = vand.u32 4294901760, %v13571_v41  ;;  %v10333_v41 = vld [vmem:[%s12674_s1 + $0x120] sm:$0xff] }
 0x464   : > { %1862 = vmatmul.mubr.f32.vlgmr.msra.gmra.mrb[8].mxu1 %v1381_v52  ;;  %v13551_v52 = vand.u32 4294901760, %v9790_v18  ;;  %v13561_v18 = vand.u32 4294901760, %v13560_v51  ;;  %13597 = vst [vmem:[#allocation18_spill] sm:$0xff] %v10333_v41 }
 0x465   : > { %7759 = vmatpush3.bf16.msra.mxu1 %v7758_v53  ;;  %6104 = vmatprep.mubr.msk.f32.mxu1 %vm1272_vm7, %v12901_v32  ;;  %v13574_v53 = vand.u32 4294901760, %v13573_v25 }
 0x466   : > { %7761 = vmatprep.subr.bf16.mxu1 %v7760_v10  ;;  %v7766_v37 = vpack.c.bf16 %v13552_v16, %v13551_v52  ;;  %v7772_v11 = vpack.c.bf16 %v13561_v18, %v13559_v6  ;;  %v13576_v10 = vand.u32 4294901760, %v13575_v12  ;;  %v13584_v52 = vand.u32 4294901760, %v13583_v13  ;;  %v13585_v16 = vld [vmem:[#allocation5_spill] sm:$0xff] }
 0x467   : > { %v7780_v63 = vpack.c.bf16 %v13574_v53, %v13572_v58  ;;  %v10338_v58 = vld [vmem:[%s12674_s1 + $0x128] sm:$0xff]  ;;  %v10359_v13 = vld [vmem:[%s12674_s1 + $0x1b0] sm:$0xff] }
 0x468   : > { %v7782_v19 = vpack.c.bf16 %v13578_v2, %v13576_v10  ;;  %13598 = vst [vmem:[#allocation19_spill] sm:$0xff] %v10338_v58  ;;  %v2201_v12 = vsel %vm278_vm0, %v10338_v58, 0  ;;  %13599 = vst [vmem:[#allocation20_spill] sm:$0xff] %v10359_v13 }
 0x469   : > { %7763 = vmatpush3.bf16.msra.mxu1 %v7762_v34  ;;  %v13579_v34 = vld [vmem:[#allocation66_spill] sm:$0xff]  ;;  %v2297_v2 = vand.u32 4294901760, %v2201_v12 }
 0x46a   : > { %7765 = vmatprep.subr.bf16.mxu1 %v7764_v61  ;;  %v13580_v43 = vand.u32 4294901760, %v13579_v34 }
 0x46c   : > { %v7784_v61 = vpack.c.bf16 %v13582_v3, %v13580_v43 }
 0x46d   : > { %7767 = vmatpush3.bf16.msra.mxu1 %v7766_v37  ;;  %v13586_v37 = vand.u32 4294901760, %v13585_v16  ;;  %v10369_v16 = vld [vmem:[%s12674_s1 + $0x130] sm:$0xff] }
 0x46e   : > { %7769 = vmatprep.subr.bf16.mxu1 %v7768_v36  ;;  %v10281_v36 = vld [vmem:[%s12674_s1 + $0x110] sm:$0xff]  ;;  %13601 = vst [vmem:[#allocation24_spill] sm:$0xff] %v10369_v16 }
 0x46f   : > { %v7786_v5 = vpack.c.bf16 %v13586_v37, %v13584_v52  ;;  %13593 = vst [vmem:[#allocation12_spill] sm:$0xff] %v10281_v36  ;;  %v2192_v18 = vsel %vm278_vm0, %v10281_v36, 0  ;;  %v10364_v52 = vld [vmem:[%s12674_s1 + $0x1b8] sm:$0xff] }
 0x470   : > { %v2288_v46 = vand.u32 4294901760, %v2192_v18  ;;  %13600 = vst [vmem:[#allocation21_spill] sm:$0xff] %v10364_v52 }
 0x471   : > { %7771 = vmatpush3.bf16.msra.mxu1 %v7770_v0 }
 0x472   : > { %7773 = vmatprep.subr.bf16.mxu1 %v7772_v11  ;;  %v2195_v11 = vsel %vm278_vm0, %v10286_v4, 0  ;;  %v10309_v24 = vsub.f32 %v2192_v18, %v2288_v46 }
 0x475   : > { %7775 = vmatpush3.bf16.msra.mxu1 %v7774_v40  ;;  %v2291_v40 = vand.u32 4294901760, %v2195_v11 }
 0x476   : > { %7777 = vmatprep.subr.bf16.mxu1 %v7776_v31  ;;  %v10319_v31 = vld [vmem:[%s12674_s1 + $0x1a0] sm:$0xff] }
 0x477   : > { %v10311_v27 = vpack.c.bf16 %v2291_v40, %v2288_v46  ;;  %v10313_v50 = vsub.f32 %v2195_v11, %v2291_v40  ;;  %13595 = vst [vmem:[#allocation16_spill] sm:$0xff] %v10319_v31  ;;  %v2246_v29 = vsel %vm278_vm0, %v10319_v31, 0  ;;  %v10409_v40 = vld [vmem:[%s12674_s1 + $0x140] sm:$0xff] }
 0x478   : > { %v2342_v25 = vand.u32 4294901760, %v2246_v29  ;;  %13605 = vst [vmem:[#allocation33_spill] sm:$0xff] %v10409_v40 }
 0x479   : > { %7779 = vmatpush3.bf16.msra.mxu1 %v7778_v1  ;;  %v2249_v1 = vsel %vm278_vm0, %v10324_v60, 0 }
 0x47a   : > { %7781 = vmatprep.subr.bf16.mxu1 %v7780_v63  ;;  %v2345_v53 = vand.u32 4294901760, %v2249_v1  ;;  %v2198_v63 = vsel %vm278_vm0, %v10333_v41, 0  ;;  %v10351_v3 = vsub.f32 %v2246_v29, %v2342_v25  ;;  %v10414_v29 = vld [vmem:[%s12674_s1 + $0x148] sm:$0xff] }
 0x47b   : > { %v2294_v7 = vand.u32 4294901760, %v2198_v63  ;;  %13606 = vst [vmem:[#allocation34_spill] sm:$0xff] %v10414_v29 }
 0x47c   : > { %v10344_v34 = vpack.c.bf16 %v2345_v53, %v2342_v25 }
 0x47d   : > { %7783 = vmatpush3.bf16.msra.mxu1 %v7782_v19  ;;  %v10348_v21 = vpack.c.bf16 %v2297_v2, %v2294_v7  ;;  %v10371_v37 = vsub.f32 %v2198_v63, %v2294_v7  ;;  %v10428_v7 = vld [vmem:[%s12674_s1 + $0x1d0] sm:$0xff] }
 0x47e   : > { %7785 = vmatprep.subr.bf16.mxu1 %v7784_v61  ;;  %v10353_v61 = vsub.f32 %v2249_v1, %v2345_v53  ;;  %13607 = vst [vmem:[#allocation36_spill] sm:$0xff] %v10428_v7  ;;  %v2264_v39 = vsel %vm278_vm0, %v10428_v7, 0 }
 0x481   : > { %7787 = vmatpush3.bf16.msra.mxu1 %v7786_v5  ;;  %v10373_v5 = vsub.f32 %v2201_v12, %v2297_v2  ;;  %v10433_v2 = vld [vmem:[%s12674_s1 + $0x1d8] sm:$0xff] }
 0x482   : > { %7789 = vmatprep.subr.bf16.mxu1 %v13525_v14  ;;  %v10235_v14 = vld [vmem:[%s12674_s1 + $0x180] sm:$0xff]  ;;  %13608 = vst [vmem:[#allocation40_spill] sm:$0xff] %v10433_v2 }
 0x483   : > { %13587 = vst [vmem:[#allocation6_spill] sm:$0xff] %v10235_v14 }
 0x484   : > { %6105 = vmatmul.mubr.msk.f32.vlgmr.msra.gmra.mrb[10].mxu1 %vm1271_vm6, %v12901_v32 }
 0x485   : > { %7791 = vmatpush3.bf16.msra.mxu1 %v13526_v47  ;;  %6106 = vmatprep.mubr.msk.f32.mxu1 %vm1272_vm7, %v12901_v32  ;;  %v10240_v47 = vld [vmem:[%s12674_s1 + $0x188] sm:$0xff] }
 0x486   : > { %7793 = vmatprep.subr.bf16.mxu1 %v13527_v33  ;;  %13588 = vst [vmem:[#allocation7_spill] sm:$0xff] %v10240_v47  ;;  %v10245_v33 = vld [vmem:[%s12674_s1 + $0x100] sm:$0xff]  ;;  %v2237_v15 = vsel %vm278_vm0, %v10240_v47, 0 }
 0x487   : > { %13589 = vst [vmem:[#allocation8_spill] sm:$0xff] %v10245_v33 }
 0x489   : > { %7795 = vmatpush3.bf16.msra.mxu1 %v13528_v54  ;;  %v2234_v54 = vsel %vm278_vm0, %v10235_v14, 0 }
 0x48a   : > { %7797 = vmatprep.subr.bf16.mxu1 %v13529_v26  ;;  %v10254_v26 = vld [vmem:[%s12674_s1 + $0x108] sm:$0xff] }
 0x48b   : > { %13590 = vst [vmem:[#allocation9_spill] sm:$0xff] %v10254_v26 }
 0x48d   : > { %7799 = vmatpush3.bf16.msra.mxu1 %v13530_v59  ;;  %v10259_v59 = vld [vmem:[%s12674_s1 + $0x190] sm:$0xff] }
 0x48e   : > { %7801 = vmatprep.subr.bf16.mxu1 %v13531_v45  ;;  %13591 = vst [vmem:[#allocation10_spill] sm:$0xff] %v10259_v59  ;;  %v2330_v45 = vand.u32 4294901760, %v2234_v54  ;;  %v2240_v56 = vsel %vm278_vm0, %v10259_v59, 0 }
 0x48f   : > { %v2336_v6 = vand.u32 4294901760, %v2240_v56 }
 0x491   : > { %7803 = vmatpush3.bf16.msra.mxu1 %v13532_v23  ;;  %v2333_v23 = vand.u32 4294901760, %v2237_v15  ;;  %v10304_v28 = vsub.f32 %v2240_v56, %v2336_v6  ;;  %v10396_v56 = vld [vmem:[%s12674_s1 + $0x1c8] sm:$0xff] }
 0x492   : > { %7805 = vmatprep.subr.bf16.mxu1 %v13533_v55  ;;  %v2186_v55 = vsel %vm278_vm0, %v10245_v33, 0  ;;  %13604 = vst [vmem:[#allocation32_spill] sm:$0xff] %v10396_v56  ;;  %v2261_v63 = vsel %vm278_vm0, %v10396_v56, 0 }
 0x495   : > { %7807 = vmatpush3.bf16.msra.mxu1 %v13534_v8  ;;  %v2189_v8 = vsel %vm278_vm0, %v10254_v26, 0 }
 0x496   : > { %7809 = vmatprep.subr.bf16.mxu1 %v13535_v9  ;;  %v10268_v9 = vld [vmem:[%s12674_s1 + $0x198] sm:$0xff] }
 0x497   : > { %13592 = vst [vmem:[#allocation11_spill] sm:$0xff] %v10268_v9  ;;  %v2243_v38 = vsel %vm278_vm0, %v10268_v9, 0 }
 0x498   : > { %v2339_v51 = vand.u32 4294901760, %v2243_v38 }
 0x499   : > { %7811 = vmatpush3.bf16.msra.mxu1 %v13536_v57  ;;  %v2282_v57 = vand.u32 4294901760, %v2186_v55 }
 0x49a   : > { %7813 = vmatprep.subr.bf16.mxu1 %v13537_v35  ;;  %v2285_v35 = vand.u32 4294901760, %v2189_v8  ;;  %v10302_v42 = vpack.c.bf16 %v2339_v51, %v2336_v6  ;;  %v10306_v20 = vsub.f32 %v2243_v38, %v2339_v51 }
 0x49b   : > { %v10290_v22 = vsub.f32 %v2186_v55, %v2282_v57 }
 0x49c   : > { %v10288_v49 = vpack.c.bf16 %v2285_v35, %v2282_v57  ;;  %v10292_v0 = vsub.f32 %v2189_v8, %v2285_v35  ;;  %v2204_v57 = vsel %vm278_vm0, %v10369_v16, 0 }
 0x49d   : > { %7815 = vmatpush3.bf16.msra.mxu1 %v13538_v62  ;;  %v10270_v62 = vpack.c.bf16 %v2333_v23, %v2330_v45  ;;  %v2300_v38 = vand.u32 4294901760, %v2204_v57 }
 0x49e   : > { %7817 = vmatprep.subr.bf16.mxu1 %v13539_v48  ;;  %v10272_v48 = vsub.f32 %v2234_v54, %v2330_v45  ;;  %v10378_v54 = vld [vmem:[%s12674_s1 + $0x138] sm:$0xff]  ;;  %v2255_v45 = vsel %vm278_vm0, %v10364_v52, 0 }
 0x49f   : > { %13602 = vst [vmem:[#allocation28_spill] sm:$0xff] %v10378_v54  ;;  %v2351_v8 = vand.u32 4294901760, %v2255_v45  ;;  %v2207_v35 = vsel %vm278_vm0, %v10378_v54, 0  ;;  %v10418_v25 = vsub.f32 %v2204_v57, %v2300_v38 }
 0x4a0   : > { %v2303_v6 = vand.u32 4294901760, %v2207_v35 }
 0x4a1   : > { %7819 = vmatpush3.bf16.msra.mxu1 %v13542_v44  ;;  %v10274_v44 = vsub.f32 %v2237_v15, %v2333_v23  ;;  %v2252_v15 = vsel %vm278_vm0, %v10359_v13, 0  ;;  %v10387_v23 = vld [vmem:[%s12674_s1 + $0x1c0] sm:$0xff]  ;;  %v10402_v11 = vsub.f32 %v2255_v45, %v2351_v8 }
 0x4a2   : > { %7821 = vmatprep.subr.bf16.mxu1 %v10270_v62  ;;  %13603 = vst [vmem:[#allocation29_spill] sm:$0xff] %v10387_v23  ;;  %v2348_v55 = vand.u32 4294901760, %v2252_v15  ;;  %v2258_v46 = vsel %vm278_vm0, %v10387_v23, 0  ;;  %v10416_v1 = vpack.c.bf16 %v2303_v6, %v2300_v38  ;;  %v10420_v53 = vsub.f32 %v2207_v35, %v2303_v6  ;;  %v10449_v35 = vld [vmem:[%s12674_s1 + $0x150] sm:$0xff]  ;;  %v10454_v38 = vld [vmem:[%s12674_s1 + $0x158] sm:$0xff] }
 0x4a3   : > { %v2354_v12 = vand.u32 4294901760, %v2258_v46  ;;  %13609 = vst [vmem:[#allocation42_spill] sm:$0xff] %v10449_v35  ;;  %13610 = vst [vmem:[#allocation47_spill] sm:$0xff] %v10454_v38  ;;  %v2219_v56 = vsel %vm278_vm0, %v10454_v38, 0 }
 0x4a4   : > { %6107 = vmatmul.mubr.msk.f32.vlgmr.msra.gmra.mrb[12].mxu1 %vm1271_vm6, %v12901_v32  ;;  %v10398_v51 = vpack.c.bf16 %v2351_v8, %v2348_v55  ;;  %v10400_v18 = vsub.f32 %v2252_v15, %v2348_v55  ;;  %v2213_v15 = vsel %vm278_vm0, %v10414_v29, 0  ;;  %v2315_v54 = vand.u32 4294901760, %v2219_v56 }
 0x4a5   : > { %v10442_v55 = vsub.f32 %v2258_v46, %v2354_v12  ;;  %v2309_v6 = vand.u32 4294901760, %v2213_v15  ;;  %v2267_v46 = vsel %vm278_vm0, %v10433_v2, 0 }
 0x4a7   : > { %v10465_v29 = vsub.f32 %v2213_v15, %v2309_v6  ;;  %v10480_v15 = vsub.f32 %v2219_v56, %v2315_v54 }
 0x4aa   : > { %7823 = vmatpush3.bf16.xpose.msra.mxu1 %v10288_v49 }
 0x4ab   : > { %7825 = vmatprep.subr.bf16.mxu1 %v10302_v42 }
 0x4b2   : > { %7827 = vmatpush3.bf16.xpose.msra.mxu1 %v10311_v27 }
 0x4b3   : > { %7829 = vmatprep.subr.bf16.mxu1 %v10344_v34 }
 0x4ba   : > { %7831 = vmatpush3.bf16.xpose.msra.mxu1 %v10348_v21 }
 0x4bb   : > { %7833 = vmatprep.subr.bf16.mxu1 %v10398_v51 }
 0x4c2   : > { %7835 = vmatpush3.bf16.xpose.msra.mxu1 %v10416_v1 }
 0x4d7   : > { %v6430_v10 = vpop.f32.mrb[2].mxu1 }
 0x4d8   : > { %v6431_v19 = vpop.f32.mrb[3].mxu1 }
 0x4d9   : > { %v10346_v43 = vadd.f32 %v6431_v19, %v6430_v10  ;;  %v2357_v10 = vand.u32 4294901760, %v2261_v63  ;;  %v2210_v19 = vsel %vm278_vm0, %v10409_v40, 0  ;;  %v2216_v40 = vsel %vm278_vm0, %v10449_v35, 0 }
 0x4da   : > { %v2306_v57 = vand.u32 4294901760, %v2210_v19 }
 0x4db   : > { %v10440_v45 = vpack.c.bf16 %v2357_v10, %v2354_v12  ;;  %v10444_v8 = vsub.f32 %v2261_v63, %v2357_v10  ;;  %v2360_v12 = vand.u32 4294901760, %v2264_v39  ;;  %v2363_v10 = vand.u32 4294901760, %v2267_v46 }
 0x4dc   : > { %v10461_v63 = vsub.f32 %v2210_v19, %v2306_v57  ;;  %v10463_v32 = vpack.c.bf16 %v2309_v6, %v2306_v57  ;;  %v2312_v19 = vand.u32 4294901760, %v2216_v40 }
 0x4dd   : > { %7837 = vmatprep.subr.bf16.mxu1 %v10440_v45  ;;  %v10471_v7 = vpack.c.bf16 %v2363_v10, %v2360_v12  ;;  %v10473_v23 = vsub.f32 %v2264_v39, %v2360_v12  ;;  %v10475_v2 = vsub.f32 %v2267_v46, %v2363_v10  ;;  %v10489_v39 = vld [vmem:[%s12674_s1 + $0x1e0] sm:$0xff]  ;;  %v10508_v46 = vld [vmem:[%s12674_s1 + $0x168] sm:$0xff] }
 0x4de   : > { %v10477_v16 = vsub.f32 %v2216_v40, %v2312_v19  ;;  %7839 = vmatpush3.bf16.xpose.msra.mxu1 %v10463_v32  ;;  %v10483_v57 = vpack.c.bf16 %v2315_v54, %v2312_v19  ;;  %13612 = vst [vmem:[#allocation52_spill] sm:$0xff] %v10489_v39  ;;  %v10494_v40 = vld [vmem:[%s12674_s1 + $0x1e8] sm:$0xff]  ;;  %v2270_v56 = vsel %vm278_vm0, %v10489_v39, 0  ;;  %v10503_v54 = vld [vmem:[%s12674_s1 + $0x160] sm:$0xff]  ;;  %13615 = vst [vmem:[#allocation56_spill] sm:$0xff] %v10508_v46  ;;  %v2225_v39 = vsel %vm278_vm0, %v10508_v46, 0 }
 0x4df   : > { %7841 = vmatprep.subr.bf16.mxu1 %v10471_v7  ;;  %13613 = vst [vmem:[#allocation53_spill] sm:$0xff] %v10494_v40  ;;  %v2273_v6 = vsel %vm278_vm0, %v10494_v40, 0  ;;  %13614 = vst [vmem:[#allocation55_spill] sm:$0xff] %v10503_v54  ;;  %v2366_v12 = vand.u32 4294901760, %v2270_v56  ;;  %v2222_v19 = vsel %vm278_vm0, %v10503_v54, 0  ;;  %v2321_v35 = vand.u32 4294901760, %v2225_v39 }
 0x4e0   : > { %13611 = vst [vmem:[#allocation49_spill] sm:$0xff] %v10483_v57  ;;  %v2369_v10 = vand.u32 4294901760, %v2273_v6  ;;  %v2318_v40 = vand.u32 4294901760, %v2222_v19  ;;  %v10524_v54 = vld [vmem:[%s12674_s1 + $0x1f0] sm:$0xff]  ;;  %v10529_v46 = vld [vmem:[%s12674_s1 + $0x1f8] sm:$0xff] }
 0x4e1   : > { %13618 = vst [vmem:[#allocation35_spill] sm:$0xff] %v10524_v54  ;;  %13619 = vst [vmem:[#allocation37_spill] sm:$0xff] %v10529_v46  ;;  %v10553_v33 = vsub.f32 %v2270_v56, %v2366_v12  ;;  %v10560_v30 = vsub.f32 %v2225_v39, %v2321_v35  ;;  %v12975_v56 = vand.u32 4294901760, %v10272_v48 }
 0x4e2   : > { %v10514_v13 = vpack.c.bf16 %v2369_v10, %v2366_v12  ;;  %v10516_v41 = vpack.c.bf16 %v2321_v35, %v2318_v40  ;;  %v10555_v47 = vsub.f32 %v2273_v6, %v2369_v10  ;;  %v10558_v14 = vsub.f32 %v2222_v19, %v2318_v40 }
 0x4e3   : > { %v12982_v6 = vand.u32 4294901760, %v10274_v44  ;;  %v2505_v40 = vsub.f32 %v10272_v48, %v12975_v56 }
 0x4e4   : > { %13616 = vst [vmem:[#allocation61_spill] sm:$0xff] %v10514_v13  ;;  %13617 = vst [vmem:[#allocation65_spill] sm:$0xff] %v10516_v41 }
 0x4e5   : > { %v2512_v35 = vsub.f32 %v10274_v44, %v12982_v6 }
 0x4e6   : > { %7843 = vmatpush3.bf16.xpose.msra.mxu1 %v10483_v57 }
 0x4e7   : > { %7845 = vmatprep.subr.bf16.mxu1 %v10514_v13  ;;  %v2513_v39 = vand.u32 4294901760, %v2512_v35  ;;  %v12989_v35 = vand.u32 4294901760, %v10290_v22 }
 0x4ee   : > { %7847 = vmatpush3.bf16.xpose.msra.mxu1 %v10516_v41 }
 0x4f7   : > { %v6465_v38 = vpop.f32.mrb[4].mxu1 }
 0x4f8   : > { %v6466_v52 = vpop.f32.mrb[5].mxu1 }
 0x4f9   : > { %v6467_v58 = vadd.f32 %v6466_v52, %v6465_v38  ;;  %v2276_v52 = vsel %vm278_vm0, %v10524_v54, 0  ;;  %v2279_v38 = vsel %vm278_vm0, %v10529_v46, 0 }
 0x4fa   : > { %v2372_v31 = vand.u32 4294901760, %v2276_v52  ;;  %v2375_v4 = vand.u32 4294901760, %v2279_v38 }
 0x4fb   : > { %v1618_v60 = vadd.f32 %v6467_v58, %v10346_v43  ;;  %v10538_v58 = vld [vmem:[%s12674_s1 + $0x170] sm:$0xff]  ;;  %v10543_v43 = vld [vmem:[%s12674_s1 + $0x178] sm:$0xff] }
 0x4fc   : > { %13620 = vst [vmem:[#allocation38_spill] sm:$0xff] %v10538_v58  ;;  %13621 = vst [vmem:[#allocation39_spill] sm:$0xff] %v10543_v43  ;;  %v2228_v36 = vsel %vm278_vm0, %v10538_v58, 0  ;;  %v2231_v54 = vsel %vm278_vm0, %v10543_v43, 0  ;;  %v10549_v59 = vpack.c.bf16 %v2375_v4, %v2372_v31  ;;  %v10563_v58 = vsub.f32 %v2276_v52, %v2372_v31 }
 0x4fd   : > { %v2324_v9 = vand.u32 4294901760, %v2228_v36  ;;  %v2327_v46 = vand.u32 4294901760, %v2231_v54  ;;  %v10565_v43 = vsub.f32 %v2279_v38, %v2375_v4  ;;  %v2506_v31 = vand.u32 4294901760, %v2505_v40 }
 0x4fe   : > { %13622 = vst [vmem:[#allocation41_spill] sm:$0xff] %v10549_v59  ;;  %7849 = vmatprep.subr.bf16.mxu1 %v10549_v59 }
 0x4ff   : > { %v10551_v26 = vpack.c.bf16 %v2327_v46, %v2324_v9  ;;  %v10567_v17 = vsub.f32 %v2228_v36, %v2324_v9  ;;  %v10569_v41 = vsub.f32 %v2231_v54, %v2327_v46  ;;  %v7852_v4 = vpack.c.bf16 %v2513_v39, %v2506_v31  ;;  %v8659_v39 = vld [vmem:[%s9345_s7] sm:$0xff] }
 0x500   : > { %v12985_v31 = vand.u32 4294901760, %v10292_v0 }
 0x501   : > { %13623 = vst [vmem:[#allocation45_spill] sm:$0xff] %v10551_v26  ;;  %7851 = vmatpush3.bf16.xpose.msra.mxu1 %v10551_v26 }
 0x502   : > { %7853 = vmatprep.subr.bf16.mxu1 %v7852_v4 }
 0x517   : > { %v6500_v9 = vpop.f32.mrb[6].mxu1 }
 0x518   : > { %v6501_v36 = vpop.f32.mrb[7].mxu1 }
 0x519   : > { %v6502_v54 = vadd.f32 %v6501_v36, %v6500_v9  ;;  %v12983_v9 = vand.u32 4294901760, %v10306_v20 }
 0x51b   : > { %v1756_v46 = vadd.f32 %v6502_v54, %v1618_v60  ;;  %v12984_v60 = vand.u32 4294901760, %v10304_v28 }
 0x537   : > { %v6535_v12 = vpop.f32.mrb[8].mxu1 }
 0x538   : > { %v6536_v10 = vpop.f32.mrb[9].mxu1 }
 0x539   : > { %v6537_v19 = vadd.f32 %v6536_v10, %v6535_v12  ;;  %v12988_v10 = vand.u32 4294901760, %v10309_v24 }
 0x53b   : > { %v1864_v52 = vadd.f32 %v6537_v19, %v1756_v46  ;;  %v12986_v19 = vand.u32 4294901760, %v10313_v50 }
 0x557   : > { %v6570_v38 = vpop.f32.mrb[10].mxu1 }
 0x558   : > { %v6571_v26 = vpop.f32.mrb[11].mxu1 }
 0x559   : > { %v6572_v56 = vadd.f32 %v6571_v26, %v6570_v38  ;;  %v2393_v26 = vsub.f32 %v10290_v22, %v12989_v35 }
 0x55b   : > { %v2032_v59 = vadd.f32 %v6572_v56, %v1864_v52  ;;  %v2526_v56 = vsub.f32 %v10306_v20, %v12983_v9  ;;  %v2394_v54 = vand.u32 4294901760, %v2393_v26  ;;  %v2407_v26 = vsub.f32 %v10309_v24, %v12988_v10 }
 0x55c   : > { %v12995_v10 = vand.u32 4294901760, %v10402_v11 }
 0x55d   : > { %v2527_v38 = vand.u32 4294901760, %v2526_v56 }
 0x577   : > { %v6605_v13 = vpop.f32.mrb[12].mxu1 }
 0x578   : > { %v6606_v57 = vpop.f32.mrb[13].mxu1 }
 0x579   : > { %v6607_v6 = vadd.f32 %v6606_v57, %v6605_v13  ;;  %v2519_v57 = vsub.f32 %v10304_v28, %v12984_v60 }
 0x57b   : > { %v2136_v40 = vadd.f32 %v6607_v6, %v2032_v59  ;;  %v2400_v59 = vsub.f32 %v10292_v0, %v12985_v31  ;;  %v2520_v52 = vand.u32 4294901760, %v2519_v57 }
 0x57d   : > { %v10582_v4 = vsub.f32 %v8659_v39, %v2136_v40  ;;  %v2401_v12 = vand.u32 4294901760, %v2400_v59  ;;  %v12987_v40 = vand.u32 4294901760, %v10351_v3  ;;  %v12991_v39 = vand.u32 4294901760, %v10353_v61 }
 0x57e   : > { %v2414_v59 = vsub.f32 %v10313_v50, %v12986_v19  ;;  %v7856_v31 = vpack.c.bf16 %v2527_v38, %v2520_v52  ;;  %v12992_v19 = vand.u32 4294901760, %v10373_v5 }
 0x57f   : > { %13624 = vst [vmem:[#allocation46_spill] sm:$0xff] %v10582_v4  ;;  %v2183_v36 = vsel %vm278_vm0, %v10582_v4, 0  ;;  %v7854_v60 = vpack.c.bf16 %v2401_v12, %v2394_v54  ;;  %v2533_v57 = vsub.f32 %v10351_v3, %v12987_v40  ;;  %v2540_v56 = vsub.f32 %v10353_v61, %v12991_v39 }
 0x580   : > { %v10591_v13 = vand.u32 4294901760, %v2183_v36  ;;  %v2415_v54 = vand.u32 4294901760, %v2414_v59  ;;  %v12990_v12 = vand.u32 4294901760, %v10371_v37  ;;  %v12993_v40 = vand.u32 4294901760, %v10400_v18 }
 0x581   : > { %v2534_v52 = vand.u32 4294901760, %v2533_v57  ;;  %v2541_v38 = vand.u32 4294901760, %v2540_v56  ;;  %v2554_v59 = vsub.f32 %v10402_v11, %v12995_v10 }
 0x582   : > { %v10603_v6 = vsub.f32 %v2183_v36, %v10591_v13 }
 0x583   : > { %v2555_v39 = vand.u32 4294901760, %v2554_v59 }
 0x584   : > { %v10606_v46 = vand.u32 4294901760, %v10603_v6 }
 0x586   : > { %v2381_v9 = vsub.f32 %v10603_v6, %v10606_v46 }
 0x588   : > { %v2382_v36 = vand.u32 4294901760, %v2381_v9  ;;  %v2408_v9 = vand.u32 4294901760, %v2407_v26  ;;  %v7860_v26 = vpack.c.bf16 %v2541_v38, %v2534_v52  ;;  %v12997_v52 = vand.u32 4294901760, %v10442_v55 }
 0x589   : > { %v12999_v38 = vand.u32 4294901760, %v10444_v8 }
 0x58a   : > { %6640 = vmatprep.mubr.f32.mxu1 %v2382_v36  ;;  %v7858_v35 = vpack.c.bf16 %v2415_v54, %v2408_v9  ;;  %v12994_v9 = vand.u32 4294901760, %v10418_v25  ;;  %v12996_v54 = vand.u32 4294901760, %v10420_v53 }
 0x58b   : > { %6641 = vmatmul.mubr.f32.vlgmr.msra.gmra.mrb[14].mxu1 %v2382_v36  ;;  %v2428_v36 = vsub.f32 %v10373_v5, %v12992_v19 }
 0x58c   : > { %7855 = vmatpush3.bf16.xpose.msra.mxu1 %v7854_v60  ;;  %6674 = vmatprep.mubr.f32.mxu1 %v10591_v13  ;;  %v2421_v60 = vsub.f32 %v10371_v37, %v12990_v12 }
 0x58d   : > { %7857 = vmatprep.subr.bf16.mxu1 %v7856_v31  ;;  %v2547_v31 = vsub.f32 %v10400_v18, %v12993_v40  ;;  %v2429_v56 = vand.u32 4294901760, %v2428_v36  ;;  %v2435_v40 = vsub.f32 %v10418_v25, %v12994_v9  ;;  %v2561_v36 = vsub.f32 %v10442_v55, %v12997_v52 }
 0x58e   : > { %v2422_v57 = vand.u32 4294901760, %v2421_v60 }
 0x58f   : > { %v2548_v12 = vand.u32 4294901760, %v2547_v31  ;;  %v2436_v31 = vand.u32 4294901760, %v2435_v40  ;;  %v2562_v9 = vand.u32 4294901760, %v2561_v36 }
 0x590   : > { %v7862_v19 = vpack.c.bf16 %v2429_v56, %v2422_v57  ;;  %v12998_v57 = vand.u32 4294901760, %v10461_v63  ;;  %v13000_v56 = vand.u32 4294901760, %v10465_v29 }
 0x591   : > { %v7864_v60 = vpack.c.bf16 %v2555_v39, %v2548_v12  ;;  %v13001_v39 = vand.u32 4294901760, %v10473_v23  ;;  %v13003_v12 = vand.u32 4294901760, %v10475_v2 }
 0x592   : > { %v2449_v52 = vsub.f32 %v10461_v63, %v12998_v57 }
 0x594   : > { %7859 = vmatpush3.bf16.xpose.msra.mxu1 %v7858_v35  ;;  %v2442_v35 = vsub.f32 %v10420_v53, %v12996_v54  ;;  %v2450_v36 = vand.u32 4294901760, %v2449_v52 }
 0x595   : > { %7861 = vmatprep.subr.bf16.mxu1 %v7860_v26  ;;  %v2568_v26 = vsub.f32 %v10444_v8, %v12999_v38 }
 0x596   : > { %v2443_v59 = vand.u32 4294901760, %v2442_v35  ;;  %v2575_v35 = vsub.f32 %v10473_v23, %v13001_v39 }
 0x597   : > { %v2569_v10 = vand.u32 4294901760, %v2568_v26 }
 0x598   : > { %v7866_v54 = vpack.c.bf16 %v2443_v59, %v2436_v31  ;;  %v13002_v31 = vand.u32 4294901760, %v10477_v16  ;;  %v13004_v59 = vand.u32 4294901760, %v10480_v15  ;;  %v2576_v57 = vand.u32 4294901760, %v2575_v35 }
 0x599   : > { %v7868_v40 = vpack.c.bf16 %v2569_v10, %v2562_v9  ;;  %v13005_v10 = vand.u32 4294901760, %v10553_v33  ;;  %v13007_v9 = vand.u32 4294901760, %v10555_v47 }
 0x59a   : > { %v2463_v39 = vsub.f32 %v10477_v16, %v13002_v31 }
 0x59c   : > { %7863 = vmatpush3.bf16.xpose.msra.mxu1 %v7862_v19  ;;  %v2456_v19 = vsub.f32 %v10465_v29, %v13000_v56  ;;  %v2464_v35 = vand.u32 4294901760, %v2463_v39 }
 0x59d   : > { %7865 = vmatprep.subr.bf16.mxu1 %v7864_v60  ;;  %v2582_v60 = vsub.f32 %v10475_v2, %v13003_v12 }
 0x59e   : > { %v2457_v26 = vand.u32 4294901760, %v2456_v19  ;;  %v2589_v19 = vsub.f32 %v10553_v33, %v13005_v10 }
 0x59f   : > { %v2583_v38 = vand.u32 4294901760, %v2582_v60 }
 0x5a0   : > { %v7870_v56 = vpack.c.bf16 %v2457_v26, %v2450_v36  ;;  %v13006_v36 = vand.u32 4294901760, %v10558_v14  ;;  %v13008_v26 = vand.u32 4294901760, %v10560_v30  ;;  %v2590_v31 = vand.u32 4294901760, %v2589_v19 }
 0x5a1   : > { %v7872_v52 = vpack.c.bf16 %v2583_v38, %v2576_v57  ;;  %v2602_v38 = vand.u32 4294901760, %v10563_v58  ;;  %v13009_v57 = vand.u32 4294901760, %v10565_v43 }
 0x5a2   : > { %v2477_v10 = vsub.f32 %v10558_v14, %v13006_v36 }
 0x5a4   : > { %7867 = vmatpush3.bf16.xpose.msra.mxu1 %v7866_v54  ;;  %v2470_v54 = vsub.f32 %v10480_v15, %v13004_v59  ;;  %v2478_v19 = vand.u32 4294901760, %v2477_v10 }
 0x5a5   : > { %7869 = vmatprep.subr.bf16.mxu1 %v7868_v40  ;;  %v2596_v40 = vsub.f32 %v10555_v47, %v13007_v9 }
 0x5a6   : > { %v2471_v60 = vand.u32 4294901760, %v2470_v54  ;;  %v2603_v54 = vsub.f32 %v10563_v58, %v2602_v38 }
 0x5a7   : > { %v2597_v12 = vand.u32 4294901760, %v2596_v40 }
 0x5a8   : > { %v7874_v59 = vpack.c.bf16 %v2471_v60, %v2464_v35  ;;  %v2490_v35 = vand.u32 4294901760, %v10567_v17  ;;  %v2497_v60 = vand.u32 4294901760, %v10569_v41  ;;  %v2604_v36 = vand.u32 4294901760, %v2603_v54 }
 0x5a9   : > { %v7876_v39 = vpack.c.bf16 %v2597_v12, %v2590_v31  ;;  %v7886_v54 = vpack.c.bf16 %v10292_v0, %v10290_v22 }
 0x5aa   : > { %v2491_v12 = vsub.f32 %v10567_v17, %v2490_v35  ;;  %v2498_v31 = vsub.f32 %v10569_v41, %v2497_v60 }
 0x5ac   : > { %7871 = vmatpush3.bf16.xpose.msra.mxu1 %v7870_v56  ;;  %v2484_v56 = vsub.f32 %v10560_v30, %v13008_v26  ;;  %v2499_v10 = vand.u32 4294901760, %v2498_v31  ;;  %v7904_v31 = vpack.c.bf16 %v10475_v2, %v10473_v23 }
 0x5ad   : > { %7873 = vmatprep.subr.bf16.mxu1 %v7872_v52  ;;  %v2610_v52 = vsub.f32 %v10565_v43, %v13009_v57 }
 0x5ae   : > { %v2485_v40 = vand.u32 4294901760, %v2484_v56 }
 0x5af   : > { %v2611_v9 = vand.u32 4294901760, %v2610_v52  ;;  %v7888_v52 = vpack.c.bf16 %v10306_v20, %v10304_v28 }
 0x5b0   : > { %v7878_v26 = vpack.c.bf16 %v2485_v40, %v2478_v19  ;;  %v7898_v19 = vpack.c.bf16 %v10420_v53, %v10418_v25  ;;  %v7900_v40 = vpack.c.bf16 %v10444_v8, %v10442_v55 }
 0x5b1   : > { %v7880_v57 = vpack.c.bf16 %v2611_v9, %v2604_v36  ;;  %v7890_v9 = vpack.c.bf16 %v10313_v50, %v10309_v24  ;;  %v7892_v36 = vpack.c.bf16 %v10353_v61, %v10351_v3 }
 0x5b4   : > { %7875 = vmatpush3.bf16.xpose.msra.mxu1 %v7874_v59  ;;  %v2492_v59 = vand.u32 4294901760, %v2491_v12  ;;  %v7902_v12 = vpack.c.bf16 %v10465_v29, %v10461_v63 }
 0x5b5   : > { %7877 = vmatprep.subr.bf16.mxu1 %v7876_v39  ;;  %v7884_v39 = vpack.c.bf16 %v10274_v44, %v10272_v48 }
 0x5b6   : > { %v7882_v56 = vpack.c.bf16 %v2499_v10, %v2492_v59  ;;  %v7906_v59 = vpack.c.bf16 %v10480_v15, %v10477_v16  ;;  %v7908_v10 = vpack.c.bf16 %v10555_v47, %v10553_v33 }
 0x5bc   : > { %7879 = vmatpush3.bf16.xpose.msra.mxu1 %v7878_v26  ;;  %v7894_v26 = vpack.c.bf16 %v10373_v5, %v10371_v37 }
 0x5bd   : > { %7881 = vmatprep.subr.bf16.mxu1 %v7880_v57  ;;  %v7896_v57 = vpack.c.bf16 %v10402_v11, %v10400_v18 }
 0x5c4   : > { %7883 = vmatpush3.bf16.xpose.msra.mxu1 %v7882_v56  ;;  %v7910_v56 = vpack.c.bf16 %v10560_v30, %v10558_v14 }
 0x5c5   : > { %7885 = vmatprep.subr.bf16.mxu1 %v7884_v39  ;;  %v7912_v39 = vpack.c.bf16 %v10565_v43, %v10563_v58 }
 0x5cb   : > { %6675 = vmatmul.mubr.f32.vlgmr.msra.gmra.mrb[14].mxu1 %v10591_v13 }
 0x5cc   : > { %7887 = vmatpush3.bf16.xpose.msra.mxu1 %v7886_v54  ;;  %6708 = vmatprep.mubr.f32.mxu1 %v10603_v6  ;;  %v7914_v54 = vpack.c.bf16 %v10569_v41, %v10567_v17  ;;  %v6140_v17 = vld [vmem:[%s12675_s2 + $0x1] ss:$4 sm:$0x3] }
 0x5cd   : > { %7889 = vmatprep.subr.bf16.mxu1 %v7888_v52  ;;  %v13626_v52 = vld [vmem:[#allocation61_spill] sm:$0xff] }
 0x5d4   : > { %7891 = vmatpush3.bf16.xpose.msra.mxu1 %v7890_v9  ;;  %v13627_v9 = vld [vmem:[#allocation65_spill] sm:$0xff] }
 0x5d5   : > { %7893 = vmatprep.subr.bf16.mxu1 %v7892_v36  ;;  %v13628_v36 = vld [vmem:[#allocation41_spill] sm:$0xff] }
 0x5dc   : > { %7895 = vmatpush3.bf16.xpose.msra.mxu1 %v7894_v26  ;;  %v13629_v26 = vand.u32 4294901760, %v10272_v48  ;;  %v13636_v48 = vand.u32 4294901760, %v10309_v24 }
 0x5dd   : > { %7897 = vmatprep.subr.bf16.mxu1 %v7896_v57  ;;  %v13630_v57 = vand.u32 4294901760, %v10274_v44  ;;  %v13637_v44 = vand.u32 4294901760, %v10313_v50  ;;  %v13644_v50 = vand.u32 4294901760, %v10418_v25 }
 0x5e4   : > { %7899 = vmatpush3.bf16.xpose.msra.mxu1 %v7898_v19  ;;  %v7948_v19 = vpack.c.bf16 %v13630_v57, %v13629_v26  ;;  %v13642_v57 = vand.u32 4294901760, %v10400_v18  ;;  %v13649_v18 = vand.u32 4294901760, %v10465_v29  ;;  %v13656_v29 = vand.u32 4294901760, %v10558_v14 }
 0x5e5   : > { %7901 = vmatprep.subr.bf16.mxu1 %v7900_v40  ;;  %v13631_v40 = vld [vmem:[#allocation45_spill] sm:$0xff] }
 0x5ec   : > { %7903 = vmatpush3.bf16.xpose.msra.mxu1 %v7902_v12  ;;  %v13632_v12 = vand.u32 4294901760, %v10290_v22  ;;  %v13638_v22 = vand.u32 4294901760, %v10351_v3  ;;  %v13645_v3 = vand.u32 4294901760, %v10420_v53  ;;  %v13652_v53 = vand.u32 4294901760, %v10477_v16 }
 0x5ed   : > { %7905 = vmatprep.subr.bf16.mxu1 %v7904_v31  ;;  %v13633_v31 = vand.u32 4294901760, %v10292_v0  ;;  %v13639_v0 = vand.u32 4294901760, %v10353_v61 }
 0x5ee   : > { %v7962_v61 = vpack.c.bf16 %v13645_v3, %v13644_v50  ;;  %v13673_v3 = vld [vmem:[#allocation18_spill] sm:$0xff] }
 0x5ef   : > { %v7956_v26 = vpack.c.bf16 %v13639_v0, %v13638_v22  ;;  %v13668_v22 = vld [vmem:[#allocation11_spill] sm:$0xff] }
 0x5f0   : > { %v13012_v0 = vand.u32 4294901760, %v13668_v22 }
 0x5f4   : > { %7907 = vmatpush3.bf16.xpose.msra.mxu1 %v7906_v59  ;;  %v7950_v59 = vpack.c.bf16 %v13633_v31, %v13632_v12  ;;  %v13646_v12 = vand.u32 4294901760, %v10442_v55  ;;  %v13647_v31 = vand.u32 4294901760, %v10444_v8  ;;  %v13653_v55 = vand.u32 4294901760, %v10480_v15 }
 0x5f5   : > { %7909 = vmatprep.subr.bf16.mxu1 %v7908_v10  ;;  %v13634_v10 = vand.u32 4294901760, %v10304_v28  ;;  %v13640_v28 = vand.u32 4294901760, %v10371_v37 }
 0x5f6   : > { %v7964_v37 = vpack.c.bf16 %v13647_v31, %v13646_v12  ;;  %v7970_v8 = vpack.c.bf16 %v13653_v55, %v13652_v53  ;;  %v13674_v12 = vld [vmem:[#allocation19_spill] sm:$0xff]  ;;  %v13679_v55 = vld [vmem:[#allocation29_spill] sm:$0xff] }
 0x5fc   : > { %7911 = vmatpush3.bf16.xpose.msra.mxu1 %v7910_v56  ;;  %v13635_v56 = vand.u32 4294901760, %v10306_v20  ;;  %v13641_v20 = vand.u32 4294901760, %v10373_v5  ;;  %v13648_v5 = vand.u32 4294901760, %v10461_v63 }
 0x5fd   : > { %7913 = vmatprep.subr.bf16.mxu1 %v7912_v39 }
 0x5fe   : > { %v7952_v39 = vpack.c.bf16 %v13635_v56, %v13634_v10  ;;  %v13651_v10 = vand.u32 4294901760, %v10475_v2  ;;  %v13654_v56 = vand.u32 4294901760, %v10553_v33  ;;  %v13660_v33 = vld [vmem:[#allocation25_spill] sm:$0xff] }
 0x604   : > { %7915 = vmatpush3.bf16.xpose.msra.mxu1 %v7914_v54  ;;  %v7954_v54 = vpack.c.bf16 %v13637_v44, %v13636_v48  ;;  %v13658_v48 = vand.u32 4294901760, %v10565_v43  ;;  %v13667_v44 = vld [vmem:[#allocation10_spill] sm:$0xff] }
 0x605   : > { %7917 = vmatprep.subr.bf16.mxu1 %v10270_v62 }
 0x606   : > { %v7976_v16 = vpack.c.bf16 %v13658_v48, %v2602_v38  ;;  %v13663_v38 = vld [vmem:[#allocation6_spill] sm:$0xff]  ;;  %v13683_v48 = vld [vmem:[#allocation36_spill] sm:$0xff] }
 0x60b   : > { %6709 = vmatmul.mubr.f32.vlgmr.msra.gmra.mrb[14].mxu1 %v10603_v6  ;;  %v13625_v6 = vld [vmem:[#allocation49_spill] sm:$0xff] }
 0x60c   : > { %7919 = vmatpush3.bf16.xpose.msra.mxu1 %v10288_v49  ;;  %6742 = vmatprep.mubr.f32.mxu1 %v10606_v46 }
 0x60d   : > { %7921 = vmatprep.subr.bf16.mxu1 %v10302_v42 }
 0x614   : > { %7923 = vmatpush3.bf16.xpose.msra.mxu1 %v10311_v27 }
 0x615   : > { %7925 = vmatprep.subr.bf16.mxu1 %v10344_v34 }
 0x61c   : > { %7927 = vmatpush3.bf16.xpose.msra.mxu1 %v10348_v21 }
 0x61d   : > { %7929 = vmatprep.subr.bf16.mxu1 %v10398_v51 }
 0x624   : > { %7931 = vmatpush3.bf16.xpose.msra.mxu1 %v10416_v1 }
 0x625   : > { %7933 = vmatprep.subr.bf16.mxu1 %v10440_v45 }
 0x62c   : > { %7935 = vmatpush3.bf16.xpose.msra.mxu1 %v10463_v32 }
 0x62d   : > { %7937 = vmatprep.subr.bf16.mxu1 %v10471_v7 }
 0x634   : > { %7939 = vmatpush3.bf16.xpose.msra.mxu1 %v13625_v6 }
 0x635   : > { %7941 = vmatprep.subr.bf16.mxu1 %v13626_v52 }
 0x63c   : > { %7943 = vmatpush3.bf16.xpose.msra.mxu1 %v13627_v9 }
 0x63d   : > { %7945 = vmatprep.subr.bf16.mxu1 %v13628_v36 }
 0x644   : > { %7947 = vmatpush3.bf16.xpose.msra.mxu1 %v13631_v40 }
 0x645   : > { %7949 = vmatprep.subr.bf16.mxu1 %v7948_v19  ;;  %v13643_v19 = vand.u32 4294901760, %v10402_v11  ;;  %v7966_v11 = vpack.c.bf16 %v13649_v18, %v13648_v5  ;;  %v13676_v18 = vld [vmem:[#allocation21_spill] sm:$0xff] }
 0x647   : > { %v7960_v24 = vpack.c.bf16 %v13643_v19, %v13642_v57  ;;  %v13671_v57 = vld [vmem:[#allocation16_spill] sm:$0xff] }
 0x648   : > { %v13031_v19 = vand.u32 4294901760, %v13671_v57 }
 0x64b   : > { %6743 = vmatmul.mubr.f32.vlgmr.msra.gmra.mrb[14].mxu1 %v10606_v46  ;;  %v7958_v46 = vpack.c.bf16 %v13641_v20, %v13640_v28  ;;  %v13670_v20 = vld [vmem:[#allocation15_spill] sm:$0xff] }
 0x64c   : > { %7951 = vmatpush3.bf16.xpose.msra.mxu1 %v7950_v59  ;;  %6776 = vmatprep.mubr.f32.mxu1 %v10591_v13  ;;  %v13650_v59 = vand.u32 4294901760, %v10473_v23  ;;  %v13657_v23 = vand.u32 4294901760, %v10560_v30  ;;  %v13659_v30 = vld [vmem:[#allocation23_spill] sm:$0xff] }
 0x64d   : > { %7953 = vmatprep.subr.bf16.mxu1 %v7952_v39  ;;  %v13655_v39 = vand.u32 4294901760, %v10555_v47  ;;  %v7978_v47 = vpack.c.bf16 %v2497_v60, %v2490_v35  ;;  %v13021_v35 = vand.u32 4294901760, %v13663_v38  ;;  %v13664_v60 = vld [vmem:[#allocation7_spill] sm:$0xff] }
 0x64e   : > { %v7968_v25 = vpack.c.bf16 %v13651_v10, %v13650_v59  ;;  %v7974_v2 = vpack.c.bf16 %v13657_v23, %v13656_v29  ;;  %v13677_v59 = vld [vmem:[#allocation24_spill] sm:$0xff]  ;;  %v13682_v23 = vld [vmem:[#allocation34_spill] sm:$0xff] }
 0x64f   : > { %v7972_v63 = vpack.c.bf16 %v13655_v39, %v13654_v56  ;;  %v13680_v56 = vld [vmem:[#allocation32_spill] sm:$0xff] }
 0x654   : > { %7955 = vmatpush3.bf16.xpose.msra.mxu1 %v7954_v54  ;;  %v13013_v54 = vand.u32 4294901760, %v13667_v44 }
 0x655   : > { %7957 = vmatprep.subr.bf16.mxu1 %v7956_v26  ;;  %v13669_v26 = vld [vmem:[#allocation12_spill] sm:$0xff] }
 0x656   : > { %v13010_v28 = vand.u32 4294901760, %v13669_v26 }
 0x65c   : > { %7959 = vmatpush3.bf16.xpose.msra.mxu1 %v7958_v46  ;;  %v13011_v46 = vand.u32 4294901760, %v13670_v20 }
 0x65d   : > { %7961 = vmatprep.subr.bf16.mxu1 %v7960_v24  ;;  %v13672_v24 = vld [vmem:[#allocation17_spill] sm:$0xff] }
 0x65e   : > { %v13030_v50 = vand.u32 4294901760, %v13672_v24 }
 0x664   : > { %7963 = vmatpush3.bf16.xpose.msra.mxu1 %v7962_v61 }
 0x665   : > { %7965 = vmatprep.subr.bf16.mxu1 %v7964_v37  ;;  %v13675_v37 = vld [vmem:[#allocation20_spill] sm:$0xff] }
 0x66c   : > { %7967 = vmatpush3.bf16.xpose.msra.mxu1 %v7966_v11 }
 0x66d   : > { %7969 = vmatprep.subr.bf16.mxu1 %v7968_v25  ;;  %v13678_v25 = vld [vmem:[#allocation28_spill] sm:$0xff] }
 0x674   : > { %7971 = vmatpush3.bf16.xpose.msra.mxu1 %v7970_v8 }
 0x675   : > { %7973 = vmatprep.subr.bf16.mxu1 %v7972_v63  ;;  %v13681_v63 = vld [vmem:[#allocation33_spill] sm:$0xff] }
 0x67c   : > { %7975 = vmatpush3.bf16.xpose.msra.mxu1 %v7974_v2 }
 0x67d   : > { %7977 = vmatprep.subr.bf16.mxu1 %v7976_v16 }
 0x684   : > { %7979 = vmatpush3.bf16.xpose.msra.mxu1 %v7978_v47  ;;  %v13684_v47 = vld [vmem:[#allocation40_spill] sm:$0xff] }
 0x685   : > { %7981 = vmatprep.subr.bf16.mxu1 %v10270_v62  ;;  %v3146_v62 = vrot.slane %v6140_v17, %v13660_v33 }
 0x68b   : > { %6777 = vmatmul.mubr.f32.vlgmr.msra.gmra.mrb[14].mxu1 %v10591_v13 }
 0x68c   : > { %7983 = vmatpush3.bf16.xpose.msra.mxu1 %v10288_v49  ;;  %6810 = vmatprep.mubr.f32.mxu1 %v10591_v13 }
 0x68d   : > { %7985 = vmatprep.subr.bf16.mxu1 %v10302_v42 }
 0x694   : > { %7987 = vmatpush3.bf16.xpose.msra.mxu1 %v10311_v27 }
 0x695   : > { %7989 = vmatprep.subr.bf16.mxu1 %v10344_v34 }
 0x69c   : > { %7991 = vmatpush3.bf16.xpose.msra.mxu1 %v10348_v21 }
 0x69d   : > { %7993 = vmatprep.subr.bf16.mxu1 %v10398_v51 }
 0x6a4   : > { %7995 = vmatpush3.bf16.xpose.msra.mxu1 %v10416_v1  ;;  %v13661_v1 = vld [vmem:[#allocation26_spill] sm:$0xff] }
 0x6a5   : > { %7997 = vmatprep.subr.bf16.mxu1 %v10440_v45  ;;  %v13662_v45 = vld [vmem:[#allocation31_spill] sm:$0xff] }
 0x6ac   : > { %7999 = vmatpush3.bf16.xpose.msra.mxu1 %v10463_v32  ;;  %v3142_v32 = vrot.slane %v6140_v17, %v13659_v30  ;;  %v13705_v30 = vand.u32 4294901760, %v13669_v26 }
 0x6ad   : > { %8001 = vmatprep.subr.bf16.mxu1 %v10471_v7 }
 0x6b4   : > { %8003 = vmatpush3.bf16.xpose.msra.mxu1 %v13625_v6  ;;  %v13020_v6 = vand.u32 4294901760, %v13664_v60 }
 0x6b5   : > { %8005 = vmatprep.subr.bf16.mxu1 %v13626_v52  ;;  %v13665_v52 = vld [vmem:[#allocation8_spill] sm:$0xff] }
 0x6bc   : > { %8007 = vmatpush3.bf16.xpose.msra.mxu1 %v13627_v9  ;;  %v13019_v9 = vand.u32 4294901760, %v13665_v52 }
 0x6bd   : > { %8009 = vmatprep.subr.bf16.mxu1 %v13628_v36  ;;  %v13666_v36 = vld [vmem:[#allocation9_spill] sm:$0xff] }
 0x6c4   : > { %8011 = vmatpush3.bf16.xpose.msra.mxu1 %v13631_v40  ;;  %v13017_v40 = vand.u32 4294901760, %v13666_v36 }
 0x6cb   : > { %6811 = vmatmul.mubr.f32.vlgmr.msra.gmra.mrb[14].mxu1 %v10591_v13 }
 0x79e   : > { %v3131_v14 = vpop.f32.mrb[14].mxu1 }
 0x79f   : > { %v3136_v49 = vmul.f32 2.0, %v3131_v14  ;;  %v3133_v42 = vpop.f32.mrb[15].mxu1 }
 0x7a0   : > { %v3137_v27 = vmul.f32 2.0, %v3133_v42  ;;  %v13687_v42 = vld [vmem:[#allocation52_spill] sm:$0xff] }
 0x7a1   : > { %v3149_v41 = vsub.f32 %v3142_v32, %v3136_v49  ;;  %v13685_v32 = vld [vmem:[#allocation42_spill] sm:$0xff]  ;;  %v10929_v49 = vsub.f32 %v13670_v20, %v13011_v46 }
 0x7a2   : > { %v3150_v34 = vsub.f32 %v3146_v62, %v3137_v27  ;;  %v13686_v62 = vld [vmem:[#allocation47_spill] sm:$0xff]  ;;  %v10924_v27 = vsub.f32 %v13669_v26, %v13010_v28 }
 0x7a3   : > { %v13027_v28 = vand.u32 4294901760, %v10929_v49 }
 0x7a4   : > { %v3151_v21 = vmin.f32 %v3149_v41, %v3150_v34  ;;  %v13024_v8 = vand.u32 4294901760, %v10924_v27 }
 0x7a6   : > { %3152 = vmin.xlane.f32.xlu1 %v3151_v21  ;;  %v10894_v21 = vsub.f32 %v13663_v38, %v13021_v35 }
 0x7a8   : > { %v13014_v14 = vand.u32 4294901760, %v10894_v21 }
 0x7aa   : > { %v3408_v46 = vsub.f32 %v10894_v21, %v13014_v14 }
 0x7ac   : > { %v3409_v11 = vand.u32 4294901760, %v3408_v46 }
 0x833   : > { %v3153_v51 = vpop.xlane.xlu1 %3152 }
 0x834   : > { %vm3154_vm8 = vcmp.le.f32.partialorder %v3149_v41, %v3153_v51  ;;  %vm3155_vm9 = vcmp.le.f32.partialorder %v3150_v34, %v3153_v51  ;;  %v13688_v41 = vld [vmem:[#allocation53_spill] sm:$0xff]  ;;  %v10899_v51 = vsub.f32 %v13664_v60, %v13020_v6  ;;  %v10919_v34 = vsub.f32 %v13668_v22, %v13012_v0 }
 0x835   : > { %v3156_v7 = vsel %vm3154_vm8, %v13661_v1, 256  ;;  %v3157_v15 = vsel %vm3155_vm9, %v13662_v45, 256 }
 0x836   : > { %vm3158_vm10 = vcmp.lt.s32.totalorder %v3156_v7, %v3157_v15  ;;  %v13015_v17 = vand.u32 4294901760, %v10899_v51  ;;  %v13023_v39 = vand.u32 4294901760, %v10919_v34 }
 0x837   : > { %v10859_v58 = vsel %vm3158_vm10, %v3156_v7, %v3157_v15  ;;  %v10904_v7 = vsub.f32 %v13665_v52, %v13019_v9  ;;  %v10909_v15 = vsub.f32 %v13666_v36, %v13017_v40 }
 0x838   : > { %v3161_v43 = vshra.s32 %v10859_v58, 16  ;;  %v3415_v0 = vsub.f32 %v10899_v51, %v13015_v17  ;;  %v3429_v14 = vsub.f32 %v10919_v34, %v13023_v39  ;;  %v3310_v17 = vsub.f32 %v10924_v27, %v13024_v8 }
 0x839   : > { %v13016_v16 = vand.u32 4294901760, %v10904_v7  ;;  %v13018_v2 = vand.u32 4294901760, %v10909_v15  ;;  %v10966_v39 = vsub.f32 %v13671_v57, %v13031_v19  ;;  %v10971_v8 = vsub.f32 %v13672_v24, %v13030_v50 }
 0x83a   : > { %v10862_v13 = vcvt.s32.f32 %v3161_v43  ;;  %v10914_v43 = vsub.f32 %v13667_v44, %v13013_v54  ;;  %v3416_v5 = vand.u32 4294901760, %v3415_v0  ;;  %v3430_v6 = vand.u32 4294901760, %v3429_v14 }
 0x83b   : > { %v3296_v54 = vsub.f32 %v10904_v7, %v13016_v16  ;;  %v3303_v53 = vsub.f32 %v10909_v15, %v13018_v2  ;;  %v3317_v16 = vsub.f32 %v10929_v49, %v13027_v28  ;;  %v3311_v35 = vand.u32 4294901760, %v3310_v17 }
 0x83c   : > { %3164 = vmin.xlane.f32.xlu0 %v10862_v13  ;;  %v13022_v29 = vand.u32 4294901760, %v10914_v43  ;;  %v8044_v31 = vpack.c.bf16 %v3416_v5, %v3409_v11  ;;  %v13690_v5 = vand.u32 4294901760, %v13674_v12  ;;  %v13026_v11 = vand.u32 4294901760, %v10966_v39 }
 0x83d   : > { %v3297_v40 = vand.u32 4294901760, %v3296_v54  ;;  %v3304_v2 = vand.u32 4294901760, %v3303_v53  ;;  %v13689_v54 = vand.u32 4294901760, %v13673_v3  ;;  %v13025_v53 = vand.u32 4294901760, %v10971_v8 }
 0x83e   : > { %v3422_v10 = vsub.f32 %v10914_v43, %v13022_v29  ;;  %v3318_v29 = vand.u32 4294901760, %v3317_v16  ;;  %8045 = vmatprep.subr.bf16.mxu0 %v8044_v31  ;;  %v13697_v14 = vand.u32 4294901760, %v13675_v37 }
 0x83f   : > { %v8046_v61 = vpack.c.bf16 %v3304_v2, %v3297_v40  ;;  %v10981_v40 = vsub.f32 %v13674_v12, %v13690_v5  ;;  %v13691_v2 = vand.u32 4294901760, %v13663_v38  ;;  %v13698_v38 = vand.u32 4294901760, %v13676_v18 }
 0x840   : > { %v3423_v9 = vand.u32 4294901760, %v3422_v10  ;;  %v8050_v0 = vpack.c.bf16 %v3318_v29, %v3311_v35  ;;  %v10976_v10 = vsub.f32 %v13673_v3, %v13689_v54  ;;  %v13695_v29 = vand.u32 4294901760, %v13666_v36 }
 0x841   : > { %8047 = vmatpush3.bf16.msra.mxu0 %v8046_v61  ;;  %v13029_v31 = vand.u32 4294901760, %v10981_v40  ;;  %v11002_v54 = vsub.f32 %v13675_v37, %v13697_v14  ;;  %v3436_v36 = vsub.f32 %v10966_v39, %v13026_v11  ;;  %v3443_v61 = vsub.f32 %v10971_v8, %v13025_v53 }
 0x842   : > { %v8048_v46 = vpack.c.bf16 %v3430_v6, %v3423_v9  ;;  %v13692_v6 = vand.u32 4294901760, %v13664_v60  ;;  %v13694_v9 = vand.u32 4294901760, %v13665_v52  ;;  %v13028_v17 = vand.u32 4294901760, %v10976_v10  ;;  %v13699_v52 = vld [vmem:[#allocation55_spill] sm:$0xff] }
 0x843   : > { %v11007_v60 = vsub.f32 %v13676_v18, %v13698_v38  ;;  %v3437_v38 = vand.u32 4294901760, %v3436_v36  ;;  %v3444_v53 = vand.u32 4294901760, %v3443_v61 }
 0x844   : > { %v10989_v35 = vpack.c.bf16 %v13692_v6, %v13691_v2  ;;  %v10995_v16 = vpack.c.bf16 %v13695_v29, %v13694_v9  ;;  %8049 = vmatprep.subr.bf16.mxu0 %v8048_v46  ;;  %v13700_v2 = vand.u32 4294901760, %v13677_v59  ;;  %v3324_v9 = vsub.f32 %v10976_v10, %v13028_v17 }
 0x845   : > { %v3331_v46 = vsub.f32 %v10981_v40, %v13029_v31  ;;  %v13032_v29 = vand.u32 4294901760, %v11002_v54  ;;  %v13033_v14 = vand.u32 4294901760, %v11007_v60  ;;  %8051 = vmatpush3.bf16.msra.mxu0 %v8050_v0  ;;  %v8052_v36 = vpack.c.bf16 %v3444_v53, %v3437_v38 }
 0x846   : > { %13693 = vst [vmem:[#allocation50_spill] sm:$0xff] %v10989_v35  ;;  %13696 = vst [vmem:[#allocation54_spill] sm:$0xff] %v10995_v16  ;;  %8013 = vmatprep.subr.bf16.mxu1 %v10989_v35  ;;  %v11020_v6 = vsub.f32 %v13677_v59, %v13700_v2  ;;  %v13701_v2 = vand.u32 4294901760, %v13678_v25  ;;  %v3325_v17 = vand.u32 4294901760, %v3324_v9  ;;  %v13703_v0 = vand.u32 4294901760, %v13668_v22 }
 0x847   : > { %8015 = vmatpush3.bf16.msra.mxu1 %v10995_v16  ;;  %v3332_v5 = vand.u32 4294901760, %v3331_v46  ;;  %v3450_v31 = vsub.f32 %v11002_v54, %v13032_v29  ;;  %v3457_v50 = vsub.f32 %v11007_v60, %v13033_v14  ;;  %v13706_v14 = vand.u32 4294901760, %v13670_v20  ;;  %8053 = vmatprep.subr.bf16.mxu0 %v8052_v36 }
 0x848   : > { %v13034_v11 = vand.u32 4294901760, %v11020_v6  ;;  %v11035_v28 = vsub.f32 %v13678_v25, %v13701_v2  ;;  %v13702_v2 = vand.u32 4294901760, %v13667_v44  ;;  %v13708_v44 = vand.u32 4294901760, %v13679_v55 }
 0x849   : > { %v8054_v46 = vpack.c.bf16 %v3332_v5, %v3325_v17  ;;  %v3451_v33 = vand.u32 4294901760, %v3450_v31  ;;  %v3458_v29 = vand.u32 4294901760, %v3457_v50  ;;  %v11057_v53 = vpack.c.bf16 %v13706_v14, %v13705_v30  ;;  %v13710_v30 = vld [vmem:[#allocation56_spill] sm:$0xff] }
 0x84a   : > { %v3338_v61 = vsub.f32 %v11020_v6, %v13034_v11  ;;  %v13035_v19 = vand.u32 4294901760, %v11035_v28  ;;  %v11051_v9 = vpack.c.bf16 %v13703_v0, %v13702_v2  ;;  %v11066_v22 = vsub.f32 %v13679_v55, %v13708_v44 }
 0x84b   : > { %13707 = vst [vmem:[#allocation59_spill] sm:$0xff] %v11057_v53  ;;  %v13709_v50 = vand.u32 4294901760, %v13680_v56  ;;  %8055 = vmatpush3.bf16.msra.mxu0 %v8054_v46  ;;  %v8056_v17 = vpack.c.bf16 %v3458_v29, %v3451_v33  ;;  %v13711_v31 = vand.u32 4294901760, %v13681_v63  ;;  %v13712_v14 = vand.u32 4294901760, %v13682_v23 }
 0x84c   : > { %13704 = vst [vmem:[#allocation58_spill] sm:$0xff] %v11051_v9  ;;  %v3339_v38 = vand.u32 4294901760, %v3338_v61  ;;  %v3345_v11 = vsub.f32 %v11035_v28, %v13035_v19  ;;  %8017 = vmatprep.subr.bf16.mxu1 %v11051_v9  ;;  %v13039_v2 = vand.u32 4294901760, %v11066_v22  ;;  %v13713_v46 = vand.u32 4294901760, %v13671_v57 }
 0x84d   : > { %v11071_v26 = vsub.f32 %v13680_v56, %v13709_v50  ;;  %8019 = vmatpush3.bf16.msra.mxu1 %v11057_v53  ;;  %v11078_v5 = vsub.f32 %v13681_v63, %v13711_v31  ;;  %v11083_v36 = vsub.f32 %v13682_v23, %v13712_v14  ;;  %v13714_v33 = vand.u32 4294901760, %v13672_v24  ;;  %8057 = vmatprep.subr.bf16.mxu0 %v8056_v17 }
 0x84e   : > { %v3346_v61 = vand.u32 4294901760, %v3345_v11  ;;  %v13716_v31 = vand.u32 4294901760, %v13673_v3  ;;  %v13717_v14 = vand.u32 4294901760, %v13674_v12  ;;  %v13719_v19 = vand.u32 4294901760, %v13683_v48 }
 0x84f   : > { %v13037_v0 = vand.u32 4294901760, %v11071_v26  ;;  %v11091_v29 = vpack.c.bf16 %v13714_v33, %v13713_v46  ;;  %v13036_v44 = vand.u32 4294901760, %v11078_v5  ;;  %v13038_v50 = vand.u32 4294901760, %v11083_v36 }
 0x850   : > { %v11099_v11 = vpack.c.bf16 %v13717_v14, %v13716_v31  ;;  %v11104_v20 = vsub.f32 %v13683_v48, %v13719_v19  ;;  %v8058_v57 = vpack.c.bf16 %v3346_v61, %v3339_v38  ;;  %v3464_v24 = vsub.f32 %v11066_v22, %v13039_v2 }
 0x851   : > { %13715 = vst [vmem:[#allocation62_spill] sm:$0xff] %v11091_v29  ;;  %v3471_v17 = vsub.f32 %v11071_v26, %v13037_v0  ;;  %8021 = vmatprep.subr.bf16.mxu1 %v11091_v29  ;;  %v13720_v3 = vand.u32 4294901760, %v13684_v47  ;;  %v3352_v19 = vsub.f32 %v11078_v5, %v13036_v44  ;;  %v3359_v38 = vsub.f32 %v11083_v36, %v13038_v50 }
 0x852   : > { %13718 = vst [vmem:[#allocation63_spill] sm:$0xff] %v11099_v11  ;;  %8023 = vmatpush3.bf16.msra.mxu1 %v11099_v11  ;;  %v13046_v61 = vand.u32 4294901760, %v11104_v20  ;;  %v13721_v46 = vand.u32 4294901760, %v13685_v32  ;;  %8059 = vmatpush3.bf16.msra.mxu0 %v8058_v57  ;;  %v3465_v31 = vand.u32 4294901760, %v3464_v24  ;;  %v13722_v44 = vand.u32 4294901760, %v13686_v62 }
 0x853   : > { %v11116_v12 = vsub.f32 %v13684_v47, %v13720_v3  ;;  %v3472_v14 = vand.u32 4294901760, %v3471_v17  ;;  %v3353_v50 = vand.u32 4294901760, %v3352_v19  ;;  %v3360_v2 = vand.u32 4294901760, %v3359_v38 }
 0x854   : > { %v11129_v33 = vsub.f32 %v13685_v32, %v13721_v46  ;;  %v11135_v0 = vsub.f32 %v13686_v62, %v13722_v44  ;;  %v3478_v4 = vsub.f32 %v11104_v20, %v13046_v61  ;;  %v13723_v17 = vand.u32 4294901760, %v13675_v37 }
 0x855   : > { %v13049_v3 = vand.u32 4294901760, %v11116_v12  ;;  %v8060_v46 = vpack.c.bf16 %v3472_v14, %v3465_v31  ;;  %v13724_v44 = vand.u32 4294901760, %v13676_v18  ;;  %v8062_v19 = vpack.c.bf16 %v3360_v2, %v3353_v50 }
 0x856   : > { %v13053_v11 = vand.u32 4294901760, %v11129_v33  ;;  %v13050_v24 = vand.u32 4294901760, %v11135_v0  ;;  %v3479_v38 = vand.u32 4294901760, %v3478_v4  ;;  %v13726_v31 = vand.u32 4294901760, %v13677_v59 }
 0x857   : > { %v3485_v57 = vsub.f32 %v11116_v12, %v13049_v3  ;;  %v11149_v29 = vpack.c.bf16 %v13724_v44, %v13723_v17  ;;  %v13727_v14 = vand.u32 4294901760, %v13678_v25  ;;  %8061 = vmatprep.subr.bf16.mxu0 %v8060_v46  ;;  %v13729_v4 = vand.u32 4294901760, %v13687_v42 }
 0x858   : > { %v3366_v61 = vsub.f32 %v11129_v33, %v13053_v11  ;;  %v3373_v37 = vsub.f32 %v11135_v0, %v13050_v24  ;;  %v13730_v2 = vand.u32 4294901760, %v13688_v41  ;;  %8063 = vmatpush3.bf16.msra.mxu0 %v8062_v19  ;;  %v13731_v50 = vand.u32 4294901760, %v13699_v52 }
 0x859   : > { %13725 = vst [vmem:[#allocation69_spill] sm:$0xff] %v11149_v29  ;;  %v11158_v53 = vpack.c.bf16 %v13727_v14, %v13726_v31  ;;  %v3486_v3 = vand.u32 4294901760, %v3485_v57  ;;  %8025 = vmatprep.subr.bf16.mxu1 %v11149_v29  ;;  %v11167_v18 = vsub.f32 %v13687_v42, %v13729_v4  ;;  %v13732_v57 = vand.u32 4294901760, %v13710_v30 }
 0x85a   : > { %v11172_v59 = vsub.f32 %v13688_v41, %v13730_v2  ;;  %v3367_v25 = vand.u32 4294901760, %v3366_v61  ;;  %v11178_v46 = vsub.f32 %v13699_v52, %v13731_v50  ;;  %v13734_v44 = vand.u32 4294901760, %v13679_v55 }
 0x85b   : > { %13728 = vst [vmem:[#allocation44_spill] sm:$0xff] %v11158_v53  ;;  %8027 = vmatpush3.bf16.msra.mxu1 %v11158_v53  ;;  %v11183_v17 = vsub.f32 %v13710_v30, %v13732_v57  ;;  %v13735_v31 = vand.u32 4294901760, %v13680_v56  ;;  %v8064_v19 = vpack.c.bf16 %v3486_v3, %v3479_v38  ;;  %v3374_v61 = vand.u32 4294901760, %v3373_v37 }
 0x85c   : > { %v13051_v4 = vand.u32 4294901760, %v11167_v18  ;;  %v13052_v2 = vand.u32 4294901760, %v11172_v59  ;;  %v13054_v50 = vand.u32 4294901760, %v11178_v46  ;;  %v13742_v29 = vand.u32 4294901760, %v13682_v23 }
 0x85d   : > { %13733 = vst [vmem:[#allocation48_spill] sm:$0xff] %v11183_v17  ;;  %v11189_v14 = vpack.c.bf16 %v13735_v31, %v13734_v44  ;;  %v13059_v24 = vand.u32 4294901760, %v11183_v17  ;;  %8065 = vmatprep.subr.bf16.mxu0 %v8064_v19  ;;  %v8066_v57 = vpack.c.bf16 %v3374_v61, %v3367_v25  ;;  %v13746_v23 = vand.u32 4294901760, %v13686_v62 }
 0x85e   : > { %v3492_v55 = vsub.f32 %v11167_v18, %v13051_v4  ;;  %v3499_v56 = vsub.f32 %v11172_v59, %v13052_v2  ;;  %v3380_v3 = vsub.f32 %v11178_v46, %v13054_v50  ;;  %v3160_v4 = vand.u32 65535, %v10859_v58 }
 0x85f   : > { %13736 = vst [vmem:[#allocation13_spill] sm:$0xff] %v11189_v14  ;;  %8029 = vmatprep.subr.bf16.mxu1 %v11189_v14  ;;  %v3387_v38 = vsub.f32 %v11183_v17, %v13059_v24  ;;  %8067 = vmatpush3.bf16.msra.mxu0 %v8066_v57  ;;  %v13737_v14 = vld [vmem:[#allocation35_spill] sm:$0xff]  ;;  %v13738_v24 = vld [vmem:[#allocation37_spill] sm:$0xff]  ;;  %v13744_v17 = vand.u32 4294901760, %v13684_v47  ;;  %v13748_v47 = vand.u32 4294901760, %v13688_v41  ;;  %v13750_v62 = vand.u32 4294901760, %v13710_v30 }
 0x860   : > { %v3493_v37 = vand.u32 4294901760, %v3492_v55  ;;  %v3500_v44 = vand.u32 4294901760, %v3499_v56  ;;  %v3381_v25 = vand.u32 4294901760, %v3380_v3  ;;  %v3162_v11 = vcvt.s32.f32 %v3160_v4  ;;  %v13739_v55 = vld [vmem:[#allocation38_spill] sm:$0xff]  ;;  %v13740_v3 = vld [vmem:[#allocation39_spill] sm:$0xff] }
 0x861   : > { %v3388_v31 = vand.u32 4294901760, %v3387_v38  ;;  %v3271_v53 = vand.u32 4294901760, %v13737_v14  ;;  %v3274_v57 = vand.u32 4294901760, %v13738_v24  ;;  %v3223_v56 = vand.u32 4294901760, %v13739_v55 }
 0x862   : > { %v8068_v19 = vpack.c.bf16 %v3500_v44, %v3493_v37  ;;  %v3226_v38 = vand.u32 4294901760, %v13740_v3 }
 0x863   : > { %v8070_v61 = vpack.c.bf16 %v3388_v31, %v3381_v25  ;;  %v11215_v37 = vsub.f32 %v13737_v14, %v3271_v53  ;;  %v11218_v44 = vsub.f32 %v13738_v24, %v3274_v57  ;;  %v11221_v58 = vsub.f32 %v13739_v55, %v3223_v56 }
 0x864   : > { %8069 = vmatprep.subr.bf16.mxu0 %v8068_v19 }
 0x865   : > { %8071 = vmatpush3.bf16.msra.mxu0 %v8070_v61  ;;  %v13069_v4 = vand.u32 4294901760, %v11218_v44 }
 0x867   : > { %v3513_v24 = vsub.f32 %v11218_v44, %v13069_v4 }
 0x869   : > { %v3514_v55 = vand.u32 4294901760, %v3513_v24 }
 0x8c9   : > { %v3165_v2 = vpop.xlane.xlu0 %3164 }
 0x8ca   : > { %vm3166_vm11 = vcmp.eq.f32.partialorder %v10862_v13, %v3165_v2  ;;  %v11224_v13 = vsub.f32 %v13740_v3, %v3226_v38  ;;  %v13741_v3 = vand.u32 4294901760, %v13681_v63  ;;  %v13745_v63 = vand.u32 4294901760, %v13685_v32 }
 0x8cb   : > { %v3167_v50 = vsel %vm3166_vm11, %v3162_v11, inf  ;;  %v13064_v11 = vand.u32 4294901760, %v11215_v37  ;;  %v13749_v32 = vand.u32 4294901760, %v13699_v52  ;;  %v3171_v52 = vcvt.f32.s32 %v3165_v2 }
 0x8cc   : > { %3168 = vmin.xlane.f32.xlu1 %v3167_v50  ;;  %v13070_v50 = vand.u32 4294901760, %v11221_v58  ;;  %v13073_v25 = vand.u32 4294901760, %v11224_v13  ;;  %v11246_v9 = vpack.c.bf16 %v13742_v29, %v13741_v3  ;;  %v11259_v29 = vpack.c.bf16 %v13746_v23, %v13745_v63 }
 0x8cd   : > { %v3506_v14 = vsub.f32 %v11215_v37, %v13064_v11  ;;  %v8106_v41 = vpack.c.bf16 %v11224_v13, %v11221_v58  ;;  %v8080_v2 = vpack.c.bf16 %v10919_v34, %v10914_v43  ;;  %v8084_v3 = vpack.c.bf16 %v10971_v8, %v10966_v39 }
 0x8ce   : > { %v3394_v31 = vsub.f32 %v11221_v58, %v13070_v50  ;;  %v3401_v19 = vsub.f32 %v11224_v13, %v13073_v25  ;;  %8031 = vmatpush3.bf16.msra.mxu1 %v11246_v9  ;;  %v13743_v50 = vand.u32 4294901760, %v13683_v48  ;;  %v13747_v48 = vand.u32 4294901760, %v13687_v42 }
 0x8cf   : > { %v3507_v61 = vand.u32 4294901760, %v3506_v14  ;;  %v8076_v14 = vpack.c.bf16 %v10899_v51, %v10894_v21  ;;  %v8104_v42 = vpack.c.bf16 %v11218_v44, %v11215_v37 }
 0x8d0   : > { %v3395_v11 = vand.u32 4294901760, %v3394_v31  ;;  %v3402_v16 = vand.u32 4294901760, %v3401_v19  ;;  %v11253_v25 = vpack.c.bf16 %v13744_v17, %v13743_v50  ;;  %v11279_v17 = vpack.c.bf16 %v3274_v57, %v3271_v53 }
 0x8d1   : > { %v8072_v35 = vpack.c.bf16 %v3514_v55, %v3507_v61  ;;  %v8078_v53 = vpack.c.bf16 %v10909_v15, %v10904_v7  ;;  %v13751_v57 = vmov 1.0   ;;  %v8082_v55 = vpack.c.bf16 %v10929_v49, %v10924_v27 }
 0x8d2   : > { %v8074_v4 = vpack.c.bf16 %v3402_v16, %v3395_v11  ;;  %8033 = vmatprep.subr.bf16.mxu1 %v11253_v25  ;;  %v11275_v16 = vpack.c.bf16 %v13750_v62, %v13749_v32  ;;  %v11281_v11 = vpack.c.bf16 %v3226_v38, %v3223_v56  ;;  %v13752_v56 = vmov 0.0  }
 0x8d3   : > { %8073 = vmatprep.subr.bf16.mxu0 %v8072_v35  ;;  %8035 = vmatpush3.bf16.msra.mxu1 %v11259_v29  ;;  %v11269_v35 = vpack.c.bf16 %v13748_v47, %v13747_v48  ;;  %v8086_v47 = vpack.c.bf16 %v10981_v40, %v10976_v10 }
 0x8d4   : > { %8075 = vmatpush3.bf16.msra.mxu0 %v8074_v4  ;;  %v3172_v4 = vshll.u32 %v3171_v52, 16  ;;  %v8088_v52 = vpack.c.bf16 %v11007_v60, %v11002_v54 }
 0x8d5   : > { %8077 = vmatprep.subr.bf16.mxu0 %v8076_v14  ;;  %8037 = vmatprep.subr.bf16.mxu1 %v11269_v35 }
 0x8d7   : > { %8039 = vmatpush3.bf16.msra.mxu1 %v11275_v16 }
 0x8d8   : > { %8041 = vmatprep.subr.bf16.mxu1 %v11279_v17 }
 0x8db   : > { %8043 = vmatpush3.bf16.msra.mxu1 %v11281_v11 }
 0x959   : > { %v3169_v30 = vpop.xlane.xlu1 %3168 }
 0x95a   : > { %v3170_v50 = vcvt.f32.s32 %v3169_v30  ;;  %v8090_v30 = vpack.c.bf16 %v11035_v28, %v11020_v6 }
 0x95c   : > { %v11289_v24 = vadd.s32 %v3172_v4, %v3170_v50  ;;  %v8092_v4 = vpack.c.bf16 %v11071_v26, %v11066_v22  ;;  %v8094_v50 = vpack.c.bf16 %v11083_v36, %v11078_v5 }
 0x95e   : > { %4043 = vst.msk [vmem:[%s10072_s15] sm:$0xff] %vm4042_vm12, %v11289_v24  ;;  %vm3175_vm13 = vcmp.eq.s32.totalorder %v13662_v45, %v11289_v24  ;;  %vm3174_vm14 = vcmp.eq.s32.totalorder %v13661_v1, %v11289_v24  ;;  %v11492_v24 = vld [vmem:[%s12674_s1 + $0x210] sm:$0xff] }
 0x95f   : > { %6143 = vmatprep.mubr.msk.f32.mxu0 %vm3175_vm13, %v13751_v57  ;;  %v6141_v38 = vsel %vm3174_vm14, 1.0, %v13752_v56  ;;  %v6142_v31 = vsel %vm3175_vm13, 1.0, %v13752_v56  ;;  %13801 = vst [vmem:[#allocation57_spill] sm:$0xff] %v11492_v24 }
 0x960   : > { %v3283_v19 = vsub.f32 %v6141_v38, %v6141_v38  ;;  %6144 = vmatmul.mubr.msk.f32.vlgmr.msra.gmra.mrb[2].mxu0 %vm3174_vm14, %v13751_v57  ;;  %v3277_v61 = vsub.f32 %v6142_v31, %v6142_v31  ;;  %v8100_v38 = vpack.c.bf16 %v11172_v59, %v11167_v18  ;;  %v13753_v31 = vld [vmem:[#allocation48_spill] sm:$0xff] }
 0x961   : > { %8079 = vmatpush3.bf16.msra.mxu0 %v8078_v53  ;;  %v8096_v53 = vpack.c.bf16 %v11116_v12, %v11104_v20 }
 0x962   : > { %3654 = vmatprep.mubr.f32.mxu0 %v3277_v61  ;;  %8081 = vmatprep.subr.bf16.mxu0 %v8080_v2  ;;  %v3278_v63 = vand.u32 4294901760, %v3277_v61  ;;  %v3284_v23 = vand.u32 4294901760, %v3283_v19  ;;  %v8098_v2 = vpack.c.bf16 %v11135_v0, %v11129_v33 }
 0x964   : > { %v3279_v14 = vsub.f32 %v3277_v61, %v3278_v63  ;;  %v3285_v48 = vsub.f32 %v3283_v19, %v3284_v23  ;;  %v8102_v61 = vpack.c.bf16 %v13753_v31, %v11178_v46 }
 0x965   : > { %8083 = vmatpush3.bf16.msra.mxu0 %v8082_v55  ;;  %v13754_v55 = vld [vmem:[#allocation50_spill] sm:$0xff] }
 0x966   : > { %8085 = vmatprep.subr.bf16.mxu0 %v8084_v3  ;;  %v3280_v32 = vand.u32 4294901760, %v3279_v14  ;;  %v3286_v62 = vand.u32 4294901760, %v3285_v48  ;;  %v13755_v3 = vld [vmem:[#allocation54_spill] sm:$0xff]  ;;  %v13757_v48 = vld [vmem:[#allocation59_spill] sm:$0xff] }
 0x967   : > { %v13756_v14 = vld [vmem:[#allocation58_spill] sm:$0xff] }
 0x968   : > { %3281 = vmatprep.mubr.f32.mxu1 %v3280_v32  ;;  %v13759_v32 = vld [vmem:[#allocation63_spill] sm:$0xff] }
 0x969   : > { %8087 = vmatpush3.bf16.msra.mxu0 %v8086_v47  ;;  %3287 = vmatmul.mubr.f32.vlgmr.msra.gmra.mrb[16].mxu1 %v3286_v62  ;;  %v13758_v47 = vld [vmem:[#allocation62_spill] sm:$0xff]  ;;  %v13760_v62 = vld [vmem:[#allocation69_spill] sm:$0xff] }
 0x96a   : > { %8089 = vmatprep.subr.bf16.mxu0 %v8088_v52  ;;  %v13761_v52 = vld [vmem:[#allocation44_spill] sm:$0xff] }
 0x96d   : > { %8091 = vmatpush3.bf16.msra.mxu0 %v8090_v30  ;;  %v13765_v30 = vand.u32 4294901760, %v10904_v7 }
 0x96e   : > { %8093 = vmatprep.subr.bf16.mxu0 %v8092_v4  ;;  %v13766_v4 = vand.u32 4294901760, %v10909_v15  ;;  %v13771_v15 = vand.u32 4294901760, %v10966_v39  ;;  %v13778_v39 = vand.u32 4294901760, %v11035_v28  ;;  %v13785_v28 = vand.u32 4294901760, %v11129_v33 }
 0x96f   : > { %v13792_v33 = vand.u32 4294901760, %v11218_v44 }
 0x971   : > { %8095 = vmatpush3.bf16.msra.mxu0 %v8094_v50  ;;  %v8142_v50 = vpack.c.bf16 %v13766_v4, %v13765_v30 }
 0x972   : > { %8097 = vmatprep.subr.bf16.mxu0 %v8096_v53  ;;  %v13767_v53 = vand.u32 4294901760, %v10914_v43  ;;  %v13772_v43 = vand.u32 4294901760, %v10971_v8  ;;  %v13779_v8 = vand.u32 4294901760, %v11066_v22  ;;  %v13786_v22 = vand.u32 4294901760, %v11135_v0 }
 0x973   : > { %v13793_v0 = vand.u32 4294901760, %v11221_v58  ;;  %v11473_v58 = vld [vmem:[%s12674_s1 + $0x208] sm:$0xff] }
 0x974   : > { %13798 = vst [vmem:[#allocation30_spill] sm:$0xff] %v11473_v58 }
 0x975   : > { %8099 = vmatpush3.bf16.msra.mxu0 %v8098_v2  ;;  %v13768_v2 = vand.u32 4294901760, %v10919_v34  ;;  %v13773_v34 = vand.u32 4294901760, %v10976_v10  ;;  %v13780_v10 = vand.u32 4294901760, %v11071_v26  ;;  %v13787_v26 = vand.u32 4294901760, %v11167_v18 }
 0x976   : > { %8101 = vmatprep.subr.bf16.mxu0 %v8100_v38  ;;  %v13794_v18 = vand.u32 4294901760, %v11224_v13 }
 0x977   : > { %v8144_v38 = vpack.c.bf16 %v13768_v2, %v13767_v53  ;;  %v8156_v4 = vpack.c.bf16 %v13780_v10, %v13779_v8  ;;  %v8162_v2 = vpack.c.bf16 %v13786_v22, %v13785_v28  ;;  %v11538_v8 = vld [vmem:[%s12674_s1 + $0x2a0] sm:$0xff]  ;;  %v11543_v10 = vld [vmem:[%s12674_s1 + $0x2a8] sm:$0xff] }
 0x978   : > { %13803 = vst [vmem:[#allocation64_spill] sm:$0xff] %v11538_v8  ;;  %13804 = vst [vmem:[#allocation66_spill] sm:$0xff] %v11543_v10 }
 0x979   : > { %8103 = vmatpush3.bf16.msra.mxu0 %v8102_v61  ;;  %v8148_v61 = vpack.c.bf16 %v13772_v43, %v13771_v15 }
 0x97a   : > { %8105 = vmatprep.subr.bf16.mxu0 %v8104_v42  ;;  %v13762_v42 = vld [vmem:[#allocation13_spill] sm:$0xff] }
 0x97d   : > { %8107 = vmatpush3.bf16.msra.mxu0 %v8106_v41  ;;  %v13763_v41 = vand.u32 4294901760, %v10894_v21  ;;  %v13769_v21 = vand.u32 4294901760, %v10924_v27  ;;  %v13776_v27 = vand.u32 4294901760, %v11007_v60  ;;  %v13783_v60 = vand.u32 4294901760, %v11104_v20 }
 0x97e   : > { %8109 = vmatprep.subr.bf16.mxu0 %v13754_v55  ;;  %v13790_v20 = vand.u32 4294901760, %v13753_v31 }
 0x980   : > { %3657 = vmatmul.mubr.f32.vlgmr.msra.gmra.mrb[4].mxu0 %v3283_v19  ;;  %v13764_v19 = vand.u32 4294901760, %v10899_v51  ;;  %v13770_v51 = vand.u32 4294901760, %v10929_v49  ;;  %v13777_v49 = vand.u32 4294901760, %v11020_v6  ;;  %v13784_v6 = vand.u32 4294901760, %v11116_v12 }
 0x981   : > { %8111 = vmatpush3.bf16.msra.mxu0 %v13755_v3  ;;  %3761 = vmatprep.mubr.f32.mxu0 %v3278_v63  ;;  %v13791_v12 = vand.u32 4294901760, %v11215_v37 }
 0x982   : > { %8113 = vmatprep.subr.bf16.mxu0 %v13756_v14  ;;  %v8140_v63 = vpack.c.bf16 %v13764_v19, %v13763_v41  ;;  %v8146_v7 = vpack.c.bf16 %v13770_v51, %v13769_v21  ;;  %v13775_v19 = vand.u32 4294901760, %v11002_v54  ;;  %v8154_v30 = vpack.c.bf16 %v13778_v39, %v13777_v49 }
 0x983   : > { %v13782_v54 = vand.u32 4294901760, %v11083_v36  ;;  %v8160_v53 = vpack.c.bf16 %v13784_v6, %v13783_v60  ;;  %v13789_v36 = vand.u32 4294901760, %v11178_v46  ;;  %v8168_v51 = vpack.c.bf16 %v13792_v33, %v13791_v12  ;;  %v11464_v46 = vld [vmem:[%s12674_s1 + $0x200] sm:$0xff]  ;;  %v11580_v12 = vld [vmem:[%s12674_s1 + $0x2b0] sm:$0xff]  ;;  %v11585_v33 = vld [vmem:[%s12674_s1 + $0x2b8] sm:$0xff] }
 0x984   : > { %13797 = vst [vmem:[#allocation27_spill] sm:$0xff] %v11464_v46  ;;  %v4089_v13 = vsel %vm278_vm0, %v11464_v46, 0  ;;  %13807 = vst [vmem:[#allocation5_spill] sm:$0xff] %v11580_v12 }
 0x985   : > { %8115 = vmatpush3.bf16.msra.mxu0 %v13757_v48  ;;  %v8166_v21 = vpack.c.bf16 %v13790_v20, %v13789_v36  ;;  %13808 = vst [vmem:[#allocation49_spill] sm:$0xff] %v11585_v33 }
 0x986   : > { %8117 = vmatprep.subr.bf16.mxu0 %v13758_v47 }
 0x989   : > { %8119 = vmatpush3.bf16.msra.mxu0 %v13759_v32 }
 0x98a   : > { %8121 = vmatprep.subr.bf16.mxu0 %v13760_v62 }
 0x98d   : > { %8123 = vmatpush3.bf16.msra.mxu0 %v13761_v52 }
 0x98e   : > { %8125 = vmatprep.subr.bf16.mxu0 %v13762_v42 }
 0x991   : > { %8127 = vmatpush3.bf16.msra.mxu0 %v11246_v9 }
 0x992   : > { %8129 = vmatprep.subr.bf16.mxu0 %v11253_v25 }
 0x995   : > { %8131 = vmatpush3.bf16.msra.mxu0 %v11259_v29 }
 0x996   : > { %8133 = vmatprep.subr.bf16.mxu0 %v11269_v35 }
 0x999   : > { %8135 = vmatpush3.bf16.msra.mxu0 %v11275_v16 }
 0x99a   : > { %8137 = vmatprep.subr.bf16.mxu0 %v11279_v17 }
 0x99d   : > { %8139 = vmatpush3.bf16.msra.mxu0 %v11281_v11 }
 0x99e   : > { %8141 = vmatprep.subr.bf16.mxu0 %v8140_v63  ;;  %v8152_v63 = vpack.c.bf16 %v13776_v27, %v13775_v19 }
 0x9a0   : > { %3765 = vmatmul.mubr.f32.vlgmr.msra.gmra.mrb[6].mxu0 %v3284_v23  ;;  %v13774_v23 = vand.u32 4294901760, %v10981_v40  ;;  %v13781_v40 = vand.u32 4294901760, %v11078_v5  ;;  %v13788_v5 = vand.u32 4294901760, %v11172_v59  ;;  %v11459_v59 = vld [vmem:[%s12674_s1 + $0x288] sm:$0xff] }
 0x9a1   : > { %8143 = vmatpush3.bf16.msra.mxu0 %v8142_v50  ;;  %6145 = vmatprep.mubr.msk.f32.mxu0 %vm3175_vm13, %v13751_v57  ;;  %13796 = vst [vmem:[#allocation22_spill] sm:$0xff] %v11459_v59  ;;  %v4140_v44 = vsel %vm278_vm0, %v11459_v59, 0 }
 0x9a2   : > { %8145 = vmatprep.subr.bf16.mxu0 %v8144_v38  ;;  %v8150_v41 = vpack.c.bf16 %v13774_v23, %v13773_v34  ;;  %v8158_v50 = vpack.c.bf16 %v13782_v54, %v13781_v40  ;;  %v8164_v38 = vpack.c.bf16 %v13788_v5, %v13787_v26  ;;  %v4152_v40 = vsel %vm278_vm0, %v11543_v10, 0  ;;  %v11552_v54 = vld [vmem:[%s12674_s1 + $0x220] sm:$0xff]  ;;  %v11759_v10 = vld [vmem:[%s12674_s1 + $0x278] sm:$0xff] }
 0x9a3   : > { %13805 = vst [vmem:[#allocation67_spill] sm:$0xff] %v11552_v54  ;;  %v4248_v6 = vand.u32 4294901760, %v4152_v40  ;;  %13830 = vst [vmem:[#allocation32_spill] sm:$0xff] %v11759_v10 }
 0x9a5   : > { %8147 = vmatpush3.bf16.msra.mxu0 %v8146_v7  ;;  %v8170_v7 = vpack.c.bf16 %v13794_v18, %v13793_v0  ;;  %v11570_v36 = vsub.f32 %v4152_v40, %v4248_v6  ;;  %v4155_v0 = vsel %vm278_vm0, %v11580_v12, 0  ;;  %v4158_v18 = vsel %vm278_vm0, %v11585_v33, 0 }
 0x9a6   : > { %8149 = vmatprep.subr.bf16.mxu0 %v8148_v61 }
 0x9a9   : > { %8151 = vmatpush3.bf16.msra.mxu0 %v8150_v41 }
 0x9aa   : > { %8153 = vmatprep.subr.bf16.mxu0 %v8152_v63 }
 0x9ad   : > { %8155 = vmatpush3.bf16.msra.mxu0 %v8154_v30 }
 0x9ae   : > { %8157 = vmatprep.subr.bf16.mxu0 %v8156_v4  ;;  %v4149_v4 = vsel %vm278_vm0, %v11538_v8, 0 }
 0x9af   : > { %v4245_v60 = vand.u32 4294901760, %v4149_v4 }
 0x9b1   : > { %8159 = vmatpush3.bf16.msra.mxu0 %v8158_v50  ;;  %v11557_v50 = vld [vmem:[%s12674_s1 + $0x228] sm:$0xff]  ;;  %v11563_v26 = vpack.c.bf16 %v4248_v6, %v4245_v60 }
 0x9b2   : > { %8161 = vmatprep.subr.bf16.mxu0 %v8160_v53  ;;  %13806 = vst [vmem:[#allocation68_spill] sm:$0xff] %v11557_v50  ;;  %v4101_v53 = vsel %vm278_vm0, %v11552_v54, 0  ;;  %v4104_v28 = vsel %vm278_vm0, %v11557_v50, 0 }
 0x9b3   : > { %v4197_v22 = vand.u32 4294901760, %v4101_v53 }
 0x9b5   : > { %8163 = vmatpush3.bf16.msra.mxu0 %v8162_v2  ;;  %v4200_v2 = vand.u32 4294901760, %v4104_v28  ;;  %v11573_v20 = vsub.f32 %v4101_v53, %v4197_v22 }
 0x9b6   : > { %8165 = vmatprep.subr.bf16.mxu0 %v8164_v38  ;;  %v11568_v38 = vsub.f32 %v4149_v4, %v4245_v60 }
 0x9b7   : > { %v11565_v5 = vpack.c.bf16 %v4200_v2, %v4197_v22 }
 0x9b9   : > { %8167 = vmatpush3.bf16.msra.mxu0 %v8166_v21  ;;  %v11575_v21 = vsub.f32 %v4104_v28, %v4200_v2  ;;  %v11656_v2 = vld [vmem:[%s12674_s1 + $0x250] sm:$0xff] }
 0x9ba   : > { %8169 = vmatprep.subr.bf16.mxu0 %v8168_v51  ;;  %v11590_v51 = vld [vmem:[%s12674_s1 + $0x230] sm:$0xff]  ;;  %13817 = vst [vmem:[#allocation10_spill] sm:$0xff] %v11656_v2 }
 0x9bb   : > { %13809 = vst [vmem:[#allocation61_spill] sm:$0xff] %v11590_v51 }
 0x9bd   : > { %8171 = vmatpush3.bf16.msra.mxu0 %v8170_v7  ;;  %v11599_v7 = vld [vmem:[%s12674_s1 + $0x238] sm:$0xff] }
 0x9be   : > { %8173 = vmatprep.subr.bf16.mxu0 %v13754_v55  ;;  %13810 = vst [vmem:[#allocation65_spill] sm:$0xff] %v11599_v7 }
 0x9c0   : > { %6146 = vmatmul.mubr.msk.f32.vlgmr.msra.gmra.mrb[8].mxu0 %vm3174_vm14, %v13751_v57 }
 0x9c1   : > { %8175 = vmatpush3.bf16.msra.mxu0 %v13755_v3  ;;  %6147 = vmatprep.mubr.msk.f32.mxu0 %vm3175_vm13, %v13751_v57 }
 0x9c2   : > { %8177 = vmatprep.subr.bf16.mxu0 %v13756_v14  ;;  %v11501_v14 = vld [vmem:[%s12674_s1 + $0x218] sm:$0xff] }
 0x9c3   : > { %13802 = vst [vmem:[#allocation60_spill] sm:$0xff] %v11501_v14  ;;  %v4098_v34 = vsel %vm278_vm0, %v11501_v14, 0 }
 0x9c4   : > { %v4194_v63 = vand.u32 4294901760, %v4098_v34 }
 0x9c5   : > { %8179 = vmatpush3.bf16.msra.mxu0 %v13757_v48  ;;  %v4095_v48 = vsel %vm278_vm0, %v11492_v24, 0 }
 0x9c6   : > { %8181 = vmatprep.subr.bf16.mxu0 %v13758_v47  ;;  %v4191_v23 = vand.u32 4294901760, %v4095_v48  ;;  %v11530_v39 = vsub.f32 %v4098_v34, %v4194_v63  ;;  %v11634_v34 = vld [vmem:[%s12674_s1 + $0x2d0] sm:$0xff] }
 0x9c7   : > { %13815 = vst [vmem:[#allocation8_spill] sm:$0xff] %v11634_v34 }
 0x9c8   : > { %v11527_v49 = vsub.f32 %v4095_v48, %v4191_v23  ;;  %v11532_v30 = vpack.c.bf16 %v4194_v63, %v4191_v23  ;;  %v11639_v23 = vld [vmem:[%s12674_s1 + $0x2d8] sm:$0xff] }
 0x9c9   : > { %8183 = vmatpush3.bf16.msra.mxu0 %v13759_v32  ;;  %13816 = vst [vmem:[#allocation9_spill] sm:$0xff] %v11639_v23 }
 0x9ca   : > { %8185 = vmatprep.subr.bf16.mxu0 %v13760_v62 }
 0x9cd   : > { %8187 = vmatpush3.bf16.msra.mxu0 %v13761_v52 }
 0x9ce   : > { %8189 = vmatprep.subr.bf16.mxu0 %v13762_v42 }
 0x9d1   : > { %8191 = vmatpush3.bf16.msra.mxu0 %v11246_v9  ;;  %v11454_v9 = vld [vmem:[%s12674_s1 + $0x280] sm:$0xff] }
 0x9d2   : > { %8193 = vmatprep.subr.bf16.mxu0 %v11253_v25  ;;  %13795 = vst [vmem:[#allocation14_spill] sm:$0xff] %v11454_v9  ;;  %v4137_v37 = vsel %vm278_vm0, %v11454_v9, 0  ;;  %v11480_v25 = vld [vmem:[%s12674_s1 + $0x290] sm:$0xff] }
 0x9d3   : > { %13799 = vst [vmem:[#allocation43_spill] sm:$0xff] %v11480_v25  ;;  %v4143_v55 = vsel %vm278_vm0, %v11480_v25, 0 }
 0x9d4   : > { %v4239_v43 = vand.u32 4294901760, %v4143_v55 }
 0x9d5   : > { %8195 = vmatpush3.bf16.msra.mxu0 %v11259_v29  ;;  %v11485_v29 = vld [vmem:[%s12674_s1 + $0x298] sm:$0xff] }
 0x9d6   : > { %8197 = vmatprep.subr.bf16.mxu0 %v11269_v35  ;;  %13800 = vst [vmem:[#allocation51_spill] sm:$0xff] %v11485_v29  ;;  %v4233_v35 = vand.u32 4294901760, %v4137_v37  ;;  %v4146_v3 = vsel %vm278_vm0, %v11485_v29, 0  ;;  %v11523_v19 = vsub.f32 %v4143_v55, %v4239_v43  ;;  %v11623_v55 = vld [vmem:[%s12674_s1 + $0x248] sm:$0xff] }
 0x9d7   : > { %v4242_v61 = vand.u32 4294901760, %v4146_v3  ;;  %13814 = vst [vmem:[#allocation7_spill] sm:$0xff] %v11623_v55 }
 0x9d8   : > { %v11507_v32 = vsub.f32 %v4137_v37, %v4233_v35  ;;  %v4107_v37 = vsel %vm278_vm0, %v11590_v51, 0 }
 0x9d9   : > { %8199 = vmatpush3.bf16.msra.mxu0 %v11275_v16  ;;  %v4236_v16 = vand.u32 4294901760, %v4140_v44  ;;  %v11521_v41 = vpack.c.bf16 %v4242_v61, %v4239_v43  ;;  %v11525_v27 = vsub.f32 %v4146_v3, %v4242_v61 }
 0x9da   : > { %8201 = vmatprep.subr.bf16.mxu0 %v11279_v17  ;;  %v4092_v17 = vsel %vm278_vm0, %v11473_v58, 0 }
 0x9db   : > { %v4188_v31 = vand.u32 4294901760, %v4092_v17  ;;  %v11505_v47 = vpack.c.bf16 %v4236_v16, %v4233_v35  ;;  %v11509_v62 = vsub.f32 %v4140_v44, %v4236_v16  ;;  %v11606_v44 = vld [vmem:[%s12674_s1 + $0x2c0] sm:$0xff]  ;;  %v4251_v35 = vand.u32 4294901760, %v4155_v0 }
 0x9dc   : > { %13811 = vst [vmem:[#allocation41_spill] sm:$0xff] %v11606_v44  ;;  %v4254_v16 = vand.u32 4294901760, %v4158_v18  ;;  %v4161_v48 = vsel %vm278_vm0, %v11606_v44, 0 }
 0x9dd   : > { %8203 = vmatpush3.bf16.msra.mxu0 %v11281_v11  ;;  %v4185_v11 = vand.u32 4294901760, %v4089_v13  ;;  %v11515_v15 = vsub.f32 %v4092_v17, %v4188_v31  ;;  %v4110_v17 = vsel %vm278_vm0, %v11599_v7, 0  ;;  %v11643_v4 = vsub.f32 %v4155_v0, %v4251_v35 }
 0x9de   : > { %8205 = vmatprep.subr.bf16.mxu0 %v11505_v47  ;;  %v4206_v3 = vand.u32 4294901760, %v4110_v17  ;;  %v11641_v63 = vpack.c.bf16 %v4254_v16, %v4251_v35  ;;  %v11645_v40 = vsub.f32 %v4158_v18, %v4254_v16  ;;  %v4257_v28 = vand.u32 4294901760, %v4161_v48  ;;  %v11668_v16 = vld [vmem:[%s12674_s1 + $0x258] sm:$0xff] }
 0x9df   : > { %v11511_v52 = vsub.f32 %v4089_v13, %v4185_v11  ;;  %v11513_v42 = vpack.c.bf16 %v4188_v31, %v4185_v11  ;;  %v11611_v13 = vld [vmem:[%s12674_s1 + $0x2c8] sm:$0xff]  ;;  %v4203_v11 = vand.u32 4294901760, %v4107_v37  ;;  %v11618_v31 = vld [vmem:[%s12674_s1 + $0x240] sm:$0xff]  ;;  %v4116_v0 = vsel %vm278_vm0, %v11623_v55, 0  ;;  %13818 = vst [vmem:[#allocation11_spill] sm:$0xff] %v11668_v16 }
 0x9e0   : > { %6148 = vmatmul.mubr.msk.f32.vlgmr.msra.gmra.mrb[10].mxu0 %vm3174_vm14, %v13751_v57  ;;  %13812 = vst [vmem:[#allocation45_spill] sm:$0xff] %v11611_v13  ;;  %13813 = vst [vmem:[#allocation6_spill] sm:$0xff] %v11618_v31  ;;  %v4164_v43 = vsel %vm278_vm0, %v11611_v13, 0  ;;  %v4113_v61 = vsel %vm278_vm0, %v11618_v31, 0  ;;  %v11651_v53 = vsub.f32 %v4110_v17, %v4206_v3  ;;  %v4170_v35 = vsel %vm278_vm0, %v11639_v23, 0 }
 0x9e1   : > { %v11647_v60 = vsub.f32 %v4107_v37, %v4203_v11  ;;  %v11649_v6 = vpack.c.bf16 %v4206_v3, %v4203_v11  ;;  %v4260_v22 = vand.u32 4294901760, %v4164_v43  ;;  %v4209_v18 = vand.u32 4294901760, %v4113_v61 }
 0x9e2   : > { %v4167_v37 = vsel %vm278_vm0, %v11634_v34, 0  ;;  %v11672_v11 = vsub.f32 %v4161_v48, %v4257_v28  ;;  %v4212_v57 = vand.u32 4294901760, %v4116_v0  ;;  %v4266_v55 = vand.u32 4294901760, %v4170_v35 }
 0x9e3   : > { %v11670_v17 = vpack.c.bf16 %v4260_v22, %v4257_v28  ;;  %v11674_v3 = vsub.f32 %v4164_v43, %v4260_v22  ;;  %v11677_v56 = vsub.f32 %v4113_v61, %v4209_v18  ;;  %v4263_v34 = vand.u32 4294901760, %v4167_v37 }
 0x9e4   : > { %v4119_v23 = vsel %vm278_vm0, %v11656_v2, 0  ;;  %v11682_v31 = vsub.f32 %v4116_v0, %v4212_v57  ;;  %v4122_v48 = vsel %vm278_vm0, %v11668_v16, 0  ;;  %v11688_v22 = vsub.f32 %v4170_v35, %v4266_v55 }
 0x9e5   : > { %v4215_v28 = vand.u32 4294901760, %v4119_v23  ;;  %v11686_v43 = vsub.f32 %v4167_v37, %v4263_v34  ;;  %v4218_v13 = vand.u32 4294901760, %v4122_v48  ;;  %v11692_v44 = vpack.c.bf16 %v4212_v57, %v4209_v18  ;;  %v11706_v37 = vld [vmem:[%s12674_s1 + $0x2e0] sm:$0xff]  ;;  %v11711_v57 = vld [vmem:[%s12674_s1 + $0x2e8] sm:$0xff] }
 0x9e6   : > { %8207 = vmatpush3.bf16.xpose.msra.mxu0 %v11513_v42  ;;  %v11696_v2 = vpack.c.bf16 %v4266_v55, %v4263_v34  ;;  %13821 = vst [vmem:[#allocation16_spill] sm:$0xff] %v11706_v37  ;;  %13822 = vst [vmem:[#allocation17_spill] sm:$0xff] %v11711_v57  ;;  %v4173_v55 = vsel %vm278_vm0, %v11706_v37, 0  ;;  %v4176_v34 = vsel %vm278_vm0, %v11711_v57, 0 }
 0x9e7   : > { %8209 = vmatprep.subr.bf16.mxu0 %v11521_v41  ;;  %v11690_v61 = vsub.f32 %v4119_v23, %v4215_v28  ;;  %v11694_v7 = vsub.f32 %v4122_v48, %v4218_v13  ;;  %v11700_v0 = vpack.c.bf16 %v4218_v13, %v4215_v28  ;;  %v11720_v13 = vld [vmem:[%s12674_s1 + $0x260] sm:$0xff]  ;;  %v11725_v23 = vld [vmem:[%s12674_s1 + $0x268] sm:$0xff]  ;;  %v4269_v18 = vand.u32 4294901760, %v4173_v55 }
 0x9e8   : > { %13819 = vst [vmem:[#allocation12_spill] sm:$0xff] %v11696_v2  ;;  %13823 = vst [vmem:[#allocation18_spill] sm:$0xff] %v11720_v13  ;;  %v4272_v35 = vand.u32 4294901760, %v4176_v34  ;;  %v4125_v48 = vsel %vm278_vm0, %v11720_v13, 0  ;;  %v4128_v28 = vsel %vm278_vm0, %v11725_v23, 0  ;;  %v11740_v13 = vld [vmem:[%s12674_s1 + $0x2f0] sm:$0xff] }
 0x9e9   : > { %13820 = vst [vmem:[#allocation15_spill] sm:$0xff] %v11700_v0  ;;  %13824 = vst [vmem:[#allocation19_spill] sm:$0xff] %v11725_v23  ;;  %v4221_v57 = vand.u32 4294901760, %v4125_v48  ;;  %v4224_v16 = vand.u32 4294901760, %v4128_v28  ;;  %v11745_v23 = vld [vmem:[%s12674_s1 + $0x2f8] sm:$0xff]  ;;  %v4179_v54 = vsel %vm278_vm0, %v11740_v13, 0  ;;  %v11769_v45 = vsub.f32 %v4173_v55, %v4269_v18 }
 0x9ea   : > { %v11731_v33 = vpack.c.bf16 %v4272_v35, %v4269_v18  ;;  %13827 = vst [vmem:[#allocation24_spill] sm:$0xff] %v11740_v13  ;;  %13828 = vst [vmem:[#allocation28_spill] sm:$0xff] %v11745_v23  ;;  %v4275_v8 = vand.u32 4294901760, %v4179_v54  ;;  %v4134_v13 = vsel %vm278_vm0, %v11759_v10, 0  ;;  %v11771_v1 = vsub.f32 %v4176_v34, %v4272_v35 }
 0x9eb   : > { %v11733_v50 = vpack.c.bf16 %v4224_v16, %v4221_v57 }
 0x9ec   : > { %13825 = vst [vmem:[#allocation20_spill] sm:$0xff] %v11731_v33  ;;  %v11778_v10 = vsub.f32 %v4179_v54, %v4275_v8 }
 0x9ed   : > { %13826 = vst [vmem:[#allocation21_spill] sm:$0xff] %v11733_v50 }
 0x9ee   : > { %8211 = vmatpush3.bf16.xpose.msra.mxu0 %v11532_v30 }
 0x9ef   : > { %8213 = vmatprep.subr.bf16.mxu0 %v11563_v26 }
 0x9f6   : > { %8215 = vmatpush3.bf16.xpose.msra.mxu0 %v11565_v5 }
 0x9f7   : > { %8217 = vmatprep.subr.bf16.mxu0 %v11641_v63 }
 0x9fe   : > { %8219 = vmatpush3.bf16.xpose.msra.mxu0 %v11649_v6 }
 0x9ff   : > { %8221 = vmatprep.subr.bf16.mxu0 %v11670_v17 }
 0xa06   : > { %8223 = vmatpush3.bf16.xpose.msra.mxu0 %v11692_v44 }
 0xa07   : > { %8225 = vmatprep.subr.bf16.mxu0 %v11696_v2 }
 0xa0e   : > { %8227 = vmatpush3.bf16.xpose.msra.mxu0 %v11700_v0 }
 0xa0f   : > { %8229 = vmatprep.subr.bf16.mxu0 %v11731_v33 }
 0xa16   : > { %8231 = vmatpush3.bf16.xpose.msra.mxu0 %v11733_v50  ;;  %v11773_v50 = vsub.f32 %v4125_v48, %v4221_v57  ;;  %v13155_v57 = vand.u32 4294901760, %v11509_v62 }
 0xa33   : > { %v6879_v37 = vpop.f32.mrb[2].mxu0 }
 0xa34   : > { %v6880_v51 = vpop.f32.mrb[3].mxu0 }
 0xa35   : > { %v6881_v12 = vadd.f32 %v6880_v51, %v6879_v37  ;;  %v4182_v51 = vsel %vm278_vm0, %v11745_v23, 0  ;;  %v11754_v37 = vld [vmem:[%s12674_s1 + $0x270] sm:$0xff]  ;;  %v4230_v23 = vand.u32 4294901760, %v4134_v13 }
 0xa36   : > { %13829 = vst [vmem:[#allocation29_spill] sm:$0xff] %v11754_v37  ;;  %v4278_v14 = vand.u32 4294901760, %v4182_v51  ;;  %v4131_v24 = vsel %vm278_vm0, %v11754_v37, 0  ;;  %v11776_v37 = vsub.f32 %v4128_v28, %v4224_v16 }
 0xa37   : > { %v4227_v29 = vand.u32 4294901760, %v4131_v24 }
 0xa38   : > { %v11765_v58 = vpack.c.bf16 %v4278_v14, %v4275_v8  ;;  %v11780_v33 = vsub.f32 %v4182_v51, %v4278_v14  ;;  %v4415_v14 = vsub.f32 %v11509_v62, %v13155_v57 }
 0xa39   : > { %v11767_v59 = vpack.c.bf16 %v4230_v23, %v4227_v29  ;;  %v11783_v0 = vsub.f32 %v4131_v24, %v4227_v29 }
 0xa3a   : > { %13831 = vst [vmem:[#allocation33_spill] sm:$0xff] %v11765_v58  ;;  %8233 = vmatprep.subr.bf16.mxu0 %v11765_v58  ;;  %v4416_v54 = vand.u32 4294901760, %v4415_v14  ;;  %v13158_v14 = vand.u32 4294901760, %v11515_v15 }
 0xa3b   : > { %13832 = vst [vmem:[#allocation34_spill] sm:$0xff] %v11767_v59  ;;  %8235 = vmatpush3.bf16.xpose.msra.mxu0 %v11767_v59 }
 0xa3c   : > { %v6844_v25 = vpop.f32.mrb[16].mxu1 }
 0xa3d   : > { %v6845_v46 = vpop.f32.mrb[17].mxu1 }
 0xa3e   : > { %v6846_v9 = vadd.f32 %v6845_v46, %v6844_v25  ;;  %v11785_v46 = vsub.f32 %v4134_v13, %v4230_v23  ;;  %v13150_v25 = vand.u32 4294901760, %v11507_v32 }
 0xa40   : > { %v3521_v2 = vadd.f32 %v6881_v12, %v6846_v9  ;;  %v4408_v16 = vsub.f32 %v11507_v32, %v13150_v25 }
 0xa42   : > { %v4409_v8 = vand.u32 4294901760, %v4408_v16  ;;  %v13162_v16 = vand.u32 4294901760, %v11511_v52 }
 0xa44   : > { %v8236_v55 = vpack.c.bf16 %v4416_v54, %v4409_v8  ;;  %v13833_v8 = vld [vmem:[#allocation46_spill] sm:$0xff] }
 0xa46   : > { %8237 = vmatprep.subr.bf16.mxu0 %v8236_v55  ;;  %v13156_v55 = vand.u32 4294901760, %v11525_v27 }
 0xa53   : > { %v6914_v29 = vpop.f32.mrb[4].mxu0 }
 0xa54   : > { %v6915_v9 = vpop.f32.mrb[5].mxu0 }
 0xa55   : > { %v6916_v24 = vadd.f32 %v6915_v9, %v6914_v29  ;;  %v4296_v9 = vsub.f32 %v11511_v52, %v13162_v16 }
 0xa57   : > { %v3659_v12 = vadd.f32 %v6916_v24, %v3521_v2  ;;  %v13157_v2 = vand.u32 4294901760, %v11523_v19 }
 0xa73   : > { %v6949_v34 = vpop.f32.mrb[6].mxu0 }
 0xa74   : > { %v6950_v13 = vpop.f32.mrb[7].mxu0 }
 0xa75   : > { %v6951_v23 = vadd.f32 %v6950_v13, %v6949_v34 }
 0xa77   : > { %v3767_v18 = vadd.f32 %v6951_v23, %v3659_v12  ;;  %v4297_v12 = vand.u32 4294901760, %v4296_v9  ;;  %v13161_v23 = vand.u32 4294901760, %v11527_v49 }
 0xa79   : > { %v4310_v9 = vsub.f32 %v11527_v49, %v13161_v23  ;;  %v13168_v23 = vand.u32 4294901760, %v11645_v40 }
 0xa93   : > { %v6984_v35 = vpop.f32.mrb[8].mxu0 }
 0xa94   : > { %v6985_v48 = vpop.f32.mrb[9].mxu0 }
 0xa95   : > { %v6986_v28 = vadd.f32 %v6985_v48, %v6984_v35 }
 0xa97   : > { %v3935_v51 = vadd.f32 %v6986_v28, %v3767_v18  ;;  %v13159_v18 = vand.u32 4294901760, %v11530_v39  ;;  %v13160_v28 = vand.u32 4294901760, %v11568_v38 }
 0xab3   : > { %v7019_v25 = vpop.f32.mrb[10].mxu0 }
 0xab4   : > { %v7020_v59 = vpop.f32.mrb[11].mxu0 }
 0xab5   : > { %v7021_v58 = vadd.f32 %v7020_v59, %v7019_v25  ;;  %v4422_v25 = vsub.f32 %v11523_v19, %v13157_v2 }
 0xab7   : > { %v4039_v57 = vadd.f32 %v7021_v58, %v3935_v51  ;;  %v4303_v58 = vsub.f32 %v11515_v15, %v13158_v14  ;;  %v4423_v35 = vand.u32 4294901760, %v4422_v25  ;;  %v13164_v51 = vand.u32 4294901760, %v11570_v36 }
 0xab8   : > { %v4436_v25 = vsub.f32 %v11568_v38, %v13160_v28  ;;  %v13166_v28 = vand.u32 4294901760, %v11643_v4 }
 0xab9   : > { %v11798_v54 = vsub.f32 %v13833_v8, %v4039_v57  ;;  %v4429_v57 = vsub.f32 %v11525_v27, %v13156_v55  ;;  %v4304_v13 = vand.u32 4294901760, %v4303_v58  ;;  %v4317_v58 = vsub.f32 %v11530_v39, %v13159_v18 }
 0xaba   : > { %v13165_v18 = vand.u32 4294901760, %v11575_v21 }
 0xabb   : > { %13834 = vst [vmem:[#allocation36_spill] sm:$0xff] %v11798_v54  ;;  %v4086_v29 = vsel %vm278_vm0, %v11798_v54, 0  ;;  %v4430_v48 = vand.u32 4294901760, %v4429_v57  ;;  %v8238_v2 = vpack.c.bf16 %v4304_v13, %v4297_v12  ;;  %v4443_v57 = vsub.f32 %v11570_v36, %v13164_v51 }
 0xabc   : > { %v11807_v59 = vand.u32 4294901760, %v4086_v29  ;;  %v4318_v12 = vand.u32 4294901760, %v4317_v58  ;;  %v13163_v13 = vand.u32 4294901760, %v11573_v20  ;;  %v4457_v58 = vsub.f32 %v11645_v40, %v13168_v23 }
 0xabd   : > { %v8240_v14 = vpack.c.bf16 %v4430_v48, %v4423_v35  ;;  %v4437_v35 = vand.u32 4294901760, %v4436_v25  ;;  %v4444_v48 = vand.u32 4294901760, %v4443_v57 }
 0xabe   : > { %v11819_v24 = vsub.f32 %v4086_v29, %v11807_v59  ;;  %v4458_v51 = vand.u32 4294901760, %v4457_v58 }
 0xac0   : > { %v11822_v34 = vand.u32 4294901760, %v11819_v24 }
 0xac2   : > { %v4284_v55 = vsub.f32 %v11819_v24, %v11822_v34 }
 0xac4   : > { %v4285_v29 = vand.u32 4294901760, %v4284_v55  ;;  %v4311_v55 = vand.u32 4294901760, %v4310_v9  ;;  %v8244_v9 = vpack.c.bf16 %v4444_v48, %v4437_v35  ;;  %v13170_v35 = vand.u32 4294901760, %v11672_v11 }
 0xac5   : > { %v13172_v48 = vand.u32 4294901760, %v11674_v3 }
 0xac6   : > { %7054 = vmatprep.mubr.f32.mxu0 %v4285_v29  ;;  %v8242_v16 = vpack.c.bf16 %v4318_v12, %v4311_v55  ;;  %v13167_v55 = vand.u32 4294901760, %v11647_v60  ;;  %v13169_v12 = vand.u32 4294901760, %v11651_v53 }
 0xac7   : > { %7055 = vmatmul.mubr.f32.vlgmr.msra.gmra.mrb[12].mxu0 %v4285_v29  ;;  %v4331_v29 = vsub.f32 %v11575_v21, %v13165_v18 }
 0xac8   : > { %8239 = vmatpush3.bf16.xpose.msra.mxu0 %v8238_v2  ;;  %7088 = vmatprep.mubr.f32.mxu0 %v11807_v59  ;;  %v4324_v2 = vsub.f32 %v11573_v20, %v13163_v13 }
 0xac9   : > { %8241 = vmatprep.subr.bf16.mxu0 %v8240_v14  ;;  %v4450_v14 = vsub.f32 %v11643_v4, %v13166_v28  ;;  %v4332_v57 = vand.u32 4294901760, %v4331_v29  ;;  %v4338_v28 = vsub.f32 %v11647_v60, %v13167_v55  ;;  %v4464_v29 = vsub.f32 %v11672_v11, %v13170_v35 }
 0xaca   : > { %v4325_v25 = vand.u32 4294901760, %v4324_v2 }
 0xacb   : > { %v4451_v13 = vand.u32 4294901760, %v4450_v14  ;;  %v4339_v14 = vand.u32 4294901760, %v4338_v28  ;;  %v4465_v55 = vand.u32 4294901760, %v4464_v29 }
 0xacc   : > { %v8246_v18 = vpack.c.bf16 %v4332_v57, %v4325_v25  ;;  %v13171_v25 = vand.u32 4294901760, %v11677_v56  ;;  %v13173_v57 = vand.u32 4294901760, %v11682_v31 }
 0xacd   : > { %v8248_v2 = vpack.c.bf16 %v4458_v51, %v4451_v13  ;;  %v13174_v51 = vand.u32 4294901760, %v11686_v43  ;;  %v13176_v13 = vand.u32 4294901760, %v11688_v22 }
 0xace   : > { %v4352_v35 = vsub.f32 %v11677_v56, %v13171_v25 }
 0xad0   : > { %8243 = vmatpush3.bf16.xpose.msra.mxu0 %v8242_v16  ;;  %v4345_v16 = vsub.f32 %v11651_v53, %v13169_v12  ;;  %v4353_v29 = vand.u32 4294901760, %v4352_v35 }
 0xad1   : > { %8245 = vmatprep.subr.bf16.mxu0 %v8244_v9  ;;  %v4471_v9 = vsub.f32 %v11674_v3, %v13172_v48 }
 0xad2   : > { %v4346_v58 = vand.u32 4294901760, %v4345_v16  ;;  %v4478_v16 = vsub.f32 %v11686_v43, %v13174_v51 }
 0xad3   : > { %v4472_v23 = vand.u32 4294901760, %v4471_v9 }
 0xad4   : > { %v8250_v12 = vpack.c.bf16 %v4346_v58, %v4339_v14  ;;  %v13175_v14 = vand.u32 4294901760, %v11690_v61  ;;  %v13177_v58 = vand.u32 4294901760, %v11694_v7  ;;  %v4479_v25 = vand.u32 4294901760, %v4478_v16 }
 0xad5   : > { %v8252_v28 = vpack.c.bf16 %v4472_v23, %v4465_v55  ;;  %v13178_v23 = vand.u32 4294901760, %v11769_v45  ;;  %v13180_v55 = vand.u32 4294901760, %v11771_v1 }
 0xad6   : > { %v4366_v51 = vsub.f32 %v11690_v61, %v13175_v14 }
 0xad8   : > { %8247 = vmatpush3.bf16.xpose.msra.mxu0 %v8246_v18  ;;  %v4359_v18 = vsub.f32 %v11682_v31, %v13173_v57  ;;  %v4367_v16 = vand.u32 4294901760, %v4366_v51 }
 0xad9   : > { %8249 = vmatprep.subr.bf16.mxu0 %v8248_v2  ;;  %v4485_v2 = vsub.f32 %v11688_v22, %v13176_v13 }
 0xada   : > { %v4360_v9 = vand.u32 4294901760, %v4359_v18  ;;  %v4492_v18 = vsub.f32 %v11769_v45, %v13178_v23 }
 0xadb   : > { %v4486_v48 = vand.u32 4294901760, %v4485_v2 }
 0xadc   : > { %v8254_v57 = vpack.c.bf16 %v4360_v9, %v4353_v29  ;;  %v13179_v29 = vand.u32 4294901760, %v11773_v50  ;;  %v13181_v9 = vand.u32 4294901760, %v11776_v37  ;;  %v4493_v14 = vand.u32 4294901760, %v4492_v18 }
 0xadd   : > { %v8256_v35 = vpack.c.bf16 %v4486_v48, %v4479_v25  ;;  %v4505_v48 = vand.u32 4294901760, %v11778_v10  ;;  %v13182_v25 = vand.u32 4294901760, %v11780_v33 }
 0xade   : > { %v4380_v23 = vsub.f32 %v11773_v50, %v13179_v29 }
 0xae0   : > { %8251 = vmatpush3.bf16.xpose.msra.mxu0 %v8250_v12  ;;  %v4373_v12 = vsub.f32 %v11694_v7, %v13177_v58  ;;  %v4381_v18 = vand.u32 4294901760, %v4380_v23 }
 0xae1   : > { %8253 = vmatprep.subr.bf16.mxu0 %v8252_v28  ;;  %v4499_v28 = vsub.f32 %v11771_v1, %v13180_v55 }
 0xae2   : > { %v4374_v2 = vand.u32 4294901760, %v4373_v12  ;;  %v4506_v12 = vsub.f32 %v11778_v10, %v4505_v48 }
 0xae3   : > { %v4500_v13 = vand.u32 4294901760, %v4499_v28 }
 0xae4   : > { %v8258_v58 = vpack.c.bf16 %v4374_v2, %v4367_v16  ;;  %v4393_v16 = vand.u32 4294901760, %v11783_v0  ;;  %v4400_v2 = vand.u32 4294901760, %v11785_v46  ;;  %v4507_v29 = vand.u32 4294901760, %v4506_v12 }
 0xae5   : > { %v8260_v51 = vpack.c.bf16 %v4500_v13, %v4493_v14  ;;  %v8270_v12 = vpack.c.bf16 %v11515_v15, %v11511_v52 }
 0xae6   : > { %v4394_v13 = vsub.f32 %v11783_v0, %v4393_v16  ;;  %v4401_v14 = vsub.f32 %v11785_v46, %v4400_v2 }
 0xae8   : > { %8255 = vmatpush3.bf16.xpose.msra.mxu0 %v8254_v57  ;;  %v4387_v57 = vsub.f32 %v11776_v37, %v13181_v9  ;;  %v4402_v23 = vand.u32 4294901760, %v4401_v14  ;;  %v8288_v14 = vpack.c.bf16 %v11688_v22, %v11686_v43 }
 0xae9   : > { %8257 = vmatprep.subr.bf16.mxu0 %v8256_v35  ;;  %v4513_v35 = vsub.f32 %v11780_v33, %v13182_v25 }
 0xaea   : > { %v4388_v28 = vand.u32 4294901760, %v4387_v57 }
 0xaeb   : > { %v4514_v55 = vand.u32 4294901760, %v4513_v35  ;;  %v8272_v35 = vpack.c.bf16 %v11525_v27, %v11523_v19 }
 0xaec   : > { %v8262_v9 = vpack.c.bf16 %v4388_v28, %v4381_v18  ;;  %v8282_v18 = vpack.c.bf16 %v11651_v53, %v11647_v60  ;;  %v8284_v28 = vpack.c.bf16 %v11674_v3, %v11672_v11 }
 0xaed   : > { %v8264_v25 = vpack.c.bf16 %v4514_v55, %v4507_v29  ;;  %v8274_v55 = vpack.c.bf16 %v11530_v39, %v11527_v49  ;;  %v8276_v29 = vpack.c.bf16 %v11570_v36, %v11568_v38 }
 0xaf0   : > { %8259 = vmatpush3.bf16.xpose.msra.mxu0 %v8258_v58  ;;  %v4395_v58 = vand.u32 4294901760, %v4394_v13  ;;  %v8286_v13 = vpack.c.bf16 %v11682_v31, %v11677_v56 }
 0xaf1   : > { %8261 = vmatprep.subr.bf16.mxu0 %v8260_v51  ;;  %v8268_v51 = vpack.c.bf16 %v11509_v62, %v11507_v32 }
 0xaf2   : > { %v8266_v57 = vpack.c.bf16 %v4402_v23, %v4395_v58  ;;  %v8290_v58 = vpack.c.bf16 %v11694_v7, %v11690_v61  ;;  %v8292_v23 = vpack.c.bf16 %v11771_v1, %v11769_v45 }
 0xaf8   : > { %8263 = vmatpush3.bf16.xpose.msra.mxu0 %v8262_v9  ;;  %v8278_v9 = vpack.c.bf16 %v11575_v21, %v11573_v20 }
 0xaf9   : > { %8265 = vmatprep.subr.bf16.mxu0 %v8264_v25  ;;  %v8280_v25 = vpack.c.bf16 %v11645_v40, %v11643_v4 }
 0xb00   : > { %8267 = vmatpush3.bf16.xpose.msra.mxu0 %v8266_v57  ;;  %v8294_v57 = vpack.c.bf16 %v11776_v37, %v11773_v50 }
 0xb01   : > { %8269 = vmatprep.subr.bf16.mxu0 %v8268_v51  ;;  %v8296_v51 = vpack.c.bf16 %v11780_v33, %v11778_v10 }
 0xb07   : > { %7089 = vmatmul.mubr.f32.vlgmr.msra.gmra.mrb[12].mxu0 %v11807_v59 }
 0xb08   : > { %8271 = vmatpush3.bf16.xpose.msra.mxu0 %v8270_v12  ;;  %7122 = vmatprep.mubr.f32.mxu0 %v11819_v24  ;;  %v8298_v12 = vpack.c.bf16 %v11785_v46, %v11783_v0  ;;  %v13873_v0 = vld [vmem:[#allocation31_spill] sm:$0xff] }
 0xb09   : > { %8273 = vmatprep.subr.bf16.mxu0 %v8272_v35  ;;  %v13836_v35 = vld [vmem:[#allocation15_spill] sm:$0xff] }
 0xb10   : > { %8275 = vmatpush3.bf16.xpose.msra.mxu0 %v8274_v55  ;;  %v13837_v55 = vld [vmem:[#allocation20_spill] sm:$0xff] }
 0xb11   : > { %8277 = vmatprep.subr.bf16.mxu0 %v8276_v29  ;;  %v13838_v29 = vld [vmem:[#allocation21_spill] sm:$0xff] }
 0xb18   : > { %8279 = vmatpush3.bf16.xpose.msra.mxu0 %v8278_v9  ;;  %v13839_v9 = vld [vmem:[#allocation33_spill] sm:$0xff] }
 0xb19   : > { %8281 = vmatprep.subr.bf16.mxu0 %v8280_v25  ;;  %v13840_v25 = vand.u32 4294901760, %v11507_v32  ;;  %v13847_v32 = vand.u32 4294901760, %v11527_v49 }
 0xb20   : > { %8283 = vmatpush3.bf16.xpose.msra.mxu0 %v8282_v18  ;;  %v13841_v18 = vand.u32 4294901760, %v11509_v62  ;;  %v13848_v62 = vand.u32 4294901760, %v11530_v39  ;;  %v13855_v39 = vand.u32 4294901760, %v11647_v60 }
 0xb21   : > { %8285 = vmatprep.subr.bf16.mxu0 %v8284_v28 }
 0xb22   : > { %v8332_v28 = vpack.c.bf16 %v13841_v18, %v13840_v25  ;;  %v8338_v25 = vpack.c.bf16 %v13848_v62, %v13847_v32  ;;  %v13866_v32 = vand.u32 4294901760, %v11771_v1  ;;  %v13869_v62 = vand.u32 4294901760, %v11780_v33 }
 0xb23   : > { %v8362_v1 = vpack.c.bf16 %v4400_v2, %v4393_v16  ;;  %v2142_v16 = vmul.f32 %v13833_v8, %v13833_v8 }
 0xb25   : > { %v2143_v2 = vsel %vm278_vm0, %v2142_v16, 0.0 }
 0xb28   : > { %8287 = vmatpush3.bf16.xpose.msra.mxu0 %v8286_v13  ;;  %v13842_v13 = vld [vmem:[#allocation34_spill] sm:$0xff] }
 0xb29   : > { %8289 = vmatprep.subr.bf16.mxu0 %v8288_v14  ;;  %v13843_v14 = vand.u32 4294901760, %v11511_v52  ;;  %v13849_v52 = vand.u32 4294901760, %v11568_v38  ;;  %v13856_v38 = vand.u32 4294901760, %v11651_v53  ;;  %v13863_v53 = vand.u32 4294901760, %v11690_v61 }
 0xb2a   : > { %v8360_v61 = vpack.c.bf16 %v13869_v62, %v4505_v48 }
 0xb30   : > { %8291 = vmatpush3.bf16.xpose.msra.mxu0 %v8290_v58  ;;  %v13844_v58 = vand.u32 4294901760, %v11515_v15  ;;  %v13850_v15 = vand.u32 4294901760, %v11570_v36  ;;  %v8346_v36 = vpack.c.bf16 %v13856_v38, %v13855_v39 }
 0xb31   : > { %8293 = vmatprep.subr.bf16.mxu0 %v8292_v23 }
 0xb32   : > { %v8334_v23 = vpack.c.bf16 %v13844_v58, %v13843_v14  ;;  %v8340_v18 = vpack.c.bf16 %v13850_v15, %v13849_v52  ;;  %v13854_v14 = vand.u32 4294901760, %v11645_v40  ;;  %v13857_v58 = vand.u32 4294901760, %v11672_v11  ;;  %v13878_v15 = vld [vmem:[#allocation43_spill] sm:$0xff] }
 0xb33   : > { %v13864_v11 = vand.u32 4294901760, %v11694_v7 }
 0xb38   : > { %8295 = vmatpush3.bf16.xpose.msra.mxu0 %v8294_v57  ;;  %v13845_v57 = vand.u32 4294901760, %v11523_v19  ;;  %v13851_v19 = vand.u32 4294901760, %v11573_v20 }
 0xb39   : > { %8297 = vmatprep.subr.bf16.mxu0 %v8296_v51  ;;  %v13846_v51 = vand.u32 4294901760, %v11525_v27  ;;  %v13852_v27 = vand.u32 4294901760, %v11575_v21  ;;  %v13859_v21 = vand.u32 4294901760, %v11677_v56 }
 0xb40   : > { %8299 = vmatpush3.bf16.xpose.msra.mxu0 %v8298_v12  ;;  %v8336_v12 = vpack.c.bf16 %v13846_v51, %v13845_v57  ;;  %v13861_v57 = vand.u32 4294901760, %v11686_v43  ;;  %v13862_v51 = vand.u32 4294901760, %v11688_v22  ;;  %v13868_v43 = vand.u32 4294901760, %v11776_v37 }
 0xb41   : > { %8301 = vmatprep.subr.bf16.mxu0 %v11505_v47 }
 0xb42   : > { %v8352_v60 = vpack.c.bf16 %v13862_v51, %v13861_v57  ;;  %v13889_v57 = vld [vmem:[#allocation68_spill] sm:$0xff] }
 0xb43   : > { %v5099_v51 = vand.u32 4294901760, %v13889_v57 }
 0xb47   : > { %7123 = vmatmul.mubr.f32.vlgmr.msra.gmra.mrb[12].mxu0 %v11819_v24  ;;  %v13835_v24 = vld [vmem:[#allocation12_spill] sm:$0xff] }
 0xb48   : > { %8303 = vmatpush3.bf16.xpose.msra.mxu0 %v11513_v42  ;;  %7156 = vmatprep.mubr.f32.mxu0 %v11822_v34 }
 0xb49   : > { %8305 = vmatprep.subr.bf16.mxu0 %v11521_v41 }
 0xb50   : > { %8307 = vmatpush3.bf16.xpose.msra.mxu0 %v11532_v30 }
 0xb51   : > { %8309 = vmatprep.subr.bf16.mxu0 %v11563_v26 }
 0xb58   : > { %8311 = vmatpush3.bf16.xpose.msra.mxu0 %v11565_v5 }
 0xb59   : > { %8313 = vmatprep.subr.bf16.mxu0 %v11641_v63 }
 0xb60   : > { %8315 = vmatpush3.bf16.xpose.msra.mxu0 %v11649_v6 }
 0xb61   : > { %8317 = vmatprep.subr.bf16.mxu0 %v11670_v17 }
 0xb68   : > { %8319 = vmatpush3.bf16.xpose.msra.mxu0 %v11692_v44 }
 0xb69   : > { %8321 = vmatprep.subr.bf16.mxu0 %v13835_v24 }
 0xb70   : > { %8323 = vmatpush3.bf16.xpose.msra.mxu0 %v13836_v35 }
 0xb71   : > { %8325 = vmatprep.subr.bf16.mxu0 %v13837_v55 }
 0xb78   : > { %8327 = vmatpush3.bf16.xpose.msra.mxu0 %v13838_v29 }
 0xb79   : > { %8329 = vmatprep.subr.bf16.mxu0 %v13839_v9 }
 0xb80   : > { %8331 = vmatpush3.bf16.xpose.msra.mxu0 %v13842_v13 }
 0xb81   : > { %8333 = vmatprep.subr.bf16.mxu0 %v8332_v28  ;;  %v13853_v28 = vand.u32 4294901760, %v11643_v4  ;;  %v13860_v4 = vand.u32 4294901760, %v11682_v31  ;;  %v13867_v31 = vand.u32 4294901760, %v11773_v50 }
 0xb83   : > { %v8344_v49 = vpack.c.bf16 %v13854_v14, %v13853_v28  ;;  %v8350_v40 = vpack.c.bf16 %v13860_v4, %v13859_v21  ;;  %v8358_v22 = vpack.c.bf16 %v13868_v43, %v13867_v31  ;;  %v13881_v14 = vld [vmem:[#allocation60_spill] sm:$0xff]  ;;  %v13888_v4 = vld [vmem:[#allocation67_spill] sm:$0xff]  ;;  %v13895_v43 = vld [vmem:[#allocation65_spill] sm:$0xff] }
 0xb84   : > { %v5093_v8 = vand.u32 4294901760, %v13881_v14 }
 0xb87   : > { %7157 = vmatmul.mubr.f32.vlgmr.msra.gmra.mrb[12].mxu0 %v11822_v34  ;;  %v8342_v34 = vpack.c.bf16 %v13852_v27, %v13851_v19  ;;  %v13879_v19 = vld [vmem:[#allocation51_spill] sm:$0xff] }
 0xb88   : > { %8335 = vmatpush3.bf16.xpose.msra.mxu0 %v8334_v23  ;;  %7190 = vmatprep.mubr.f32.mxu0 %v11807_v59  ;;  %v13858_v23 = vand.u32 4294901760, %v11674_v3  ;;  %v8354_v3 = vpack.c.bf16 %v13864_v11, %v13863_v53  ;;  %v5141_v27 = vand.u32 4294901760, %v13879_v19  ;;  %v13891_v11 = vld [vmem:[#allocation49_spill] sm:$0xff] }
 0xb89   : > { %8337 = vmatprep.subr.bf16.mxu0 %v8336_v12  ;;  %v13865_v12 = vand.u32 4294901760, %v11769_v45  ;;  %v6181_v45 = vld [vmem:[%s12675_s2 + $0x2] ss:$4 sm:$0x3] }
 0xb8a   : > { %v8348_v20 = vpack.c.bf16 %v13858_v23, %v13857_v58  ;;  %v13886_v58 = vld [vmem:[#allocation64_spill] sm:$0xff] }
 0xb8b   : > { %v8356_v56 = vpack.c.bf16 %v13866_v32, %v13865_v12  ;;  %v5144_v23 = vand.u32 4294901760, %v13886_v58 }
 0xb90   : > { %8339 = vmatpush3.bf16.xpose.msra.mxu0 %v8338_v25  ;;  %v13877_v25 = vld [vmem:[#allocation30_spill] sm:$0xff] }
 0xb91   : > { %8341 = vmatprep.subr.bf16.mxu0 %v8340_v18  ;;  %v5087_v52 = vand.u32 4294901760, %v13877_v25  ;;  %v5138_v18 = vand.u32 4294901760, %v13878_v15 }
 0xb93   : > { %v12090_v38 = vpack.c.bf16 %v5141_v27, %v5138_v18 }
 0xb95   : > { %13884 = vst [vmem:[#allocation47_spill] sm:$0xff] %v12090_v38 }
 0xb98   : > { %8343 = vmatpush3.bf16.xpose.msra.mxu0 %v8342_v34  ;;  %v13880_v34 = vld [vmem:[#allocation57_spill] sm:$0xff] }
 0xb99   : > { %8345 = vmatprep.subr.bf16.mxu0 %v8344_v49  ;;  %v5090_v28 = vand.u32 4294901760, %v13880_v34 }
 0xba0   : > { %8347 = vmatpush3.bf16.xpose.msra.mxu0 %v8346_v36  ;;  %v12093_v36 = vpack.c.bf16 %v5093_v8, %v5090_v28 }
 0xba1   : > { %8349 = vmatprep.subr.bf16.mxu0 %v8348_v20  ;;  %v13887_v20 = vld [vmem:[#allocation66_spill] sm:$0xff] }
 0xba2   : > { %13885 = vst [vmem:[#allocation52_spill] sm:$0xff] %v12093_v36  ;;  %v5147_v21 = vand.u32 4294901760, %v13887_v20 }
 0xba4   : > { %v12103_v12 = vpack.c.bf16 %v5147_v21, %v5144_v23 }
 0xba6   : > { %13892 = vst [vmem:[#allocation53_spill] sm:$0xff] %v12103_v12 }
 0xba8   : > { %8351 = vmatpush3.bf16.xpose.msra.mxu0 %v8350_v40  ;;  %v5096_v40 = vand.u32 4294901760, %v13888_v4 }
 0xba9   : > { %8353 = vmatprep.subr.bf16.mxu0 %v8352_v60  ;;  %v13890_v60 = vld [vmem:[#allocation5_spill] sm:$0xff] }
 0xbaa   : > { %v5150_v53 = vand.u32 4294901760, %v13890_v60  ;;  %v12106_v32 = vpack.c.bf16 %v5099_v51, %v5096_v40 }
 0xbac   : > { %13893 = vst [vmem:[#allocation55_spill] sm:$0xff] %v12106_v32 }
 0xbb0   : > { %8355 = vmatpush3.bf16.xpose.msra.mxu0 %v8354_v3  ;;  %v5153_v3 = vand.u32 4294901760, %v13891_v11 }
 0xbb1   : > { %8357 = vmatprep.subr.bf16.mxu0 %v8356_v56  ;;  %v13894_v56 = vld [vmem:[#allocation61_spill] sm:$0xff] }
 0xbb2   : > { %v5102_v31 = vand.u32 4294901760, %v13894_v56  ;;  %v12111_v62 = vpack.c.bf16 %v5153_v3, %v5150_v53 }
 0xbb4   : > { %13896 = vst [vmem:[#allocation56_spill] sm:$0xff] %v12111_v62 }
 0xbb8   : > { %8359 = vmatpush3.bf16.xpose.msra.mxu0 %v8358_v22  ;;  %v5105_v22 = vand.u32 4294901760, %v13895_v43 }
 0xbb9   : > { %8361 = vmatprep.subr.bf16.mxu0 %v8360_v61  ;;  %v13897_v61 = vld [vmem:[#allocation41_spill] sm:$0xff] }
 0xbc0   : > { %8363 = vmatpush3.bf16.xpose.msra.mxu0 %v8362_v1  ;;  %v5156_v1 = vand.u32 4294901760, %v13897_v61 }
 0xbc1   : > { %8365 = vmatprep.subr.bf16.mxu0 %v11505_v47  ;;  %v13870_v47 = vld [vmem:[#allocation23_spill] sm:$0xff] }
 0xbc7   : > { %7191 = vmatmul.mubr.f32.vlgmr.msra.gmra.mrb[12].mxu0 %v11807_v59 }
 0xbc8   : > { %8367 = vmatpush3.bf16.xpose.msra.mxu0 %v11513_v42  ;;  %7224 = vmatprep.mubr.f32.mxu0 %v11807_v59  ;;  %v5045_v42 = vrot.slane %v6181_v45, %v13870_v47 }
 0xbc9   : > { %8369 = vmatprep.subr.bf16.mxu0 %v11521_v41 }
 0xbd0   : > { %8371 = vmatpush3.bf16.xpose.msra.mxu0 %v11532_v30  ;;  %v13871_v30 = vld [vmem:[#allocation25_spill] sm:$0xff] }
 0xbd1   : > { %8373 = vmatprep.subr.bf16.mxu0 %v11563_v26  ;;  %v5049_v10 = vrot.slane %v6181_v45, %v13871_v30  ;;  %v13898_v45 = vld [vmem:[#allocation45_spill] sm:$0xff] }
 0xbd2   : > { %v5159_v47 = vand.u32 4294901760, %v13898_v45 }
 0xbd8   : > { %8375 = vmatpush3.bf16.xpose.msra.mxu0 %v11565_v5 }
 0xbd9   : > { %8377 = vmatprep.subr.bf16.mxu0 %v11641_v63 }
 0xbe0   : > { %8379 = vmatpush3.bf16.xpose.msra.mxu0 %v11649_v6  ;;  %v13872_v6 = vld [vmem:[#allocation26_spill] sm:$0xff] }
 0xbe1   : > { %8381 = vmatprep.subr.bf16.mxu0 %v11670_v17 }
 0xbe8   : > { %8383 = vmatpush3.bf16.xpose.msra.mxu0 %v11692_v44 }
 0xbe9   : > { %8385 = vmatprep.subr.bf16.mxu0 %v13835_v24  ;;  %v13874_v24 = vld [vmem:[#allocation14_spill] sm:$0xff] }
 0xbf0   : > { %8387 = vmatpush3.bf16.xpose.msra.mxu0 %v13836_v35  ;;  %v5132_v35 = vand.u32 4294901760, %v13874_v24 }
 0xbf1   : > { %8389 = vmatprep.subr.bf16.mxu0 %v13837_v55  ;;  %v13875_v55 = vld [vmem:[#allocation22_spill] sm:$0xff] }
 0xbf8   : > { %8391 = vmatpush3.bf16.xpose.msra.mxu0 %v13838_v29  ;;  %v5135_v29 = vand.u32 4294901760, %v13875_v55 }
 0xbf9   : > { %8393 = vmatprep.subr.bf16.mxu0 %v13839_v9  ;;  %v13876_v9 = vld [vmem:[#allocation27_spill] sm:$0xff] }
 0xbfa   : > { %v12086_v49 = vpack.c.bf16 %v5135_v29, %v5132_v35 }
 0xbfc   : > { %13882 = vst [vmem:[#allocation40_spill] sm:$0xff] %v12086_v49  ;;  %8397 = vmatprep.subr.bf16.mxu1 %v12086_v49 }
 0xc00   : > { %8395 = vmatpush3.bf16.xpose.msra.mxu0 %v13842_v13  ;;  %v5084_v13 = vand.u32 4294901760, %v13876_v9 }
 0xc02   : > { %v12088_v39 = vpack.c.bf16 %v5087_v52, %v5084_v13 }
 0xc04   : > { %13883 = vst [vmem:[#allocation42_spill] sm:$0xff] %v12088_v39  ;;  %8399 = vmatpush3.bf16.msra.mxu1 %v12088_v39 }
 0xc05   : > { %8401 = vmatprep.subr.bf16.mxu1 %v12090_v38 }
 0xc07   : > { %7225 = vmatmul.mubr.f32.vlgmr.msra.gmra.mrb[12].mxu0 %v11807_v59 }
 0xc08   : > { %8403 = vmatpush3.bf16.msra.mxu1 %v12093_v36 }
 0xc09   : > { %8405 = vmatprep.subr.bf16.mxu1 %v12103_v12 }
 0xc0c   : > { %8407 = vmatpush3.bf16.msra.mxu1 %v12106_v32  ;;  %v12158_v32 = vsub.f32 %v13879_v19, %v5141_v27  ;;  %v12173_v19 = vsub.f32 %v13886_v58, %v5144_v23  ;;  %v12176_v27 = vsub.f32 %v13887_v20, %v5147_v21  ;;  %v12199_v23 = vsub.f32 %v13894_v56, %v5102_v31 }
 0xc0d   : > { %8409 = vmatprep.subr.bf16.mxu1 %v12111_v62  ;;  %v12202_v20 = vsub.f32 %v13895_v43, %v5105_v22  ;;  %v12205_v21 = vsub.f32 %v13897_v61, %v5156_v1 }
 0xc0f   : > { %13916 = vst [vmem:[#allocation58_spill] sm:$0xff] %v12202_v20  ;;  %13917 = vst [vmem:[#allocation59_spill] sm:$0xff] %v12205_v21 }
 0xcda   : > { %v5034_v41 = vpop.f32.mrb[12].mxu0 }
 0xcdb   : > { %v5039_v50 = vmul.f32 2.0, %v5034_v41  ;;  %v5036_v26 = vpop.f32.mrb[13].mxu0  ;;  %v13900_v41 = vld [vmem:[#allocation6_spill] sm:$0xff] }
 0xcdc   : > { %v5040_v5 = vmul.f32 2.0, %v5036_v26  ;;  %v5108_v30 = vand.u32 4294901760, %v13900_v41  ;;  %v12121_v26 = vpack.c.bf16 %v5159_v47, %v5156_v1 }
 0xcdd   : > { %v5052_v33 = vsub.f32 %v5045_v42, %v5039_v50  ;;  %v12116_v42 = vpack.c.bf16 %v5105_v22, %v5102_v31  ;;  %v13925_v31 = vld [vmem:[#allocation29_spill] sm:$0xff]  ;;  %v13926_v22 = vld [vmem:[#allocation32_spill] sm:$0xff] }
 0xcde   : > { %v5053_v7 = vsub.f32 %v5049_v10, %v5040_v5  ;;  %v13901_v10 = vld [vmem:[#allocation7_spill] sm:$0xff]  ;;  %13902 = vst [vmem:[#allocation37_spill] sm:$0xff] %v12121_v26  ;;  %v13201_v43 = vand.u32 4294901760, %v13925_v31  ;;  %v13198_v61 = vand.u32 4294901760, %v13926_v22 }
 0xcdf   : > { %13899 = vst [vmem:[#allocation35_spill] sm:$0xff] %v12116_v42  ;;  %v5111_v50 = vand.u32 4294901760, %v13901_v10  ;;  %8411 = vmatpush3.bf16.msra.mxu1 %v12116_v42  ;;  %v13906_v42 = vld [vmem:[#allocation10_spill] sm:$0xff] }
 0xce0   : > { %v5054_v44 = vmin.f32 %v5052_v33, %v5053_v7  ;;  %8413 = vmatprep.subr.bf16.mxu1 %v12121_v26 }
 0xce1   : > { %v12124_v5 = vpack.c.bf16 %v5111_v50, %v5108_v30 }
 0xce2   : > { %5055 = vmin.xlane.f32.xlu0 %v5054_v44 }
 0xce3   : > { %13903 = vst [vmem:[#allocation38_spill] sm:$0xff] %v12124_v5  ;;  %8415 = vmatpush3.bf16.msra.mxu1 %v12124_v5  ;;  %v5114_v5 = vand.u32 4294901760, %v13906_v42 }
 0xd6f   : > { %v5056_v63 = vpop.xlane.xlu0 %5055 }
 0xd70   : > { %vm5057_vm15 = vcmp.le.f32.partialorder %v5052_v33, %v5056_v63  ;;  %vm5058_vm1 = vcmp.le.f32.partialorder %v5053_v7, %v5056_v63 }
 0xd71   : > { %v5059_v17 = vsel %vm5057_vm15, %v13872_v6, 256  ;;  %v5060_v37 = vsel %vm5058_vm1, %v13873_v0, 256 }
 0xd72   : > { %vm5061_vm2 = vcmp.lt.s32.totalorder %v5059_v17, %v5060_v37 }
 0xd73   : > { %v5062_v46 = vsel %vm5061_vm2, %v5059_v17, %v5060_v37  ;;  %v4045_v17 = vmul.f32 %v11798_v54, %v11798_v54  ;;  %v12155_v54 = vsub.f32 %v13878_v15, %v5138_v18  ;;  %v13913_v15 = vld [vmem:[#allocation19_spill] sm:$0xff] }
 0xd74   : > { %v5064_v59 = vshra.s32 %v5062_v46, 16  ;;  %v5063_v33 = vand.u32 65535, %v5062_v46  ;;  %v13907_v46 = vld [vmem:[#allocation11_spill] sm:$0xff]  ;;  %v13205_v18 = vand.u32 4294901760, %v13913_v15 }
 0xd75   : > { %v4046_v37 = vsel %vm278_vm0, %v4045_v17, 0.0  ;;  %v5117_v62 = vand.u32 4294901760, %v13907_v46  ;;  %v12150_v17 = vsub.f32 %v13877_v25, %v5087_v52  ;;  %v13912_v25 = vld [vmem:[#allocation18_spill] sm:$0xff] }
 0xd76   : > { %v5066_v48 = vcvt.s32.f32 %v5064_v59  ;;  %v5065_v44 = vcvt.s32.f32 %v5063_v33  ;;  %v13904_v59 = vld [vmem:[#allocation8_spill] sm:$0xff]  ;;  %v12139_v33 = vsub.f32 %v13874_v24, %v5132_v35  ;;  %v5120_v52 = vand.u32 4294901760, %v13912_v25 }
 0xd77   : > { %v5162_v16 = vand.u32 4294901760, %v13904_v59  ;;  %v13910_v24 = vld [vmem:[#allocation16_spill] sm:$0xff] }
 0xd78   : > { %5067 = vmin.xlane.f32.xlu1 %v5066_v48  ;;  %v5168_v35 = vand.u32 4294901760, %v13910_v24  ;;  %v12196_v58 = vpack.c.bf16 %v13205_v18, %v5120_v52  ;;  %v13197_v1 = vand.u32 4294901760, %v12139_v33 }
 0xd7a   : > { %13915 = vst [vmem:[#allocation54_spill] sm:$0xff] %v12196_v58 }
 0xd7c   : > { %2144 = vadd.xlane.f32.xlu1 %v2143_v2  ;;  %v13905_v2 = vld [vmem:[#allocation9_spill] sm:$0xff] }
 0xd7d   : > { %v5165_v26 = vand.u32 4294901760, %v13905_v2 }
 0xe05   : > { %v12128_v7 = vpop.xlane.xlu1 %5067 }
 0xe06   : > { %vm5069_vm3 = vcmp.eq.f32.partialorder %v5066_v48, %v12128_v7  ;;  %v12141_v48 = vpack.c.bf16 %v5165_v26, %v5162_v16 }
 0xe07   : > { %v5070_v63 = vsel %vm5069_vm3, %v5065_v44, inf  ;;  %v12144_v44 = vsub.f32 %v13875_v55, %v5135_v29  ;;  %v13911_v55 = vld [vmem:[#allocation17_spill] sm:$0xff] }
 0xe08   : > { %5071 = vmin.xlane.f32.xlu0 %v5070_v63  ;;  %13908 = vst [vmem:[#allocation39_spill] sm:$0xff] %v12141_v48  ;;  %v12147_v63 = vsub.f32 %v13876_v9, %v5084_v13  ;;  %8417 = vmatprep.subr.bf16.mxu1 %v12141_v48  ;;  %v5171_v29 = vand.u32 4294901760, %v13911_v55  ;;  %v12164_v9 = vsub.f32 %v13880_v34, %v5090_v28 }
 0xe09   : > { %v12167_v13 = vsub.f32 %v13881_v14, %v5093_v8  ;;  %v12179_v48 = vsub.f32 %v13888_v4, %v5096_v40  ;;  %v12184_v28 = vsub.f32 %v13889_v57, %v5099_v51  ;;  %v12187_v14 = vsub.f32 %v13890_v60, %v5150_v53  ;;  %v13923_v53 = vld [vmem:[#allocation24_spill] sm:$0xff] }
 0xe0a   : > { %v12181_v34 = vpack.c.bf16 %v5171_v29, %v5168_v35  ;;  %v12190_v8 = vsub.f32 %v13891_v11, %v5153_v3  ;;  %v12208_v4 = vsub.f32 %v13898_v45, %v5159_v47  ;;  %v12212_v40 = vsub.f32 %v13900_v41, %v5108_v30  ;;  %v13924_v3 = vld [vmem:[#allocation28_spill] sm:$0xff] }
 0xe0b   : > { %v12215_v57 = vsub.f32 %v13901_v10, %v5111_v50  ;;  %v12218_v51 = vsub.f32 %v13904_v59, %v5162_v16  ;;  %v12221_v60 = vsub.f32 %v13905_v2, %v5165_v26  ;;  %v13203_v11 = vand.u32 4294901760, %v13923_v53 }
 0xe0c   : > { %4047 = vadd.xlane.f32.xlu0 %v4046_v37  ;;  %v12152_v37 = vpack.c.bf16 %v5117_v62, %v5114_v5  ;;  %13914 = vst [vmem:[#allocation50_spill] sm:$0xff] %v12181_v34  ;;  %13918 = vst [vmem:[#allocation62_spill] sm:$0xff] %v12208_v4  ;;  %v13202_v56 = vand.u32 4294901760, %v13924_v3  ;;  %v13196_v45 = vand.u32 4294901760, %v12144_v44  ;;  %v13199_v47 = vand.u32 4294901760, %v12147_v63 }
 0xe0d   : > { %13919 = vst [vmem:[#allocation63_spill] sm:$0xff] %v12212_v40  ;;  %13920 = vst [vmem:[#allocation69_spill] sm:$0xff] %v12215_v57  ;;  %v13200_v41 = vand.u32 4294901760, %v12150_v17  ;;  %v12233_v30 = vsub.f32 %v13906_v42, %v5114_v5  ;;  %v12236_v10 = vsub.f32 %v13907_v46, %v5117_v62  ;;  %v12248_v26 = vpack.c.bf16 %v13198_v61, %v13201_v43 }
 0xe0e   : > { %13909 = vst [vmem:[#allocation48_spill] sm:$0xff] %v12152_v37  ;;  %8419 = vmatpush3.bf16.msra.mxu1 %v12152_v37  ;;  %13921 = vst [vmem:[#allocation44_spill] sm:$0xff] %v12218_v51  ;;  %v12242_v50 = vpack.c.bf16 %v13202_v56, %v13203_v11  ;;  %v12251_v59 = vsub.f32 %v13910_v24, %v5168_v35  ;;  %v12254_v42 = vsub.f32 %v13911_v55, %v5171_v29 }
 0xe0f   : > { %8421 = vmatprep.subr.bf16.mxu1 %v12181_v34  ;;  %13922 = vst [vmem:[#allocation13_spill] sm:$0xff] %v12221_v60  ;;  %13928 = vst [vmem:[#allocation12_spill] sm:$0xff] %v12248_v26  ;;  %v5311_v62 = vsub.f32 %v12139_v33, %v13197_v1  ;;  %v5318_v5 = vsub.f32 %v12144_v44, %v13196_v45  ;;  %v5199_v16 = vsub.f32 %v12147_v63, %v13199_v47 }
 0xe10   : > { %13927 = vst [vmem:[#allocation46_spill] sm:$0xff] %v12242_v50  ;;  %13929 = vst [vmem:[#allocation15_spill] sm:$0xff] %v12254_v42  ;;  %v5206_v2 = vsub.f32 %v12150_v17, %v13200_v41  ;;  %v13204_v46 = vand.u32 4294901760, %v12155_v54  ;;  %v13206_v24 = vand.u32 4294901760, %v12158_v32  ;;  %v13212_v29 = vand.u32 4294901760, %v12164_v9 }
 0xe11   : > { %v5312_v35 = vand.u32 4294901760, %v5311_v62  ;;  %v5319_v55 = vand.u32 4294901760, %v5318_v5  ;;  %v13207_v45 = vand.u32 4294901760, %v12167_v13  ;;  %v5200_v1 = vand.u32 4294901760, %v5199_v16 }
 0xe12   : > { %8423 = vmatpush3.bf16.msra.mxu1 %v12196_v58  ;;  %v5207_v61 = vand.u32 4294901760, %v5206_v2  ;;  %v5325_v47 = vsub.f32 %v12155_v54, %v13204_v46  ;;  %v5332_v41 = vsub.f32 %v12158_v32, %v13206_v24  ;;  %v5213_v62 = vsub.f32 %v12164_v9, %v13212_v29 }
 0xe13   : > { %8425 = vmatprep.subr.bf16.mxu1 %v12242_v50  ;;  %v8428_v43 = vpack.c.bf16 %v5319_v55, %v5312_v35  ;;  %v5220_v5 = vsub.f32 %v12167_v13, %v13207_v45  ;;  %v13208_v16 = vand.u32 4294901760, %v12173_v19  ;;  %v13210_v46 = vand.u32 4294901760, %v12176_v27 }
 0xe14   : > { %v12287_v2 = vpack.c.bf16 %v5207_v61, %v5200_v1  ;;  %v5326_v56 = vand.u32 4294901760, %v5325_v47  ;;  %v5333_v11 = vand.u32 4294901760, %v5332_v41  ;;  %v5214_v18 = vand.u32 4294901760, %v5213_v62 }
 0xe15   : > { %v5221_v24 = vand.u32 4294901760, %v5220_v5  ;;  %v5339_v35 = vsub.f32 %v12173_v19, %v13208_v16  ;;  %v13209_v55 = vand.u32 4294901760, %v12179_v48  ;;  %v12297_v45 = vsub.f32 %v13912_v25, %v5120_v52 }
 0xe16   : > { %8427 = vmatpush3.bf16.msra.mxu1 %v12248_v26  ;;  %v12299_v61 = vpack.c.bf16 %v5333_v11, %v5326_v56  ;;  %v5346_v1 = vsub.f32 %v12176_v27, %v13210_v46  ;;  %v13213_v5 = vand.u32 4294901760, %v12187_v14  ;;  %v13216_v52 = vand.u32 4294901760, %v12190_v8 }
 0xe17   : > { %8429 = vmatprep.subr.bf16.mxu1 %v8428_v43  ;;  %13930 = vst [vmem:[#allocation20_spill] sm:$0xff] %v12297_v45  ;;  %v13211_v43 = vand.u32 4294901760, %v12184_v28  ;;  %v12305_v47 = vpack.c.bf16 %v5221_v24, %v5214_v18  ;;  %v5340_v41 = vand.u32 4294901760, %v5339_v35  ;;  %v5227_v62 = vsub.f32 %v12179_v48, %v13209_v55 }
 0xe18   : > { %v5347_v16 = vand.u32 4294901760, %v5346_v1  ;;  %v13217_v11 = vand.u32 4294901760, %v12199_v23  ;;  %v13931_v56 = vand.u32 4294901760, %v13913_v15  ;;  %v5353_v35 = vsub.f32 %v12187_v14, %v13213_v5 }
 0xe19   : > { %v5234_v25 = vsub.f32 %v12184_v28, %v13211_v43  ;;  %v5228_v24 = vand.u32 4294901760, %v5227_v62  ;;  %v13218_v1 = vand.u32 4294901760, %v12202_v20  ;;  %v5360_v43 = vsub.f32 %v12190_v8, %v13216_v52 }
 0xe1a   : > { %v12319_v18 = vsub.f32 %v13913_v15, %v13931_v56  ;;  %v12325_v55 = vpack.c.bf16 %v5347_v16, %v5340_v41  ;;  %v5241_v29 = vsub.f32 %v12199_v23, %v13217_v11  ;;  %v5354_v15 = vand.u32 4294901760, %v5353_v35 }
 0xe1b   : > { %v5235_v46 = vand.u32 4294901760, %v5234_v25  ;;  %v5248_v62 = vsub.f32 %v12202_v20, %v13218_v1  ;;  %v13221_v56 = vand.u32 4294901760, %v12205_v21  ;;  %v13222_v5 = vand.u32 4294901760, %v12208_v4 }
 0xe1c   : > { %13932 = vst [vmem:[#allocation21_spill] sm:$0xff] %v12319_v18  ;;  %v5361_v41 = vand.u32 4294901760, %v5360_v43  ;;  %v5242_v25 = vand.u32 4294901760, %v5241_v29  ;;  %v13227_v26 = vand.u32 4294901760, %v12212_v40  ;;  %v13933_v50 = vand.u32 4294901760, %v13923_v53 }
 0xe1d   : > { %v12338_v16 = vpack.c.bf16 %v5235_v46, %v5228_v24  ;;  %v5249_v52 = vand.u32 4294901760, %v5248_v62  ;;  %v5367_v11 = vsub.f32 %v12205_v21, %v13221_v56  ;;  %v5374_v35 = vsub.f32 %v12208_v4, %v13222_v5 }
 0xe1e   : > { %v12351_v46 = vsub.f32 %v13923_v53, %v13933_v50  ;;  %v13935_v29 = vand.u32 4294901760, %v13924_v3  ;;  %v12358_v24 = vpack.c.bf16 %v5361_v41, %v5354_v15  ;;  %v5255_v62 = vsub.f32 %v12212_v40, %v13227_v26 }
 0xe1f   : > { %v12363_v56 = vpack.c.bf16 %v5249_v52, %v5242_v25  ;;  %v5368_v5 = vand.u32 4294901760, %v5367_v11  ;;  %v5375_v1 = vand.u32 4294901760, %v5374_v35  ;;  %v13937_v58 = vand.u32 4294901760, %v12215_v57 }
 0xe20   : > { %13934 = vst [vmem:[#allocation33_spill] sm:$0xff] %v12351_v46  ;;  %v12356_v43 = vsub.f32 %v13924_v3, %v13935_v29  ;;  %v5256_v50 = vand.u32 4294901760, %v5255_v62  ;;  %v13228_v34 = vand.u32 4294901760, %v12218_v51  ;;  %v13231_v3 = vand.u32 4294901760, %v12221_v60 }
 0xe21   : > { %v5262_v53 = vsub.f32 %v12215_v57, %v13937_v58  ;;  %v13232_v15 = vand.u32 4294901760, %v12233_v30  ;;  %v13938_v41 = vand.u32 4294901760, %v13925_v31  ;;  %v12376_v52 = vpack.c.bf16 %v5375_v1, %v5368_v5 }
 0xe22   : > { %13936 = vst [vmem:[#allocation34_spill] sm:$0xff] %v12356_v43  ;;  %v13233_v25 = vand.u32 4294901760, %v12236_v10  ;;  %v13940_v35 = vand.u32 4294901760, %v13926_v22  ;;  %v5381_v62 = vsub.f32 %v12218_v51, %v13228_v34  ;;  %v5388_v26 = vsub.f32 %v12221_v60, %v13231_v3 }
 0xe23   : > { %v12374_v29 = vsub.f32 %v13925_v31, %v13938_v41  ;;  %v5263_v11 = vand.u32 4294901760, %v5262_v53  ;;  %v5269_v31 = vsub.f32 %v12233_v30, %v13232_v15  ;;  %v13239_v53 = vand.u32 4294901760, %v12254_v42 }
 0xe24   : > { %v12382_v58 = vsub.f32 %v13926_v22, %v13940_v35  ;;  %v5276_v1 = vsub.f32 %v12236_v10, %v13233_v25  ;;  %v13234_v22 = vand.u32 4294901760, %v12251_v59  ;;  %v5382_v41 = vand.u32 4294901760, %v5381_v62 }
 0xe25   : > { %13939 = vst [vmem:[#allocation23_spill] sm:$0xff] %v12374_v29  ;;  %v12393_v5 = vpack.c.bf16 %v5263_v11, %v5256_v50  ;;  %v5389_v35 = vand.u32 4294901760, %v5388_v26  ;;  %v5270_v34 = vand.u32 4294901760, %v5269_v31  ;;  %v13245_v37 = vand.u32 4294901760, %v12297_v45 }
 0xe26   : > { %13941 = vst [vmem:[#allocation25_spill] sm:$0xff] %v12382_v58  ;;  %v5277_v3 = vand.u32 4294901760, %v5276_v1  ;;  %v5395_v15 = vsub.f32 %v12251_v59, %v13234_v22  ;;  %v5402_v50 = vsub.f32 %v12254_v42, %v13239_v53  ;;  %v13244_v11 = vand.u32 4294901760, %v12319_v18 }
 0xe27   : > { %v12408_v25 = vpack.c.bf16 %v5389_v35, %v5382_v41  ;;  %v5283_v26 = vsub.f32 %v12297_v45, %v13245_v37  ;;  %v13248_v36 = vand.u32 4294901760, %v12351_v46  ;;  %v13249_v53 = vand.u32 4294901760, %v12356_v43 }
 0xe28   : > { %v12413_v62 = vpack.c.bf16 %v5277_v3, %v5270_v34  ;;  %v5396_v31 = vand.u32 4294901760, %v5395_v15  ;;  %v5403_v1 = vand.u32 4294901760, %v5402_v50  ;;  %v5290_v22 = vsub.f32 %v12319_v18, %v13244_v11 }
 0xe29   : > { %v5284_v12 = vand.u32 4294901760, %v5283_v26  ;;  %v13250_v41 = vand.u32 4294901760, %v12374_v29  ;;  %v13251_v39 = vand.u32 4294901760, %v12382_v58  ;;  %v5409_v34 = vsub.f32 %v12351_v46, %v13248_v36 }
 0xe2a   : > { %v8452_v35 = vpack.c.bf16 %v5403_v1, %v5396_v31  ;;  %v5291_v38 = vand.u32 4294901760, %v5290_v22  ;;  %v5416_v3 = vsub.f32 %v12356_v43, %v13249_v53  ;;  %v8460_v36 = vpack.c.bf16 %v12144_v44, %v12139_v33 }
 0xe2b   : > { %v5297_v15 = vsub.f32 %v12374_v29, %v13250_v41  ;;  %v5304_v26 = vsub.f32 %v12382_v58, %v13251_v39  ;;  %v5410_v22 = vand.u32 4294901760, %v5409_v34  ;;  %v8462_v53 = vpack.c.bf16 %v12150_v17, %v12147_v63 }
 0xe2c   : > { %v8454_v50 = vpack.c.bf16 %v5291_v38, %v5284_v12  ;;  %v5417_v31 = vand.u32 4294901760, %v5416_v3  ;;  %v8464_v41 = vpack.c.bf16 %v12158_v32, %v12155_v54  ;;  %v8466_v38 = vpack.c.bf16 %v12167_v13, %v12164_v9 }
 0xe2d   : > { %v5298_v1 = vand.u32 4294901760, %v5297_v15  ;;  %v5305_v11 = vand.u32 4294901760, %v5304_v26  ;;  %v8468_v12 = vpack.c.bf16 %v12176_v27, %v12173_v19  ;;  %v8470_v34 = vpack.c.bf16 %v12184_v28, %v12179_v48 }
 0xe2e   : > { %v8456_v37 = vpack.c.bf16 %v5417_v31, %v5410_v22  ;;  %v8474_v3 = vpack.c.bf16 %v12202_v20, %v12199_v23  ;;  %v8476_v15 = vpack.c.bf16 %v12208_v4, %v12205_v21  ;;  %v8478_v26 = vpack.c.bf16 %v12215_v57, %v12212_v40 }
 0xe2f   : > { %v8458_v49 = vpack.c.bf16 %v5305_v11, %v5298_v1  ;;  %v8472_v11 = vpack.c.bf16 %v12190_v8, %v12187_v14  ;;  %v8480_v22 = vpack.c.bf16 %v12221_v60, %v12218_v51  ;;  %v8482_v31 = vpack.c.bf16 %v12236_v10, %v12233_v30 }
 0xe30   : > { %v8484_v1 = vpack.c.bf16 %v12254_v42, %v12251_v59  ;;  %v8486_v39 = vpack.c.bf16 %v12319_v18, %v12297_v45  ;;  %v8488_v20 = vpack.c.bf16 %v12356_v43, %v12351_v46  ;;  %v8490_v4 = vpack.c.bf16 %v12382_v58, %v12374_v29 }
 0xe31   : > { %v5074_v57 = vcvt.f32.s32 %v12128_v7  ;;  %v13942_v43 = vmov 0.0   ;;  %v13943_v42 = vmov 1.0  }
 0xe33   : > { %v5075_v21 = vshll.u32 %v5074_v57, 16 }
 0xe95   : > { %v5072_v40 = vpop.xlane.xlu0 %5071 }
 0xe96   : > { %v5073_v60 = vcvt.f32.s32 %v5072_v40 }
 0xe98   : > { %v12467_v51 = vadd.s32 %v5075_v21, %v5073_v60 }
 0xe9a   : > { %vm5077_vm6 = vcmp.eq.s32.totalorder %v13872_v6, %v12467_v51  ;;  %vm5078_vm7 = vcmp.eq.s32.totalorder %v13873_v0, %v12467_v51  ;;  %5946 = vst.msk [vmem:[%s10072_s15] sm:$0xff] %vm5945_vm4, %v12467_v51  ;;  %s214_s15 = sand.u32 1, %s8714_s19  }
 0xe9b   : > { %v6182_v58 = vsel %vm5077_vm6, 1.0, %v13942_v43  ;;  %v6183_v7 = vsel %vm5078_vm7, 1.0, %v13942_v43  ;;  %v13959_v43 = vand.u32 4294901760, %v12139_v33  ;;  %v13966_v33 = vand.u32 4294901760, %v12164_v9  ;;  %s6096_s23 = sshll.u32 %s214_s15, 3  ;;  %s5958_s10 = scalar_lea.sflag [#allocation3], %s214_s15 }
 0xe9c   : > { %v12483_v21 = vsub.f32 %v6182_v58, %v6182_v58  ;;  %v5180_v40 = vsub.f32 %v6183_v7, %v6183_v7  ;;  %v13963_v58 = vand.u32 4294901760, %v12150_v17  ;;  %v13973_v9 = vand.u32 4294901760, %v12190_v8  ;;  %v13985_v8 = vld [vmem:[#allocation44_spill] sm:$0xff]  ;;  %s216_s25 = scalar_lea.vmem [#allocation2], %s6096_s23 }
 0xe9d   : > { %s5979_s30 = sshll.u32 %s216_s25, 4  ;;  %s5980_s30 = int_to_ptr.vmem [resolvable:$true] %s5979_s30 }
 0xe9e   : > { %v5181_v57 = vand.u32 4294901760, %v5180_v40  ;;  %v5187_v60 = vand.u32 4294901760, %v12483_v21  ;;  %p8667_p0 = scmp.lt.s32.totalorder %s5980_s30, %s8665_s12 }
 0xea0   : > { %v5182_v29 = vsub.f32 %v5180_v40, %v5181_v57  ;;  %v5188_v46 = vsub.f32 %v12483_v21, %v5187_v60 }
 0xea2   : > { %v5183_v18 = vand.u32 4294901760, %v5182_v29  ;;  %v5189_v45 = vand.u32 4294901760, %v5188_v46  ;;  %v13958_v46 = vld [vmem:[#allocation46_spill] sm:$0xff] }
 0xea4   : > { %5184 = vmatprep.mubr.f32.mxu1 %v5183_v18  ;;  %v13955_v18 = vld [vmem:[#allocation48_spill] sm:$0xff] }
 0xea5   : > { %5190 = vmatmul.mubr.f32.vlgmr.msra.gmra.mrb[18].mxu1 %v5189_v45  ;;  %v13947_v45 = vld [vmem:[#allocation52_spill] sm:$0xff] }
 0xea6   : > { %8431 = vmatpush3.bf16.msra.mxu1 %v12287_v2  ;;  %6184 = vmatprep.mubr.msk.f32.mxu1 %vm5078_vm7, %v13943_v42  ;;  %v13948_v2 = vld [vmem:[#allocation53_spill] sm:$0xff] }
 0xea7   : > { %8433 = vmatprep.subr.bf16.mxu1 %v12299_v61  ;;  %v13950_v61 = vld [vmem:[#allocation56_spill] sm:$0xff] }
 0xeaa   : > { %8435 = vmatpush3.bf16.msra.mxu1 %v12305_v47  ;;  %v13954_v47 = vld [vmem:[#allocation39_spill] sm:$0xff] }
 0xeab   : > { %8437 = vmatprep.subr.bf16.mxu1 %v12325_v55  ;;  %v13949_v55 = vld [vmem:[#allocation55_spill] sm:$0xff] }
 0xeae   : > { %8439 = vmatpush3.bf16.msra.mxu1 %v12338_v16  ;;  %v13957_v16 = vld [vmem:[#allocation54_spill] sm:$0xff] }
 0xeaf   : > { %8441 = vmatprep.subr.bf16.mxu1 %v12358_v24  ;;  %v13960_v24 = vand.u32 4294901760, %v12144_v44  ;;  %v13967_v44 = vand.u32 4294901760, %v12167_v13  ;;  %v13974_v13 = vand.u32 4294901760, %v12199_v23 }
 0xeb1   : > { %v8524_v29 = vpack.c.bf16 %v13960_v24, %v13959_v43  ;;  %v13990_v43 = vand.u32 4294901760, %v12236_v10  ;;  %v14002_v10 = vld [vmem:[#allocation23_spill] sm:$0xff] }
 0xeb2   : > { %8443 = vmatpush3.bf16.msra.mxu1 %v12363_v56  ;;  %v13956_v56 = vld [vmem:[#allocation50_spill] sm:$0xff] }
 0xeb3   : > { %8445 = vmatprep.subr.bf16.mxu1 %v12376_v52  ;;  %v13961_v52 = vld [vmem:[#allocation12_spill] sm:$0xff] }
 0xeb6   : > { %8447 = vmatpush3.bf16.msra.mxu1 %v12393_v5 }
 0xeb7   : > { %8449 = vmatprep.subr.bf16.mxu1 %v12408_v25  ;;  %v13962_v25 = vand.u32 4294901760, %v12147_v63  ;;  %v8530_v63 = vpack.c.bf16 %v13967_v44, %v13966_v33 }
 0xeb9   : > { %v8526_v5 = vpack.c.bf16 %v13963_v58, %v13962_v25  ;;  %v13992_v25 = vld [vmem:[#allocation15_spill] sm:$0xff] }
 0xeba   : > { %8451 = vmatpush3.bf16.msra.mxu1 %v12413_v62  ;;  %v13965_v62 = vand.u32 4294901760, %v12158_v32  ;;  %v13969_v32 = vand.u32 4294901760, %v12176_v27  ;;  %v13977_v27 = vld [vmem:[#allocation59_spill] sm:$0xff]  ;;  %v13993_v58 = vand.u32 4294901760, %v13992_v25 }
 0xebb   : > { %8453 = vmatprep.subr.bf16.mxu1 %v8452_v35  ;;  %v13970_v35 = vand.u32 4294901760, %v12179_v48 }
 0xebe   : > { %8455 = vmatpush3.bf16.msra.mxu1 %v8454_v50  ;;  %v13971_v50 = vand.u32 4294901760, %v12184_v28  ;;  %v13981_v28 = vld [vmem:[#allocation63_spill] sm:$0xff] }
 0xebf   : > { %8457 = vmatprep.subr.bf16.mxu1 %v8456_v37  ;;  %v13946_v37 = vld [vmem:[#allocation47_spill] sm:$0xff] }
 0xec2   : > { %8459 = vmatpush3.bf16.msra.mxu1 %v8458_v49  ;;  %v13944_v49 = vld [vmem:[#allocation40_spill] sm:$0xff] }
 0xec3   : > { %8461 = vmatprep.subr.bf16.mxu1 %v8460_v36  ;;  %v13945_v36 = vld [vmem:[#allocation42_spill] sm:$0xff] }
 0xec5   : > { %6185 = vmatmul.mubr.msk.f32.vlgmr.msra.gmra.mrb[20].mxu1 %vm5077_vm6, %v13943_v42 }
 0xec6   : > { %8463 = vmatpush3.bf16.msra.mxu1 %v8462_v53  ;;  %5557 = vmatprep.mubr.f32.mxu1 %v5180_v40  ;;  %v13964_v53 = vand.u32 4294901760, %v12155_v54  ;;  %v13968_v54 = vand.u32 4294901760, %v12173_v19  ;;  %v13987_v40 = vld [vmem:[#allocation13_spill] sm:$0xff] }
 0xec7   : > { %8465 = vmatprep.subr.bf16.mxu1 %v8464_v41  ;;  %v13988_v23 = vand.u32 4294901760, %v13987_v40 }
 0xec8   : > { %v8528_v41 = vpack.c.bf16 %v13965_v62, %v13964_v53  ;;  %v8532_v17 = vpack.c.bf16 %v13969_v32, %v13968_v54  ;;  %v13994_v53 = vld [vmem:[#allocation20_spill] sm:$0xff]  ;;  %v14000_v32 = vld [vmem:[#allocation34_spill] sm:$0xff] }
 0xec9   : > { %v13995_v62 = vand.u32 4294901760, %v13994_v53 }
 0xeca   : > { %8467 = vmatpush3.bf16.msra.mxu1 %v8466_v38  ;;  %v8534_v38 = vpack.c.bf16 %v13971_v50, %v13970_v35  ;;  %v14003_v35 = vand.u32 4294901760, %v14002_v10  ;;  %v14004_v50 = vld [vmem:[#allocation25_spill] sm:$0xff] }
 0xecb   : > { %8469 = vmatprep.subr.bf16.mxu1 %v8468_v12  ;;  %v13972_v12 = vand.u32 4294901760, %v12187_v14 }
 0xece   : > { %8471 = vmatpush3.bf16.msra.mxu1 %v8470_v34  ;;  %v8536_v34 = vpack.c.bf16 %v13973_v9, %v13972_v12 }
 0xecf   : > { %8473 = vmatprep.subr.bf16.mxu1 %v8472_v11  ;;  %v13975_v11 = vld [vmem:[#allocation58_spill] sm:$0xff] }
 0xed0   : > { %v13976_v19 = vand.u32 4294901760, %v13975_v11  ;;  %v14006_v11 = vld [vmem:[#allocation36_spill] sm:$0xff] }
 0xed2   : > { %8475 = vmatpush3.bf16.msra.mxu1 %v8474_v3  ;;  %v8538_v3 = vpack.c.bf16 %v13976_v19, %v13974_v13  ;;  %v5953_v13 = vld [vmem:[%s9345_s7] sm:$0xff]  ;;  %s8660_s7 = scalar_lea.vmem %s5980_s30, 128 }
 0xed3   : > { %8477 = vmatprep.subr.bf16.mxu1 %v8476_v15  ;;  %v13978_v15 = vand.u32 4294901760, %v13977_v27  ;;  %p8661_p11 = scmp.ne.s32.totalorder %s5980_s30, %s8660_s7  ;;  %p8668_p1 = scmp.lt.s32.totalorder %s8666_s13, %s8660_s7 }
 0xed5   : > { %p8662_p12 = pnand %p8661_p11, %p8795_p5  ;;  %p8669_p2 = por %p8668_p1, %p8667_p0 }
 0xed6   : > { %8479 = vmatpush3.bf16.msra.mxu1 %v8478_v26  ;;  %v13979_v26 = vld [vmem:[#allocation62_spill] sm:$0xff] }
 0xed7   : > { %8481 = vmatprep.subr.bf16.mxu1 %v8480_v22  ;;  %v13980_v48 = vand.u32 4294901760, %v13979_v26  ;;  %p8663_p13 = pneg %p8662_p12 }
 0xed9   : > { %v8540_v22 = vpack.c.bf16 %v13980_v48, %v13978_v15  ;;  %p8670_p3 = pnand %p8669_p2, %p8663_p13 }
 0xeda   : > { %8483 = vmatpush3.bf16.msra.mxu1 %v8482_v31  ;;  %v13982_v31 = vand.u32 4294901760, %v13981_v28 }
 0xedb   : > { %8485 = vmatprep.subr.bf16.mxu1 %v8484_v1  ;;  %v13983_v1 = vld [vmem:[#allocation69_spill] sm:$0xff] }
 0xedc   : > { %v13984_v14 = vand.u32 4294901760, %v13983_v1 }
 0xede   : > { %8487 = vmatpush3.bf16.msra.mxu1 %v8486_v39  ;;  %v13951_v39 = vld [vmem:[#allocation35_spill] sm:$0xff]  ;;  %v8542_v7 = vpack.c.bf16 %v13984_v14, %v13982_v31 }
 0xedf   : > { %8489 = vmatprep.subr.bf16.mxu1 %v8488_v20  ;;  %v13952_v20 = vld [vmem:[#allocation37_spill] sm:$0xff] }
 0xee2   : > { %8491 = vmatpush3.bf16.msra.mxu1 %v8490_v4  ;;  %v13953_v4 = vld [vmem:[#allocation38_spill] sm:$0xff] }
 0xee3   : > { %8493 = vmatprep.subr.bf16.mxu1 %v13944_v49 }
 0xee5   : > { %5560 = vmatmul.mubr.f32.vlgmr.msra.gmra.mrb[22].mxu1 %v12483_v21  ;;  %v13986_v21 = vand.u32 4294901760, %v13985_v8 }
 0xee6   : > { %8495 = vmatpush3.bf16.msra.mxu1 %v13945_v36  ;;  %5664 = vmatprep.mubr.f32.mxu1 %v5181_v57 }
 0xee7   : > { %8497 = vmatprep.subr.bf16.mxu1 %v13946_v37  ;;  %v8544_v57 = vpack.c.bf16 %v13988_v23, %v13986_v21 }
 0xeea   : > { %8499 = vmatpush3.bf16.msra.mxu1 %v13947_v45 }
 0xeeb   : > { %8501 = vmatprep.subr.bf16.mxu1 %v13948_v2 }
 0xeee   : > { %8503 = vmatpush3.bf16.msra.mxu1 %v13949_v55 }
 0xeef   : > { %8505 = vmatprep.subr.bf16.mxu1 %v13950_v61 }
 0xef2   : > { %8507 = vmatpush3.bf16.msra.mxu1 %v13951_v39 }
 0xef3   : > { %8509 = vmatprep.subr.bf16.mxu1 %v13952_v20 }
 0xef6   : > { %8511 = vmatpush3.bf16.msra.mxu1 %v13953_v4 }
 0xef7   : > { %8513 = vmatprep.subr.bf16.mxu1 %v13954_v47 }
 0xefa   : > { %8515 = vmatpush3.bf16.msra.mxu1 %v13955_v18 }
 0xefb   : > { %8517 = vmatprep.subr.bf16.mxu1 %v13956_v56 }
 0xefe   : > { %8519 = vmatpush3.bf16.msra.mxu1 %v13957_v16 }
 0xeff   : > { %8521 = vmatprep.subr.bf16.mxu1 %v13958_v46 }
 0xf02   : > { %8523 = vmatpush3.bf16.msra.mxu1 %v13961_v52 }
 0xf03   : > { %8525 = vmatprep.subr.bf16.mxu1 %v8524_v29  ;;  %v13991_v29 = vand.u32 4294901760, %v12251_v59  ;;  %v14005_v59 = vand.u32 4294901760, %v14004_v50 }
 0xf05   : > { %5668 = vmatmul.mubr.f32.vlgmr.msra.gmra.mrb[24].mxu1 %v5187_v60  ;;  %v13989_v60 = vand.u32 4294901760, %v12233_v30  ;;  %v14001_v30 = vand.u32 4294901760, %v14000_v32 }
 0xf06   : > { %8527 = vmatpush3.bf16.msra.mxu1 %v8526_v5  ;;  %6186 = vmatprep.mubr.msk.f32.mxu1 %vm5078_vm7, %v13943_v42  ;;  %v8548_v5 = vpack.c.bf16 %v13993_v58, %v13991_v29 }
 0xf07   : > { %8529 = vmatprep.subr.bf16.mxu1 %v8528_v41  ;;  %v8546_v24 = vpack.c.bf16 %v13990_v43, %v13989_v60  ;;  %v13996_v41 = vld [vmem:[#allocation21_spill] sm:$0xff] }
 0xf08   : > { %v13997_v33 = vand.u32 4294901760, %v13996_v41 }
 0xf0a   : > { %8531 = vmatpush3.bf16.msra.mxu1 %v8530_v63  ;;  %v8550_v44 = vpack.c.bf16 %v13997_v33, %v13995_v62  ;;  %v13998_v63 = vld [vmem:[#allocation33_spill] sm:$0xff] }
 0xf0b   : > { %8533 = vmatprep.subr.bf16.mxu1 %v8532_v17  ;;  %v13999_v54 = vand.u32 4294901760, %v13998_v63 }
 0xf0d   : > { %v8552_v17 = vpack.c.bf16 %v14001_v30, %v13999_v54 }
 0xf0e   : > { %8535 = vmatpush3.bf16.msra.mxu1 %v8534_v38  ;;  %v8554_v38 = vpack.c.bf16 %v14005_v59, %v14003_v35 }
 0xf0f   : > { %8537 = vmatprep.subr.bf16.mxu1 %v8536_v34 }
 0xf12   : > { %8539 = vmatpush3.bf16.msra.mxu1 %v8538_v3 }
 0xf13   : > { %8541 = vmatprep.subr.bf16.mxu1 %v8540_v22 }
 0xf16   : > { %8543 = vmatpush3.bf16.msra.mxu1 %v8542_v7 }
 0xf17   : > { %8545 = vmatprep.subr.bf16.mxu1 %v8544_v57 }
 0xf1a   : > { %8547 = vmatpush3.bf16.msra.mxu1 %v8546_v24 }
 0xf1b   : > { %8549 = vmatprep.subr.bf16.mxu1 %v8548_v5 }
 0xf1e   : > { %8551 = vmatpush3.bf16.msra.mxu1 %v8550_v44 }
 0xf1f   : > { %8553 = vmatprep.subr.bf16.mxu1 %v8552_v17 }
 0xf22   : > { %8555 = vmatpush3.bf16.msra.mxu1 %v8554_v38 }
 0xf23   : > { %8557 = vmatprep.subr.bf16.mxu1 %v13944_v49 }
 0xf25   : > { %6187 = vmatmul.mubr.msk.f32.vlgmr.msra.gmra.mrb[26].mxu1 %vm5077_vm6, %v13943_v42 }
 0xf26   : > { %8559 = vmatpush3.bf16.msra.mxu1 %v13945_v36  ;;  %6188 = vmatprep.mubr.msk.f32.mxu1 %vm5078_vm7, %v13943_v42 }
 0xf27   : > { %8561 = vmatprep.subr.bf16.mxu1 %v13946_v37 }
 0xf2a   : > { %8563 = vmatpush3.bf16.msra.mxu1 %v13947_v45 }
 0xf2b   : > { %8565 = vmatprep.subr.bf16.mxu1 %v13948_v2 }
 0xf2e   : > { %8567 = vmatpush3.bf16.msra.mxu1 %v13949_v55 }
 0xf2f   : > { %8569 = vmatprep.subr.bf16.mxu1 %v13950_v61 }
 0xf32   : > { %8571 = vmatpush3.bf16.msra.mxu1 %v13951_v39 }
 0xf33   : > { %8573 = vmatprep.subr.bf16.mxu1 %v13952_v20 }
 0xf36   : > { %8575 = vmatpush3.bf16.msra.mxu1 %v13953_v4 }
 0xf37   : > { %8577 = vmatprep.subr.bf16.mxu1 %v13954_v47 }
 0xf3a   : > { %8579 = vmatpush3.bf16.msra.mxu1 %v13955_v18 }
 0xf3b   : > { %8581 = vmatprep.subr.bf16.mxu1 %v13956_v56 }
 0xf3e   : > { %8583 = vmatpush3.bf16.msra.mxu1 %v13957_v16 }
 0xf3f   : > { %8585 = vmatprep.subr.bf16.mxu1 %v13958_v46 }
 0xf42   : > { %8587 = vmatpush3.bf16.msra.mxu1 %v13961_v52 }
 0xf45   : > { %6189 = vmatmul.mubr.msk.f32.vlgmr.msra.gmra.mrb[28].mxu1 %vm5077_vm6, %v13943_v42 }
 0xf78   : > { %v7258_v0 = vpop.f32.mrb[18].mxu1 }
 0xf79   : > { %v7259_v49 = vpop.f32.mrb[19].mxu1 }
 0xf7a   : > { %v7260_v36 = vadd.f32 %v7259_v49, %v7258_v0 }
 0xf98   : > { %v7293_v37 = vpop.f32.mrb[20].mxu1 }
 0xf99   : > { %v7294_v45 = vpop.f32.mrb[21].mxu1 }
 0xf9a   : > { %v7295_v2 = vadd.f32 %v7294_v45, %v7293_v37 }
 0xf9c   : > { %v5424_v55 = vadd.f32 %v7295_v2, %v7260_v36 }
 0xfb8   : > { %v7328_v61 = vpop.f32.mrb[22].mxu1 }
 0xfb9   : > { %v7329_v39 = vpop.f32.mrb[23].mxu1 }
 0xfba   : > { %v7330_v20 = vadd.f32 %v7329_v39, %v7328_v61 }
 0xfbc   : > { %v5562_v4 = vadd.f32 %v7330_v20, %v5424_v55 }
 0xfd8   : > { %v7363_v47 = vpop.f32.mrb[24].mxu1 }
 0xfd9   : > { %v7364_v18 = vpop.f32.mrb[25].mxu1 }
 0xfda   : > { %v7365_v56 = vadd.f32 %v7364_v18, %v7363_v47 }
 0xfdc   : > { %v5670_v16 = vadd.f32 %v7365_v56, %v5562_v4 }
 0xff8   : > { %v7398_v46 = vpop.f32.mrb[26].mxu1 }
 0xff9   : > { %v7399_v6 = vpop.f32.mrb[27].mxu1 }
 0xffa   : > { %v7400_v51 = vadd.f32 %v7399_v6, %v7398_v46 }
 0xffc   : > { %v5838_v42 = vadd.f32 %v7400_v51, %v5670_v16 }
0x1018   : > { %v7433_v52 = vpop.f32.mrb[28].mxu1 }
0x1019   : > { %v7434_v12 = vpop.f32.mrb[29].mxu1 }
0x101a   : > { %v7435_v9 = vadd.f32 %v7434_v12, %v7433_v52 }
0x101c   : > { %v5942_v34 = vadd.f32 %v7435_v9, %v5838_v42 }
0x101e   : > { %v5947_v19 = vsub.f32 %v14006_v11, %v5942_v34 }
0x1020   : > { %v5948_v3 = vmul.f32 %v5947_v19, %v5947_v19  ;;  %v5954_v27 = vsub.f32 %v5953_v13, %v5947_v19 }
0x1022   : > { %v5949_v15 = vsel %vm278_vm0, %v5948_v3, 0.0  ;;  %5955 = vst.msk [vmem:[%s216_s25] sm:$0xff] %vm278_vm0, %v5954_v27 }
0x1023   : > { %5950 = vadd.xlane.f32.xlu1 %v5949_v15 }
0x1024   : > { %8673 = shalt.err (!%p8670_p3)
}
0x1025   : > { %s8674_s22 = scalar_lea.hbm %s12632_s9, 128  ;;  %s8678_s15 = scalar_lea.hbm %s12676_s3, 256 }
0x1026   : > { %p8675_p4 = scmp.ne.s32.totalorder %s12632_s9, %s8674_s22  ;;  %p8679_p9 = scmp.lt.u32.totalorder %s12632_s9, %s12676_s3 }
0x1027   : > { %p8680_p10 = scmp.lt.u32.totalorder %s8678_s15, %s8674_s22  ;;  %p8682_p12 = scmp.lt.u32.totalorder %s8674_s22, %s12632_s9 }
0x1028   : > { %p8676_p7 = pnand %p8675_p4, %p8795_p5 }
0x1029   : > { %p8681_p11 = por %p8680_p10, %p8679_p9 }
0x102a   : > { %p8677_p8 = pneg %p8676_p7 }
0x102b   : > { %p8683_p13 = por %p8682_p12, %p8681_p11 }
0x102d   : > { %p8684_p0 = pnand %p8683_p13, %p8677_p8 }
0x102f   : > { %8687 = shalt.err (!%p8684_p0)
}
0x1030   : > { %8618 = dma.vmem_to_hbm [thread:$0]  (%p8795_p5), %s5980_s30, 128, %s12632_s9, %s5958_s10   ;;  %v2145_v26 = vpop.xlane.xlu1 %2144  ;;  %v4048_v48 = vpop.xlane.xlu0 %4047 }
0x1031   : > { %v4049_v22 = vadd.f32 %v4048_v48, %v2145_v26  ;;  %s240_s8 = scalar_lea.vmem %s12678_s5, %s9287_s14 }
0x10b0   : > { %v5951_v28 = vpop.xlane.xlu1 %5950 }
0x10b1   : > { %v5952_v31 = vadd.f32 %v5951_v28, %v4049_v22 }
0x10b3   : > { %5956 = vst.msk [vmem:[%s240_s8] sm:$0xff] %vm2139_vm5, %v5952_v31 }
0x10b4 PF: > { %p8624_p1 = scmp.ge.s32.totalorder %s8722_s21, 2  ;;  %s5997_s28 = sand.u32 1, %s8710_s18  }
0x10b5   : > { %s5998_s30 = scalar_lea.sflag [#allocation3], %s5997_s28 }
0x10b6   : > { %p8621_p2 = pnand %p8624_p1, %p8799_p6 }
0x10b8   : > { %8705 = dma.done.wait (!%p8621_p2), %s5998_s30, 128  }
0x10b9   : > { %8707 = vsyncadd (!%p8621_p2), %s5998_s30, 4294967168  ;;  %p16_p5 = scmp.ge.s32.totalorder %s8782_s24, 4   ;;  %s14007_s18 = smov %s8714_s19 }
0x10ba   : > { %s14008_s19 = smov %s8718_s20  ;;  %s14009_s20 = smov %s8793_s27 }
0x10bb   : > { %s14010_s21 = smov %s8782_s24  ;;  %18 = sbr.rel (!%p16_p5) target bundleno = 3 (0x3), region = 95 }
0x10c2   :  { %6017 = vsyncpa [#allocation3], 1 }
0x10c3   :  { %6019 = vsyncpa [#allocation3 + $0x1], 1 }

</bundles_post_ra>
